<compile_context>
chip_gen: v7x
topology: tpu7x:2x2x1
jax: 0.10.0
libtpu: 0.0.40
codegen_flags: <defaults>
</compile_context>

<pallas_src>
import functools

import jax
import jax.numpy as jnp
from jax import lax
from jax.experimental import pallas as pl
from jax.experimental.pallas import tpu as pltpu


# ---------------------------------------------------------------------------
# Kernel 1: fused vision embedding (patch matmul + CLS + pos-emb + pre-LN)
# ---------------------------------------------------------------------------
def _vision_embed_kernel(patch_ref, pw_ref, cls_ref, pos_ref, g_ref, b_ref, o_ref):
    def ln(x):
        mu = jnp.mean(x, axis=-1, keepdims=True)
        var = jnp.mean((x - mu) ** 2, axis=-1, keepdims=True)
        return (x - mu) * lax.rsqrt(var + 1e-5) * g_ref[...] + b_ref[...]

    # (n_patches, C*P*P) @ (C*P*P, Dv) -> (n_patches, Dv); bf16 MXU, f32 acc.
    pe = jnp.dot(patch_ref[0].astype(jnp.bfloat16), pw_ref[...],
                 preferred_element_type=jnp.float32)
    o_ref[0, :1, :] = ln(cls_ref[...] + pos_ref[:1, :])
    o_ref[0, 1:, :] = ln(pe + pos_ref[1:, :])


def vision_embed(patches, p, cfg):
    B, n_patches, cpp = patches.shape
    Dv = cfg["Dv"]
    Sv = n_patches + 1
    return pl.pallas_call(
        _vision_embed_kernel,
        out_shape=jax.ShapeDtypeStruct((B, Sv, Dv), jnp.float32),
        grid=(B,),
        in_specs=[
            pl.BlockSpec((1, n_patches, cpp), lambda b: (b, 0, 0)),
            pl.BlockSpec((cpp, Dv), lambda b: (0, 0)),
            pl.BlockSpec((1, Dv), lambda b: (0, 0)),
            pl.BlockSpec((Sv, Dv), lambda b: (0, 0)),
            pl.BlockSpec((1, Dv), lambda b: (0, 0)),
            pl.BlockSpec((1, Dv), lambda b: (0, 0)),
        ],
        out_specs=pl.BlockSpec((1, Sv, Dv), lambda b: (b, 0, 0)),
        compiler_params=pltpu.CompilerParams(dimension_semantics=("parallel",)),
    )(patches, p["v_patch_w"],
      p["v_class_emb"].reshape(1, Dv), p["v_pos_emb"],
      p["v_pre_ln_g"].reshape(1, Dv), p["v_pre_ln_b"].reshape(1, Dv))


# ---------------------------------------------------------------------------
# Kernel 2: fused transformer encoder layer (pre-LN CLIP block)
# ---------------------------------------------------------------------------
def _encoder_layer_kernel(*refs, n_heads, causal):
    if causal:
        lens_ref = refs[0]
        refs = refs[1:]
    (h_ref, ln1_g, ln1_b, wq, bq, wk, bk, wv, bv, wo, bo,
     ln2_g, ln2_b, w1, b1, w2, b2, o_ref) = refs

    x = h_ref[0]                               # (S, D) f32 residual stream
    S, D = x.shape
    dh = D // n_heads
    scale = dh ** -0.5

    def ln(v, g, b):
        mu = jnp.mean(v, axis=-1, keepdims=True)
        var = jnp.mean((v - mu) ** 2, axis=-1, keepdims=True)
        return (v - mu) * lax.rsqrt(var + 1e-5) * g[...] + b[...]

    # ---- LN1 + QKV projections (bf16 MXU, f32 accumulate) ----
    hn = ln(x, ln1_g, ln1_b).astype(jnp.bfloat16)
    q = jnp.dot(hn, wq[...], preferred_element_type=jnp.float32) + bq[...]
    k = jnp.dot(hn, wk[...], preferred_element_type=jnp.float32) + bk[...]
    v = jnp.dot(hn, wv[...], preferred_element_type=jnp.float32) + bv[...]
    qb = (q * scale).astype(jnp.bfloat16)
    kb = k.astype(jnp.bfloat16)
    vb = v.astype(jnp.bfloat16)

    # ---- additive attention mask built in-kernel (no HBM bias tensor) ----
    if causal:
        length = lens_ref[pl.program_id(0)]
        row = lax.broadcasted_iota(jnp.int32, (S, S), 0)
        col = lax.broadcasted_iota(jnp.int32, (S, S), 1)
        bias = jnp.where((col <= row) & (col < length),
                         0.0, -1e9).astype(jnp.float32)
    else:
        bias = None

    # ---- multi-head attention; head outputs folded into O-projection ----
    wo_b = wo[...]                              # (D, D) bf16
    attn = jnp.zeros((S, D), jnp.float32)
    for h_i in range(n_heads):
        sl = slice(h_i * dh, (h_i + 1) * dh)
        s = lax.dot_general(qb[:, sl], kb[:, sl], (((1,), (1,)), ((), ())),
                            preferred_element_type=jnp.float32)       # (S, S)
        if bias is not None:
            s = s + bias
        s = s - jnp.max(s, axis=-1, keepdims=True)
        pexp = jnp.exp(s)
        pexp = pexp * pl.reciprocal(jnp.sum(pexp, axis=-1, keepdims=True),
                                    approx=True)
        o_h = jnp.dot(pexp.astype(jnp.bfloat16), vb[:, sl],
                      preferred_element_type=jnp.float32)              # (S, dh)
        attn = attn + jnp.dot(o_h.astype(jnp.bfloat16), wo_b[sl, :],
                              preferred_element_type=jnp.float32)      # (S, D)
    x = x + attn + bo[...]

    # ---- MLP: LN2 -> fc1 -> quick-GELU -> fc2 -> residual ----
    hn2 = ln(x, ln2_g, ln2_b).astype(jnp.bfloat16)
    m = jnp.dot(hn2, w1[...], preferred_element_type=jnp.float32) + b1[...]
    m = m * pl.reciprocal(1.0 + jnp.exp(-1.702 * m), approx=True)      # quick-GELU
    m = jnp.dot(m.astype(jnp.bfloat16), w2[...],
                preferred_element_type=jnp.float32) + b2[...]
    o_ref[0] = x + m


def encoder_layer(h, p, n_heads, lens=None):
    B, S, D = h.shape
    mlp = p["fc1_w"].shape[1]
    causal = lens is not None

    kern = functools.partial(_encoder_layer_kernel, n_heads=n_heads, causal=causal)
    hmap = lambda b, *_: (b, 0, 0)
    wmap = lambda b, *_: (0, 0)

    wshapes = [(1, D), (1, D),                       # ln1 g/b
               (D, D), (1, D), (D, D), (1, D),       # q, k
               (D, D), (1, D), (D, D), (1, D),       # v, o
               (1, D), (1, D),                       # ln2 g/b
               (D, mlp), (1, mlp), (mlp, D), (1, D)]  # fc1, fc2
    in_specs = [pl.BlockSpec((1, S, D), hmap)] + [pl.BlockSpec(s, wmap) for s in wshapes]

    grid_spec = pltpu.PrefetchScalarGridSpec(
        num_scalar_prefetch=1 if causal else 0,
        grid=(B,),
        in_specs=in_specs,
        out_specs=pl.BlockSpec((1, S, D), hmap),
    )
    call = pl.pallas_call(
        kern,
        out_shape=jax.ShapeDtypeStruct((B, S, D), jnp.float32),
        grid_spec=grid_spec,
        compiler_params=pltpu.CompilerParams(dimension_semantics=("parallel",)),
    )
    args = (h,
            p["ln1_g"].reshape(1, D), p["ln1_b"].reshape(1, D),
            p["q_w"], p["q_b"].reshape(1, D),
            p["k_w"], p["k_b"].reshape(1, D),
            p["v_w"], p["v_b"].reshape(1, D),
            p["o_w"], p["o_b"].reshape(1, D),
            p["ln2_g"].reshape(1, D), p["ln2_b"].reshape(1, D),
            p["fc1_w"], p["fc1_b"].reshape(1, mlp),
            p["fc2_w"], p["fc2_b"].reshape(1, D))
    if causal:
        return call(lens, *args)
    return call(*args)


# ---------------------------------------------------------------------------
# Kernel 3: fused tail (LNs -> projections -> L2-norm -> mix -> classifier)
# ---------------------------------------------------------------------------
def _tail_kernel(pv_ref, pt_ref, vg, vb_, tg, tb, vproj, tproj,
                 w1, b1, w2, b2, o_ref):
    def ln(x, g, b):
        mu = jnp.mean(x, axis=-1, keepdims=True)
        var = jnp.mean((x - mu) ** 2, axis=-1, keepdims=True)
        return (x - mu) * lax.rsqrt(var + 1e-5) * g[...] + b[...]

    img = jnp.dot(ln(pv_ref[...], vg, vb_).astype(jnp.bfloat16), vproj[...],
                  preferred_element_type=jnp.float32)
    txt = jnp.dot(ln(pt_ref[...], tg, tb).astype(jnp.bfloat16), tproj[...],
                  preferred_element_type=jnp.float32)
    img = img * lax.rsqrt(jnp.sum(img * img, axis=-1, keepdims=True) + 1e-12)
    txt = txt * lax.rsqrt(jnp.sum(txt * txt, axis=-1, keepdims=True) + 1e-12)
    comb = img * 0.7 + txt * 0.3
    hcls = jnp.dot(comb.astype(jnp.bfloat16), w1[...],
                   preferred_element_type=jnp.float32) + b1[...]
    hcls = jnp.maximum(hcls, 0.0)
    # nn.Dropout(0.1) is identity in eval mode.
    o_ref[...] = jnp.dot(hcls.astype(jnp.bfloat16), w2[...],
                         preferred_element_type=jnp.float32) + b2[...]


def fused_tail(pooled_v, pooled_t, p, cfg):
    B, Dv = pooled_v.shape
    Dt = pooled_t.shape[1]
    proj, Hc, C = cfg["proj"], cfg["clf_hidden"], cfg["n_classes"]
    idx = lambda i: (0, 0)
    return pl.pallas_call(
        _tail_kernel,
        out_shape=jax.ShapeDtypeStruct((B, C), jnp.float32),
        grid=(1,),
        in_specs=[
            pl.BlockSpec((B, Dv), idx), pl.BlockSpec((B, Dt), idx),
            pl.BlockSpec((1, Dv), idx), pl.BlockSpec((1, Dv), idx),
            pl.BlockSpec((1, Dt), idx), pl.BlockSpec((1, Dt), idx),
            pl.BlockSpec((Dv, proj), idx), pl.BlockSpec((Dt, proj), idx),
            pl.BlockSpec((proj, Hc), idx), pl.BlockSpec((1, Hc), idx),
            pl.BlockSpec((Hc, C), idx), pl.BlockSpec((1, C), idx),
        ],
        out_specs=pl.BlockSpec((B, C), idx),
        compiler_params=pltpu.CompilerParams(dimension_semantics=("arbitrary",)),
    )(pooled_v, pooled_t,
      p["v_post_ln_g"].reshape(1, Dv), p["v_post_ln_b"].reshape(1, Dv),
      p["t_final_ln_g"].reshape(1, Dt), p["t_final_ln_b"].reshape(1, Dt),
      p["visual_proj_w"], p["text_proj_w"],
      p["clf_w1"], p["clf_b1"].reshape(1, Hc),
      p["clf_w2"], p["clf_b2"].reshape(1, C))


# ---------------------------------------------------------------------------
# Parameter init (deterministic, synthetic). Matmul weights stored in bf16.
# ---------------------------------------------------------------------------
def _dense_init(key, din, dout, scale=0.02):
    kw, kb = jax.random.split(key)
    w = (scale * jax.random.normal(kw, (din, dout), jnp.float32)).astype(jnp.bfloat16)
    b = scale * jax.random.normal(kb, (dout,), jnp.float32)
    return w, b


def _layer_init(key, d, mlp):
    ks = jax.random.split(key, 6)
    qw, qb = _dense_init(ks[0], d, d)
    kw_, kb_ = _dense_init(ks[1], d, d)
    vw, vb = _dense_init(ks[2], d, d)
    ow, ob = _dense_init(ks[3], d, d)
    f1w, f1b = _dense_init(ks[4], d, mlp)
    f2w, f2b = _dense_init(ks[5], mlp, d)
    return dict(
        q_w=qw, q_b=qb, k_w=kw_, k_b=kb_, v_w=vw, v_b=vb, o_w=ow, o_b=ob,
        fc1_w=f1w, fc1_b=f1b, fc2_w=f2w, fc2_b=f2b,
        ln1_g=jnp.ones((d,), jnp.float32), ln1_b=jnp.zeros((d,), jnp.float32),
        ln2_g=jnp.ones((d,), jnp.float32), ln2_b=jnp.zeros((d,), jnp.float32),
    )


def init_params(key, cfg):
    ks = jax.random.split(key, 16)
    Dv, Dt = cfg["Dv"], cfg["Dt"]
    P, C = cfg["patch"], cfg["C"]
    n_pos_v = (cfg["image_size"] // P) ** 2 + 1
    params = {}
    # vision tower (patch conv has no bias in CLIP)
    params["v_patch_w"] = (0.02 * jax.random.normal(
        ks[0], (C * P * P, Dv), jnp.float32)).astype(jnp.bfloat16)
    params["v_class_emb"] = 0.02 * jax.random.normal(ks[1], (Dv,), jnp.float32)
    params["v_pos_emb"] = 0.02 * jax.random.normal(ks[2], (n_pos_v, Dv), jnp.float32)
    params["v_pre_ln_g"] = jnp.ones((Dv,), jnp.float32)
    params["v_pre_ln_b"] = jnp.zeros((Dv,), jnp.float32)
    params["v_post_ln_g"] = jnp.ones((Dv,), jnp.float32)
    params["v_post_ln_b"] = jnp.zeros((Dv,), jnp.float32)
    params["v_layers"] = [
        _layer_init(k, Dv, cfg["mlp"]) for k in jax.random.split(ks[3], cfg["layers"])]
    params["visual_proj_w"] = (0.02 * jax.random.normal(
        ks[4], (Dv, cfg["proj"]), jnp.float32)).astype(jnp.bfloat16)
    # text tower
    params["t_tok_emb"] = 0.02 * jax.random.normal(ks[5], (cfg["vocab"], Dt), jnp.float32)
    params["t_pos_emb"] = 0.02 * jax.random.normal(ks[6], (cfg["L"], Dt), jnp.float32)
    params["t_layers"] = [
        _layer_init(k, Dt, cfg["mlp"]) for k in jax.random.split(ks[7], cfg["layers"])]
    params["t_final_ln_g"] = jnp.ones((Dt,), jnp.float32)
    params["t_final_ln_b"] = jnp.zeros((Dt,), jnp.float32)
    params["text_proj_w"] = (0.02 * jax.random.normal(
        ks[8], (Dt, cfg["proj"]), jnp.float32)).astype(jnp.bfloat16)
    # classifier: Linear -> ReLU -> Dropout(eval) -> Linear
    params["clf_w1"], params["clf_b1"] = _dense_init(ks[9], cfg["proj"], cfg["clf_hidden"])
    params["clf_w2"], params["clf_b2"] = _dense_init(ks[10], cfg["clf_hidden"], cfg["n_classes"])
    return params


# ---------------------------------------------------------------------------
# Full forward pass (CLIPFineTuner.forward semantics)
# ---------------------------------------------------------------------------
def clip_finetuner_forward(params, pixel_values, input_ids, attention_mask, cfg):
    B = pixel_values.shape[0]
    P, C, Hh = cfg["patch"], cfg["C"], cfg["heads"]

    # ---------------- vision tower ----------------
    n_side = cfg["image_size"] // P
    n_patches = n_side * n_side
    # NCHW -> patch rows (conv with stride==kernel == unfold + matmul)
    patches = pixel_values.reshape(B, C, n_side, P, n_side, P)
    patches = patches.transpose(0, 2, 4, 1, 3, 5).reshape(B, n_patches, C * P * P)
    h = vision_embed(patches, params, cfg)            # embeds + CLS + pos + pre-LN
    for lp in params["v_layers"]:
        h = encoder_layer(h, lp, Hh)                  # no attention mask for vision
    pooled_v = h[:, 0, :]                             # CLS token; post-LN fused into tail

    # ---------------- text tower ----------------
    tok = jnp.take(params["t_tok_emb"], input_ids, axis=0)    # (B, L, Dt) gather in glue
    ht = tok + params["t_pos_emb"][None]
    lens = jnp.sum(attention_mask, axis=-1).astype(jnp.int32)
    for lp in params["t_layers"]:
        ht = encoder_layer(ht, lp, Hh, lens=lens)     # causal + pad mask built in-kernel
    # TODO(synk): HF CLIP pools at the eos_token_id position; here we pool the
    # last attended token.
    pooled_t = ht[jnp.arange(B), lens - 1]            # final-LN fused into tail

    # ---------------- fused tail: LN -> proj -> L2-norm -> 0.7/0.3 mix -> head
    return fused_tail(pooled_v, pooled_t, params, cfg)


# ---------------------------------------------------------------------------
if __name__ == "__main__":
    cfg = dict(
        image_size=16, patch=8, C=3,      # 2x2 patches + CLS = 5 vision tokens
        Dv=32, Dt=32, heads=4, layers=2, mlp=64,
        proj=16, vocab=64, L=8,
        clf_hidden=64, n_classes=5,
    )
    B = 2

    root = jax.random.PRNGKey(0)
    k_params, k_pix, k_ids = jax.random.split(root, 3)

    params = init_params(k_params, cfg)
    pixel_values = jax.random.normal(
        k_pix, (B, cfg["C"], cfg["image_size"], cfg["image_size"]), jnp.float32)
    input_ids = jax.random.randint(k_ids, (B, cfg["L"]), 0, cfg["vocab"], dtype=jnp.int32)
    attention_mask = jnp.array([[1, 1, 1, 1, 1, 1, 0, 0],
                                [1, 1, 1, 1, 1, 1, 1, 1]], jnp.int32)

    fwd = jax.jit(lambda p, pv, ii, am: clip_finetuner_forward(p, pv, ii, am, cfg))
    logits = fwd(params, pixel_values, input_ids, attention_mask)
    jax.block_until_ready(logits)
    assert logits.shape == (B, cfg["n_classes"])
    print("KERNEL_OK")
</pallas_src>

<mosaic_0001>
module attributes {stable_mosaic.version = 11 : i64} {
  func.func @_encoder_layer_kernel(%arg0: i32, %arg1: memref<1x5x32xf32, #tpu.memory_space<vmem>>, %arg2: memref<1x32xf32, #tpu.memory_space<vmem>>, %arg3: memref<1x32xf32, #tpu.memory_space<vmem>>, %arg4: memref<32x32xbf16, #tpu.memory_space<vmem>>, %arg5: memref<1x32xf32, #tpu.memory_space<vmem>>, %arg6: memref<32x32xbf16, #tpu.memory_space<vmem>>, %arg7: memref<1x32xf32, #tpu.memory_space<vmem>>, %arg8: memref<32x32xbf16, #tpu.memory_space<vmem>>, %arg9: memref<1x32xf32, #tpu.memory_space<vmem>>, %arg10: memref<32x32xbf16, #tpu.memory_space<vmem>>, %arg11: memref<1x32xf32, #tpu.memory_space<vmem>>, %arg12: memref<1x32xf32, #tpu.memory_space<vmem>>, %arg13: memref<1x32xf32, #tpu.memory_space<vmem>>, %arg14: memref<32x64xbf16, #tpu.memory_space<vmem>>, %arg15: memref<1x64xf32, #tpu.memory_space<vmem>>, %arg16: memref<64x32xbf16, #tpu.memory_space<vmem>>, %arg17: memref<1x32xf32, #tpu.memory_space<vmem>>, %arg18: memref<1x5x32xf32, #tpu.memory_space<vmem>>) attributes {dimension_semantics = [#tpu.dimension_semantics<parallel>], iteration_bounds = array<i64: 2>, scalar_prefetch = 0 : i64, scratch_operands = 0 : i64, tpu.core_type = #tpu.core_type<tc>, window_params = [{transform_indices = @transform_0, window_bounds = array<i64: 1, 5, 32>}, {pipeline_mode = #tpu.pipeline_mode<synchronous>, transform_indices = @transform_1, window_bounds = array<i64: 1, 32>}, {pipeline_mode = #tpu.pipeline_mode<synchronous>, transform_indices = @transform_2, window_bounds = array<i64: 1, 32>}, {pipeline_mode = #tpu.pipeline_mode<synchronous>, transform_indices = @transform_3, window_bounds = array<i64: 32, 32>}, {pipeline_mode = #tpu.pipeline_mode<synchronous>, transform_indices = @transform_4, window_bounds = array<i64: 1, 32>}, {pipeline_mode = #tpu.pipeline_mode<synchronous>, transform_indices = @transform_5, window_bounds = array<i64: 32, 32>}, {pipeline_mode = #tpu.pipeline_mode<synchronous>, transform_indices = @transform_6, window_bounds = array<i64: 1, 32>}, {pipeline_mode = #tpu.pipeline_mode<synchronous>, transform_indices = @transform_7, window_bounds = array<i64: 32, 32>}, {pipeline_mode = #tpu.pipeline_mode<synchronous>, transform_indices = @transform_8, window_bounds = array<i64: 1, 32>}, {pipeline_mode = #tpu.pipeline_mode<synchronous>, transform_indices = @transform_9, window_bounds = array<i64: 32, 32>}, {pipeline_mode = #tpu.pipeline_mode<synchronous>, transform_indices = @transform_10, window_bounds = array<i64: 1, 32>}, {pipeline_mode = #tpu.pipeline_mode<synchronous>, transform_indices = @transform_11, window_bounds = array<i64: 1, 32>}, {pipeline_mode = #tpu.pipeline_mode<synchronous>, transform_indices = @transform_12, window_bounds = array<i64: 1, 32>}, {pipeline_mode = #tpu.pipeline_mode<synchronous>, transform_indices = @transform_13, window_bounds = array<i64: 32, 64>}, {pipeline_mode = #tpu.pipeline_mode<synchronous>, transform_indices = @transform_14, window_bounds = array<i64: 1, 64>}, {pipeline_mode = #tpu.pipeline_mode<synchronous>, transform_indices = @transform_15, window_bounds = array<i64: 64, 32>}, {pipeline_mode = #tpu.pipeline_mode<synchronous>, transform_indices = @transform_16, window_bounds = array<i64: 1, 32>}, {transform_indices = @transform_17, window_bounds = array<i64: 1, 5, 32>}]} {
    %c0 = arith.constant 0 : index
    %c0_0 = arith.constant 0 : index
    %c0_1 = arith.constant 0 : index
    %0 = vector.load %arg1[%c0, %c0_0, %c0_1] : memref<1x5x32xf32, #tpu.memory_space<vmem>>, vector<1x5x32xf32>
    %1 = vector.shape_cast %0 : vector<1x5x32xf32> to vector<5x32xf32>
    %cst = arith.constant dense<0.000000e+00> : vector<5xf32>
    %2 = vector.multi_reduction <add>, %1, %cst [1] : vector<5x32xf32> to vector<5xf32>
    %3 = vector.shape_cast %2 : vector<5xf32> to vector<5x1xf32>
    %cst_2 = arith.constant 3.200000e+01 : f32
    %4 = vector.broadcast %cst_2 : f32 to vector<5x1xf32>
    %5 = arith.divf %3, %4 : vector<5x1xf32>
    %6 = vector.broadcast %5 : vector<5x1xf32> to vector<5x32xf32>
    %7 = arith.subf %1, %6 : vector<5x32xf32>
    %8 = arith.mulf %7, %7 : vector<5x32xf32>
    %cst_3 = arith.constant dense<0.000000e+00> : vector<5xf32>
    %9 = vector.multi_reduction <add>, %8, %cst_3 [1] : vector<5x32xf32> to vector<5xf32>
    %10 = vector.shape_cast %9 : vector<5xf32> to vector<5x1xf32>
    %cst_4 = arith.constant 3.200000e+01 : f32
    %11 = vector.broadcast %cst_4 : f32 to vector<5x1xf32>
    %12 = arith.divf %10, %11 : vector<5x1xf32>
    %13 = vector.broadcast %5 : vector<5x1xf32> to vector<5x32xf32>
    %14 = arith.subf %1, %13 : vector<5x32xf32>
    %cst_5 = arith.constant 9.99999974E-6 : f32
    %15 = vector.broadcast %cst_5 : f32 to vector<5x1xf32>
    %16 = arith.addf %12, %15 : vector<5x1xf32>
    %17 = math.rsqrt %16 : vector<5x1xf32>
    %18 = vector.broadcast %17 : vector<5x1xf32> to vector<5x32xf32>
    %19 = arith.mulf %14, %18 : vector<5x32xf32>
    %c0_6 = arith.constant 0 : index
    %c0_7 = arith.constant 0 : index
    %20 = vector.load %arg2[%c0_6, %c0_7] : memref<1x32xf32, #tpu.memory_space<vmem>>, vector<1x32xf32>
    %21 = vector.broadcast %20 : vector<1x32xf32> to vector<5x32xf32>
    %22 = arith.mulf %19, %21 : vector<5x32xf32>
    %c0_8 = arith.constant 0 : index
    %c0_9 = arith.constant 0 : index
    %23 = vector.load %arg3[%c0_8, %c0_9] : memref<1x32xf32, #tpu.memory_space<vmem>>, vector<1x32xf32>
    %24 = vector.broadcast %23 : vector<1x32xf32> to vector<5x32xf32>
    %25 = arith.addf %22, %24 : vector<5x32xf32>
    %26 = arith.truncf %25 : vector<5x32xf32> to vector<5x32xbf16>
    %c0_10 = arith.constant 0 : index
    %c0_11 = arith.constant 0 : index
    %27 = vector.load %arg4[%c0_10, %c0_11] : memref<32x32xbf16, #tpu.memory_space<vmem>>, vector<32x32xbf16>
    %cst_12 = arith.constant dense<0.000000e+00> : vector<5x32xf32>
    %28 = tpu.matmul %26, %27, %cst_12 {dimension_numbers = #tpu.dot_dimension_numbers<[1], [0], [0], [1], [0, 0, 1, 1], [], []>} : vector<5x32xbf16>, vector<32x32xbf16>, vector<5x32xf32> -> vector<5x32xf32>
    %c0_13 = arith.constant 0 : index
    %c0_14 = arith.constant 0 : index
    %29 = vector.load %arg5[%c0_13, %c0_14] : memref<1x32xf32, #tpu.memory_space<vmem>>, vector<1x32xf32>
    %30 = vector.broadcast %29 : vector<1x32xf32> to vector<5x32xf32>
    %31 = arith.addf %28, %30 : vector<5x32xf32>
    %c0_15 = arith.constant 0 : index
    %c0_16 = arith.constant 0 : index
    %32 = vector.load %arg6[%c0_15, %c0_16] : memref<32x32xbf16, #tpu.memory_space<vmem>>, vector<32x32xbf16>
    %cst_17 = arith.constant dense<0.000000e+00> : vector<5x32xf32>
    %33 = tpu.matmul %26, %32, %cst_17 {dimension_numbers = #tpu.dot_dimension_numbers<[1], [0], [0], [1], [0, 0, 1, 1], [], []>} : vector<5x32xbf16>, vector<32x32xbf16>, vector<5x32xf32> -> vector<5x32xf32>
    %c0_18 = arith.constant 0 : index
    %c0_19 = arith.constant 0 : index
    %34 = vector.load %arg7[%c0_18, %c0_19] : memref<1x32xf32, #tpu.memory_space<vmem>>, vector<1x32xf32>
    %35 = vector.broadcast %34 : vector<1x32xf32> to vector<5x32xf32>
    %36 = arith.addf %33, %35 : vector<5x32xf32>
    %c0_20 = arith.constant 0 : index
    %c0_21 = arith.constant 0 : index
    %37 = vector.load %arg8[%c0_20, %c0_21] : memref<32x32xbf16, #tpu.memory_space<vmem>>, vector<32x32xbf16>
    %cst_22 = arith.constant dense<0.000000e+00> : vector<5x32xf32>
    %38 = tpu.matmul %26, %37, %cst_22 {dimension_numbers = #tpu.dot_dimension_numbers<[1], [0], [0], [1], [0, 0, 1, 1], [], []>} : vector<5x32xbf16>, vector<32x32xbf16>, vector<5x32xf32> -> vector<5x32xf32>
    %c0_23 = arith.constant 0 : index
    %c0_24 = arith.constant 0 : index
    %39 = vector.load %arg9[%c0_23, %c0_24] : memref<1x32xf32, #tpu.memory_space<vmem>>, vector<1x32xf32>
    %40 = vector.broadcast %39 : vector<1x32xf32> to vector<5x32xf32>
    %41 = arith.addf %38, %40 : vector<5x32xf32>
    %cst_25 = arith.constant 0.353553385 : f32
    %42 = vector.broadcast %cst_25 : f32 to vector<5x32xf32>
    %43 = arith.mulf %31, %42 : vector<5x32xf32>
    %44 = arith.truncf %43 : vector<5x32xf32> to vector<5x32xbf16>
    %45 = arith.truncf %36 : vector<5x32xf32> to vector<5x32xbf16>
    %46 = arith.truncf %41 : vector<5x32xf32> to vector<5x32xbf16>
    %c0_26 = arith.constant 0 : index
    %c0_27 = arith.constant 0 : index
    %47 = vector.load %arg10[%c0_26, %c0_27] : memref<32x32xbf16, #tpu.memory_space<vmem>>, vector<32x32xbf16>
    %cst_28 = arith.constant 0.000000e+00 : f32
    %48 = vector.broadcast %cst_28 : f32 to vector<5x32xf32>
    %49 = vector.extract_strided_slice %44 {offsets = [0, 0], sizes = [5, 8], strides = [1, 1]} : vector<5x32xbf16> to vector<5x8xbf16>
    %50 = vector.extract_strided_slice %45 {offsets = [0, 0], sizes = [5, 8], strides = [1, 1]} : vector<5x32xbf16> to vector<5x8xbf16>
    %cst_29 = arith.constant dense<0.000000e+00> : vector<5x5xf32>
    %51 = tpu.matmul %49, %50, %cst_29 {dimension_numbers = #tpu.dot_dimension_numbers<[1], [1], [0], [0], [0, 0, 1, 0], [], []>} : vector<5x8xbf16>, vector<5x8xbf16>, vector<5x5xf32> -> vector<5x5xf32>
    %cst_30 = arith.constant dense<0xFF800000> : vector<5xf32>
    %52 = vector.multi_reduction <maximumf>, %51, %cst_30 [1] : vector<5x5xf32> to vector<5xf32>
    %53 = vector.shape_cast %52 : vector<5xf32> to vector<5x1xf32>
    %54 = vector.broadcast %53 : vector<5x1xf32> to vector<5x5xf32>
    %55 = arith.subf %51, %54 : vector<5x5xf32>
    %56 = math.exp %55 : vector<5x5xf32>
    %cst_31 = arith.constant dense<0.000000e+00> : vector<5xf32>
    %57 = vector.multi_reduction <add>, %56, %cst_31 [1] : vector<5x5xf32> to vector<5xf32>
    %58 = vector.shape_cast %57 : vector<5xf32> to vector<5x1xf32>
    %59 = tpu.reciprocal %58 {approx = true} : vector<5x1xf32> -> vector<5x1xf32>
    %60 = vector.broadcast %59 : vector<5x1xf32> to vector<5x5xf32>
    %61 = arith.mulf %56, %60 : vector<5x5xf32>
    %62 = arith.truncf %61 : vector<5x5xf32> to vector<5x5xbf16>
    %63 = vector.extract_strided_slice %46 {offsets = [0, 0], sizes = [5, 8], strides = [1, 1]} : vector<5x32xbf16> to vector<5x8xbf16>
    %cst_32 = arith.constant dense<0.000000e+00> : vector<5x8xf32>
    %64 = tpu.matmul %62, %63, %cst_32 {dimension_numbers = #tpu.dot_dimension_numbers<[1], [0], [0], [1], [0, 0, 1, 1], [], []>} : vector<5x5xbf16>, vector<5x8xbf16>, vector<5x8xf32> -> vector<5x8xf32>
    %65 = arith.truncf %64 : vector<5x8xf32> to vector<5x8xbf16>
    %66 = vector.extract_strided_slice %47 {offsets = [0, 0], sizes = [8, 32], strides = [1, 1]} : vector<32x32xbf16> to vector<8x32xbf16>
    %cst_33 = arith.constant dense<0.000000e+00> : vector<5x32xf32>
    %67 = tpu.matmul %65, %66, %cst_33 {dimension_numbers = #tpu.dot_dimension_numbers<[1], [0], [0], [1], [0, 0, 1, 1], [], []>} : vector<5x8xbf16>, vector<8x32xbf16>, vector<5x32xf32> -> vector<5x32xf32>
    %68 = arith.addf %48, %67 : vector<5x32xf32>
    %69 = vector.extract_strided_slice %44 {offsets = [0, 8], sizes = [5, 8], strides = [1, 1]} : vector<5x32xbf16> to vector<5x8xbf16>
    %70 = vector.extract_strided_slice %45 {offsets = [0, 8], sizes = [5, 8], strides = [1, 1]} : vector<5x32xbf16> to vector<5x8xbf16>
    %cst_34 = arith.constant dense<0.000000e+00> : vector<5x5xf32>
    %71 = tpu.matmul %69, %70, %cst_34 {dimension_numbers = #tpu.dot_dimension_numbers<[1], [1], [0], [0], [0, 0, 1, 0], [], []>} : vector<5x8xbf16>, vector<5x8xbf16>, vector<5x5xf32> -> vector<5x5xf32>
    %cst_35 = arith.constant dense<0xFF800000> : vector<5xf32>
    %72 = vector.multi_reduction <maximumf>, %71, %cst_35 [1] : vector<5x5xf32> to vector<5xf32>
    %73 = vector.shape_cast %72 : vector<5xf32> to vector<5x1xf32>
    %74 = vector.broadcast %73 : vector<5x1xf32> to vector<5x5xf32>
    %75 = arith.subf %71, %74 : vector<5x5xf32>
    %76 = math.exp %75 : vector<5x5xf32>
    %cst_36 = arith.constant dense<0.000000e+00> : vector<5xf32>
    %77 = vector.multi_reduction <add>, %76, %cst_36 [1] : vector<5x5xf32> to vector<5xf32>
    %78 = vector.shape_cast %77 : vector<5xf32> to vector<5x1xf32>
    %79 = tpu.reciprocal %78 {approx = true} : vector<5x1xf32> -> vector<5x1xf32>
    %80 = vector.broadcast %79 : vector<5x1xf32> to vector<5x5xf32>
    %81 = arith.mulf %76, %80 : vector<5x5xf32>
    %82 = arith.truncf %81 : vector<5x5xf32> to vector<5x5xbf16>
    %83 = vector.extract_strided_slice %46 {offsets = [0, 8], sizes = [5, 8], strides = [1, 1]} : vector<5x32xbf16> to vector<5x8xbf16>
    %cst_37 = arith.constant dense<0.000000e+00> : vector<5x8xf32>
    %84 = tpu.matmul %82, %83, %cst_37 {dimension_numbers = #tpu.dot_dimension_numbers<[1], [0], [0], [1], [0, 0, 1, 1], [], []>} : vector<5x5xbf16>, vector<5x8xbf16>, vector<5x8xf32> -> vector<5x8xf32>
    %85 = arith.truncf %84 : vector<5x8xf32> to vector<5x8xbf16>
    %86 = vector.extract_strided_slice %47 {offsets = [8, 0], sizes = [8, 32], strides = [1, 1]} : vector<32x32xbf16> to vector<8x32xbf16>
    %cst_38 = arith.constant dense<0.000000e+00> : vector<5x32xf32>
    %87 = tpu.matmul %85, %86, %cst_38 {dimension_numbers = #tpu.dot_dimension_numbers<[1], [0], [0], [1], [0, 0, 1, 1], [], []>} : vector<5x8xbf16>, vector<8x32xbf16>, vector<5x32xf32> -> vector<5x32xf32>
    %88 = arith.addf %68, %87 : vector<5x32xf32>
    %89 = vector.extract_strided_slice %44 {offsets = [0, 16], sizes = [5, 8], strides = [1, 1]} : vector<5x32xbf16> to vector<5x8xbf16>
    %90 = vector.extract_strided_slice %45 {offsets = [0, 16], sizes = [5, 8], strides = [1, 1]} : vector<5x32xbf16> to vector<5x8xbf16>
    %cst_39 = arith.constant dense<0.000000e+00> : vector<5x5xf32>
    %91 = tpu.matmul %89, %90, %cst_39 {dimension_numbers = #tpu.dot_dimension_numbers<[1], [1], [0], [0], [0, 0, 1, 0], [], []>} : vector<5x8xbf16>, vector<5x8xbf16>, vector<5x5xf32> -> vector<5x5xf32>
    %cst_40 = arith.constant dense<0xFF800000> : vector<5xf32>
    %92 = vector.multi_reduction <maximumf>, %91, %cst_40 [1] : vector<5x5xf32> to vector<5xf32>
    %93 = vector.shape_cast %92 : vector<5xf32> to vector<5x1xf32>
    %94 = vector.broadcast %93 : vector<5x1xf32> to vector<5x5xf32>
    %95 = arith.subf %91, %94 : vector<5x5xf32>
    %96 = math.exp %95 : vector<5x5xf32>
    %cst_41 = arith.constant dense<0.000000e+00> : vector<5xf32>
    %97 = vector.multi_reduction <add>, %96, %cst_41 [1] : vector<5x5xf32> to vector<5xf32>
    %98 = vector.shape_cast %97 : vector<5xf32> to vector<5x1xf32>
    %99 = tpu.reciprocal %98 {approx = true} : vector<5x1xf32> -> vector<5x1xf32>
    %100 = vector.broadcast %99 : vector<5x1xf32> to vector<5x5xf32>
    %101 = arith.mulf %96, %100 : vector<5x5xf32>
    %102 = arith.truncf %101 : vector<5x5xf32> to vector<5x5xbf16>
    %103 = vector.extract_strided_slice %46 {offsets = [0, 16], sizes = [5, 8], strides = [1, 1]} : vector<5x32xbf16> to vector<5x8xbf16>
    %cst_42 = arith.constant dense<0.000000e+00> : vector<5x8xf32>
    %104 = tpu.matmul %102, %103, %cst_42 {dimension_numbers = #tpu.dot_dimension_numbers<[1], [0], [0], [1], [0, 0, 1, 1], [], []>} : vector<5x5xbf16>, vector<5x8xbf16>, vector<5x8xf32> -> vector<5x8xf32>
    %105 = arith.truncf %104 : vector<5x8xf32> to vector<5x8xbf16>
    %106 = vector.extract_strided_slice %47 {offsets = [16, 0], sizes = [8, 32], strides = [1, 1]} : vector<32x32xbf16> to vector<8x32xbf16>
    %cst_43 = arith.constant dense<0.000000e+00> : vector<5x32xf32>
    %107 = tpu.matmul %105, %106, %cst_43 {dimension_numbers = #tpu.dot_dimension_numbers<[1], [0], [0], [1], [0, 0, 1, 1], [], []>} : vector<5x8xbf16>, vector<8x32xbf16>, vector<5x32xf32> -> vector<5x32xf32>
    %108 = arith.addf %88, %107 : vector<5x32xf32>
    %109 = vector.extract_strided_slice %44 {offsets = [0, 24], sizes = [5, 8], strides = [1, 1]} : vector<5x32xbf16> to vector<5x8xbf16>
    %110 = vector.extract_strided_slice %45 {offsets = [0, 24], sizes = [5, 8], strides = [1, 1]} : vector<5x32xbf16> to vector<5x8xbf16>
    %cst_44 = arith.constant dense<0.000000e+00> : vector<5x5xf32>
    %111 = tpu.matmul %109, %110, %cst_44 {dimension_numbers = #tpu.dot_dimension_numbers<[1], [1], [0], [0], [0, 0, 1, 0], [], []>} : vector<5x8xbf16>, vector<5x8xbf16>, vector<5x5xf32> -> vector<5x5xf32>
    %cst_45 = arith.constant dense<0xFF800000> : vector<5xf32>
    %112 = vector.multi_reduction <maximumf>, %111, %cst_45 [1] : vector<5x5xf32> to vector<5xf32>
    %113 = vector.shape_cast %112 : vector<5xf32> to vector<5x1xf32>
    %114 = vector.broadcast %113 : vector<5x1xf32> to vector<5x5xf32>
    %115 = arith.subf %111, %114 : vector<5x5xf32>
    %116 = math.exp %115 : vector<5x5xf32>
    %cst_46 = arith.constant dense<0.000000e+00> : vector<5xf32>
    %117 = vector.multi_reduction <add>, %116, %cst_46 [1] : vector<5x5xf32> to vector<5xf32>
    %118 = vector.shape_cast %117 : vector<5xf32> to vector<5x1xf32>
    %119 = tpu.reciprocal %118 {approx = true} : vector<5x1xf32> -> vector<5x1xf32>
    %120 = vector.broadcast %119 : vector<5x1xf32> to vector<5x5xf32>
    %121 = arith.mulf %116, %120 : vector<5x5xf32>
    %122 = arith.truncf %121 : vector<5x5xf32> to vector<5x5xbf16>
    %123 = vector.extract_strided_slice %46 {offsets = [0, 24], sizes = [5, 8], strides = [1, 1]} : vector<5x32xbf16> to vector<5x8xbf16>
    %cst_47 = arith.constant dense<0.000000e+00> : vector<5x8xf32>
    %124 = tpu.matmul %122, %123, %cst_47 {dimension_numbers = #tpu.dot_dimension_numbers<[1], [0], [0], [1], [0, 0, 1, 1], [], []>} : vector<5x5xbf16>, vector<5x8xbf16>, vector<5x8xf32> -> vector<5x8xf32>
    %125 = arith.truncf %124 : vector<5x8xf32> to vector<5x8xbf16>
    %126 = vector.extract_strided_slice %47 {offsets = [24, 0], sizes = [8, 32], strides = [1, 1]} : vector<32x32xbf16> to vector<8x32xbf16>
    %cst_48 = arith.constant dense<0.000000e+00> : vector<5x32xf32>
    %127 = tpu.matmul %125, %126, %cst_48 {dimension_numbers = #tpu.dot_dimension_numbers<[1], [0], [0], [1], [0, 0, 1, 1], [], []>} : vector<5x8xbf16>, vector<8x32xbf16>, vector<5x32xf32> -> vector<5x32xf32>
    %128 = arith.addf %108, %127 : vector<5x32xf32>
    %129 = arith.addf %1, %128 : vector<5x32xf32>
    %c0_49 = arith.constant 0 : index
    %c0_50 = arith.constant 0 : index
    %130 = vector.load %arg11[%c0_49, %c0_50] : memref<1x32xf32, #tpu.memory_space<vmem>>, vector<1x32xf32>
    %131 = vector.broadcast %130 : vector<1x32xf32> to vector<5x32xf32>
    %132 = arith.addf %129, %131 : vector<5x32xf32>
    %cst_51 = arith.constant dense<0.000000e+00> : vector<5xf32>
    %133 = vector.multi_reduction <add>, %132, %cst_51 [1] : vector<5x32xf32> to vector<5xf32>
    %134 = vector.shape_cast %133 : vector<5xf32> to vector<5x1xf32>
    %cst_52 = arith.constant 3.200000e+01 : f32
    %135 = vector.broadcast %cst_52 : f32 to vector<5x1xf32>
    %136 = arith.divf %134, %135 : vector<5x1xf32>
    %137 = vector.broadcast %136 : vector<5x1xf32> to vector<5x32xf32>
    %138 = arith.subf %132, %137 : vector<5x32xf32>
    %139 = arith.mulf %138, %138 : vector<5x32xf32>
    %cst_53 = arith.constant dense<0.000000e+00> : vector<5xf32>
    %140 = vector.multi_reduction <add>, %139, %cst_53 [1] : vector<5x32xf32> to vector<5xf32>
    %141 = vector.shape_cast %140 : vector<5xf32> to vector<5x1xf32>
    %cst_54 = arith.constant 3.200000e+01 : f32
    %142 = vector.broadcast %cst_54 : f32 to vector<5x1xf32>
    %143 = arith.divf %141, %142 : vector<5x1xf32>
    %144 = vector.broadcast %136 : vector<5x1xf32> to vector<5x32xf32>
    %145 = arith.subf %132, %144 : vector<5x32xf32>
    %cst_55 = arith.constant 9.99999974E-6 : f32
    %146 = vector.broadcast %cst_55 : f32 to vector<5x1xf32>
    %147 = arith.addf %143, %146 : vector<5x1xf32>
    %148 = math.rsqrt %147 : vector<5x1xf32>
    %149 = vector.broadcast %148 : vector<5x1xf32> to vector<5x32xf32>
    %150 = arith.mulf %145, %149 : vector<5x32xf32>
    %c0_56 = arith.constant 0 : index
    %c0_57 = arith.constant 0 : index
    %151 = vector.load %arg12[%c0_56, %c0_57] : memref<1x32xf32, #tpu.memory_space<vmem>>, vector<1x32xf32>
    %152 = vector.broadcast %151 : vector<1x32xf32> to vector<5x32xf32>
    %153 = arith.mulf %150, %152 : vector<5x32xf32>
    %c0_58 = arith.constant 0 : index
    %c0_59 = arith.constant 0 : index
    %154 = vector.load %arg13[%c0_58, %c0_59] : memref<1x32xf32, #tpu.memory_space<vmem>>, vector<1x32xf32>
    %155 = vector.broadcast %154 : vector<1x32xf32> to vector<5x32xf32>
    %156 = arith.addf %153, %155 : vector<5x32xf32>
    %157 = arith.truncf %156 : vector<5x32xf32> to vector<5x32xbf16>
    %c0_60 = arith.constant 0 : index
    %c0_61 = arith.constant 0 : index
    %158 = vector.load %arg14[%c0_60, %c0_61] : memref<32x64xbf16, #tpu.memory_space<vmem>>, vector<32x64xbf16>
    %cst_62 = arith.constant dense<0.000000e+00> : vector<5x64xf32>
    %159 = tpu.matmul %157, %158, %cst_62 {dimension_numbers = #tpu.dot_dimension_numbers<[1], [0], [0], [1], [0, 0, 1, 1], [], []>} : vector<5x32xbf16>, vector<32x64xbf16>, vector<5x64xf32> -> vector<5x64xf32>
    %c0_63 = arith.constant 0 : index
    %c0_64 = arith.constant 0 : index
    %160 = vector.load %arg15[%c0_63, %c0_64] : memref<1x64xf32, #tpu.memory_space<vmem>>, vector<1x64xf32>
    %161 = vector.broadcast %160 : vector<1x64xf32> to vector<5x64xf32>
    %162 = arith.addf %159, %161 : vector<5x64xf32>
    %cst_65 = arith.constant -1.702000e+00 : f32
    %163 = vector.broadcast %cst_65 : f32 to vector<5x64xf32>
    %164 = arith.mulf %163, %162 : vector<5x64xf32>
    %165 = math.exp %164 : vector<5x64xf32>
    %cst_66 = arith.constant 1.000000e+00 : f32
    %166 = vector.broadcast %cst_66 : f32 to vector<5x64xf32>
    %167 = arith.addf %166, %165 : vector<5x64xf32>
    %168 = tpu.reciprocal %167 {approx = true} : vector<5x64xf32> -> vector<5x64xf32>
    %169 = arith.mulf %162, %168 : vector<5x64xf32>
    %170 = arith.truncf %169 : vector<5x64xf32> to vector<5x64xbf16>
    %c0_67 = arith.constant 0 : index
    %c0_68 = arith.constant 0 : index
    %171 = vector.load %arg16[%c0_67, %c0_68] : memref<64x32xbf16, #tpu.memory_space<vmem>>, vector<64x32xbf16>
    %cst_69 = arith.constant dense<0.000000e+00> : vector<5x32xf32>
    %172 = tpu.matmul %170, %171, %cst_69 {dimension_numbers = #tpu.dot_dimension_numbers<[1], [0], [0], [1], [0, 0, 1, 1], [], []>} : vector<5x64xbf16>, vector<64x32xbf16>, vector<5x32xf32> -> vector<5x32xf32>
    %c0_70 = arith.constant 0 : index
    %c0_71 = arith.constant 0 : index
    %173 = vector.load %arg17[%c0_70, %c0_71] : memref<1x32xf32, #tpu.memory_space<vmem>>, vector<1x32xf32>
    %174 = vector.broadcast %173 : vector<1x32xf32> to vector<5x32xf32>
    %175 = arith.addf %172, %174 : vector<5x32xf32>
    %176 = arith.addf %132, %175 : vector<5x32xf32>
    %c0_72 = arith.constant 0 : index
    %c0_73 = arith.constant 0 : index
    %c0_74 = arith.constant 0 : index
    %177 = vector.load %arg18[%c0_72, %c0_73, %c0_74] : memref<1x5x32xf32, #tpu.memory_space<vmem>>, vector<1x5x32xf32>
    %178 = vector.shape_cast %177 : vector<1x5x32xf32> to vector<5x32xf32>
    %179 = vector.shape_cast %176 : vector<5x32xf32> to vector<1x5x32xf32>
    tpu.vector_store %arg18[%c0_72, %c0_73, %c0_74], %179 {strides = array<i32>} : memref<1x5x32xf32, #tpu.memory_space<vmem>>, vector<1x5x32xf32>,
    return
  }
  func.func @transform_0(%arg0: i32) -> (i32, i32, i32) {
    %c0_i32 = arith.constant 0 : i32
    %c0_i32_0 = arith.constant 0 : i32
    %c0_i32_1 = arith.constant 0 : i32
    return %arg0, %c0_i32, %c0_i32_0 : i32, i32, i32
  }
  func.func @transform_1(%arg0: i32) -> (i32, i32) {
    %c0_i32 = arith.constant 0 : i32
    %c0_i32_0 = arith.constant 0 : i32
    %c0_i32_1 = arith.constant 0 : i32
    return %c0_i32, %c0_i32_0 : i32, i32
  }
  func.func @transform_2(%arg0: i32) -> (i32, i32) {
    %c0_i32 = arith.constant 0 : i32
    %c0_i32_0 = arith.constant 0 : i32
    %c0_i32_1 = arith.constant 0 : i32
    return %c0_i32, %c0_i32_0 : i32, i32
  }
  func.func @transform_3(%arg0: i32) -> (i32, i32) {
    %c0_i32 = arith.constant 0 : i32
    %c0_i32_0 = arith.constant 0 : i32
    %c0_i32_1 = arith.constant 0 : i32
    return %c0_i32, %c0_i32_0 : i32, i32
  }
  func.func @transform_4(%arg0: i32) -> (i32, i32) {
    %c0_i32 = arith.constant 0 : i32
    %c0_i32_0 = arith.constant 0 : i32
    %c0_i32_1 = arith.constant 0 : i32
    return %c0_i32, %c0_i32_0 : i32, i32
  }
  func.func @transform_5(%arg0: i32) -> (i32, i32) {
    %c0_i32 = arith.constant 0 : i32
    %c0_i32_0 = arith.constant 0 : i32
    %c0_i32_1 = arith.constant 0 : i32
    return %c0_i32, %c0_i32_0 : i32, i32
  }
  func.func @transform_6(%arg0: i32) -> (i32, i32) {
    %c0_i32 = arith.constant 0 : i32
    %c0_i32_0 = arith.constant 0 : i32
    %c0_i32_1 = arith.constant 0 : i32
    return %c0_i32, %c0_i32_0 : i32, i32
  }
  func.func @transform_7(%arg0: i32) -> (i32, i32) {
    %c0_i32 = arith.constant 0 : i32
    %c0_i32_0 = arith.constant 0 : i32
    %c0_i32_1 = arith.constant 0 : i32
    return %c0_i32, %c0_i32_0 : i32, i32
  }
  func.func @transform_8(%arg0: i32) -> (i32, i32) {
    %c0_i32 = arith.constant 0 : i32
    %c0_i32_0 = arith.constant 0 : i32
    %c0_i32_1 = arith.constant 0 : i32
    return %c0_i32, %c0_i32_0 : i32, i32
  }
  func.func @transform_9(%arg0: i32) -> (i32, i32) {
    %c0_i32 = arith.constant 0 : i32
    %c0_i32_0 = arith.constant 0 : i32
    %c0_i32_1 = arith.constant 0 : i32
    return %c0_i32, %c0_i32_0 : i32, i32
  }
  func.func @transform_10(%arg0: i32) -> (i32, i32) {
    %c0_i32 = arith.constant 0 : i32
    %c0_i32_0 = arith.constant 0 : i32
    %c0_i32_1 = arith.constant 0 : i32
    return %c0_i32, %c0_i32_0 : i32, i32
  }
  func.func @transform_11(%arg0: i32) -> (i32, i32) {
    %c0_i32 = arith.constant 0 : i32
    %c0_i32_0 = arith.constant 0 : i32
    %c0_i32_1 = arith.constant 0 : i32
    return %c0_i32, %c0_i32_0 : i32, i32
  }
  func.func @transform_12(%arg0: i32) -> (i32, i32) {
    %c0_i32 = arith.constant 0 : i32
    %c0_i32_0 = arith.constant 0 : i32
    %c0_i32_1 = arith.constant 0 : i32
    return %c0_i32, %c0_i32_0 : i32, i32
  }
  func.func @transform_13(%arg0: i32) -> (i32, i32) {
    %c0_i32 = arith.constant 0 : i32
    %c0_i32_0 = arith.constant 0 : i32
    %c0_i32_1 = arith.constant 0 : i32
    return %c0_i32, %c0_i32_0 : i32, i32
  }
  func.func @transform_14(%arg0: i32) -> (i32, i32) {
    %c0_i32 = arith.constant 0 : i32
    %c0_i32_0 = arith.constant 0 : i32
    %c0_i32_1 = arith.constant 0 : i32
    return %c0_i32, %c0_i32_0 : i32, i32
  }
  func.func @transform_15(%arg0: i32) -> (i32, i32) {
    %c0_i32 = arith.constant 0 : i32
    %c0_i32_0 = arith.constant 0 : i32
    %c0_i32_1 = arith.constant 0 : i32
    return %c0_i32, %c0_i32_0 : i32, i32
  }
  func.func @transform_16(%arg0: i32) -> (i32, i32) {
    %c0_i32 = arith.constant 0 : i32
    %c0_i32_0 = arith.constant 0 : i32
    %c0_i32_1 = arith.constant 0 : i32
    return %c0_i32, %c0_i32_0 : i32, i32
  }
  func.func @transform_17(%arg0: i32) -> (i32, i32, i32) {
    %c0_i32 = arith.constant 0 : i32
    %c0_i32_0 = arith.constant 0 : i32
    %c0_i32_1 = arith.constant 0 : i32
    return %arg0, %c0_i32, %c0_i32_0 : i32, i32, i32
  }
}

module attributes {stable_mosaic.version = 11 : i64} {
  func.func @_vision_embed_kernel(%arg0: i32, %arg1: memref<1x4x192xf32, #tpu.memory_space<vmem>>, %arg2: memref<192x32xbf16, #tpu.memory_space<vmem>>, %arg3: memref<1x32xf32, #tpu.memory_space<vmem>>, %arg4: memref<5x32xf32, #tpu.memory_space<vmem>>, %arg5: memref<1x32xf32, #tpu.memory_space<vmem>>, %arg6: memref<1x32xf32, #tpu.memory_space<vmem>>, %arg7: memref<1x5x32xf32, #tpu.memory_space<vmem>>) attributes {dimension_semantics = [#tpu.dimension_semantics<parallel>], iteration_bounds = array<i64: 2>, scalar_prefetch = 0 : i64, scratch_operands = 0 : i64, tpu.core_type = #tpu.core_type<tc>, window_params = [{transform_indices = @transform_0, window_bounds = array<i64: 1, 4, 192>}, {pipeline_mode = #tpu.pipeline_mode<synchronous>, transform_indices = @transform_1, window_bounds = array<i64: 192, 32>}, {pipeline_mode = #tpu.pipeline_mode<synchronous>, transform_indices = @transform_2, window_bounds = array<i64: 1, 32>}, {pipeline_mode = #tpu.pipeline_mode<synchronous>, transform_indices = @transform_3, window_bounds = array<i64: 5, 32>}, {pipeline_mode = #tpu.pipeline_mode<synchronous>, transform_indices = @transform_4, window_bounds = array<i64: 1, 32>}, {pipeline_mode = #tpu.pipeline_mode<synchronous>, transform_indices = @transform_5, window_bounds = array<i64: 1, 32>}, {transform_indices = @transform_6, window_bounds = array<i64: 1, 5, 32>}]} {
    %c0 = arith.constant 0 : index
    %c0_0 = arith.constant 0 : index
    %c0_1 = arith.constant 0 : index
    %0 = vector.load %arg1[%c0, %c0_0, %c0_1] : memref<1x4x192xf32, #tpu.memory_space<vmem>>, vector<1x4x192xf32>
    %1 = vector.shape_cast %0 : vector<1x4x192xf32> to vector<4x192xf32>
    %2 = arith.truncf %1 : vector<4x192xf32> to vector<4x192xbf16>
    %c0_2 = arith.constant 0 : index
    %c0_3 = arith.constant 0 : index
    %3 = vector.load %arg2[%c0_2, %c0_3] : memref<192x32xbf16, #tpu.memory_space<vmem>>, vector<192x32xbf16>
    %cst = arith.constant dense<0.000000e+00> : vector<4x32xf32>
    %4 = tpu.matmul %2, %3, %cst {dimension_numbers = #tpu.dot_dimension_numbers<[1], [0], [0], [1], [0, 0, 1, 1], [], []>} : vector<4x192xbf16>, vector<192x32xbf16>, vector<4x32xf32> -> vector<4x32xf32>
    %c0_4 = arith.constant 0 : index
    %c0_5 = arith.constant 0 : index
    %5 = vector.load %arg3[%c0_4, %c0_5] : memref<1x32xf32, #tpu.memory_space<vmem>>, vector<1x32xf32>
    %c0_6 = arith.constant 0 : index
    %c0_7 = arith.constant 0 : index
    %6 = vector.load %arg4[%c0_6, %c0_7] : memref<5x32xf32, #tpu.memory_space<vmem>>, vector<1x32xf32>
    %7 = arith.addf %5, %6 : vector<1x32xf32>
    %cst_8 = arith.constant dense<0.000000e+00> : vector<1xf32>
    %8 = vector.multi_reduction <add>, %7, %cst_8 [1] : vector<1x32xf32> to vector<1xf32>
    %9 = vector.shape_cast %8 : vector<1xf32> to vector<1x1xf32>
    %cst_9 = arith.constant 3.200000e+01 : f32
    %10 = vector.broadcast %cst_9 : f32 to vector<1x1xf32>
    %11 = arith.divf %9, %10 : vector<1x1xf32>
    %12 = vector.broadcast %11 : vector<1x1xf32> to vector<1x32xf32>
    %13 = arith.subf %7, %12 : vector<1x32xf32>
    %14 = arith.mulf %13, %13 : vector<1x32xf32>
    %cst_10 = arith.constant dense<0.000000e+00> : vector<1xf32>
    %15 = vector.multi_reduction <add>, %14, %cst_10 [1] : vector<1x32xf32> to vector<1xf32>
    %16 = vector.shape_cast %15 : vector<1xf32> to vector<1x1xf32>
    %cst_11 = arith.constant 3.200000e+01 : f32
    %17 = vector.broadcast %cst_11 : f32 to vector<1x1xf32>
    %18 = arith.divf %16, %17 : vector<1x1xf32>
    %19 = vector.broadcast %11 : vector<1x1xf32> to vector<1x32xf32>
    %20 = arith.subf %7, %19 : vector<1x32xf32>
    %cst_12 = arith.constant 9.99999974E-6 : f32
    %21 = vector.broadcast %cst_12 : f32 to vector<1x1xf32>
    %22 = arith.addf %18, %21 : vector<1x1xf32>
    %23 = math.rsqrt %22 : vector<1x1xf32>
    %24 = vector.broadcast %23 : vector<1x1xf32> to vector<1x32xf32>
    %25 = arith.mulf %20, %24 : vector<1x32xf32>
    %c0_13 = arith.constant 0 : index
    %c0_14 = arith.constant 0 : index
    %26 = vector.load %arg5[%c0_13, %c0_14] : memref<1x32xf32, #tpu.memory_space<vmem>>, vector<1x32xf32>
    %27 = arith.mulf %25, %26 : vector<1x32xf32>
    %c0_15 = arith.constant 0 : index
    %c0_16 = arith.constant 0 : index
    %28 = vector.load %arg6[%c0_15, %c0_16] : memref<1x32xf32, #tpu.memory_space<vmem>>, vector<1x32xf32>
    %29 = arith.addf %27, %28 : vector<1x32xf32>
    %c0_17 = arith.constant 0 : index
    %c0_18 = arith.constant 0 : index
    %c0_19 = arith.constant 0 : index
    %30 = vector.load %arg7[%c0_17, %c0_18, %c0_19] : memref<1x5x32xf32, #tpu.memory_space<vmem>>, vector<1x1x32xf32>
    %31 = vector.shape_cast %30 : vector<1x1x32xf32> to vector<1x32xf32>
    %32 = vector.shape_cast %29 : vector<1x32xf32> to vector<1x1x32xf32>
    tpu.vector_store %arg7[%c0_17, %c0_18, %c0_19], %32 {strides = array<i32>} : memref<1x5x32xf32, #tpu.memory_space<vmem>>, vector<1x1x32xf32>,
    %c1 = arith.constant 1 : index
    %c0_20 = arith.constant 0 : index
    %33 = vector.load %arg4[%c1, %c0_20] : memref<5x32xf32, #tpu.memory_space<vmem>>, vector<4x32xf32>
    %34 = arith.addf %4, %33 : vector<4x32xf32>
    %cst_21 = arith.constant dense<0.000000e+00> : vector<4xf32>
    %35 = vector.multi_reduction <add>, %34, %cst_21 [1] : vector<4x32xf32> to vector<4xf32>
    %36 = vector.shape_cast %35 : vector<4xf32> to vector<4x1xf32>
    %cst_22 = arith.constant 3.200000e+01 : f32
    %37 = vector.broadcast %cst_22 : f32 to vector<4x1xf32>
    %38 = arith.divf %36, %37 : vector<4x1xf32>
    %39 = vector.broadcast %38 : vector<4x1xf32> to vector<4x32xf32>
    %40 = arith.subf %34, %39 : vector<4x32xf32>
    %41 = arith.mulf %40, %40 : vector<4x32xf32>
    %cst_23 = arith.constant dense<0.000000e+00> : vector<4xf32>
    %42 = vector.multi_reduction <add>, %41, %cst_23 [1] : vector<4x32xf32> to vector<4xf32>
    %43 = vector.shape_cast %42 : vector<4xf32> to vector<4x1xf32>
    %cst_24 = arith.constant 3.200000e+01 : f32
    %44 = vector.broadcast %cst_24 : f32 to vector<4x1xf32>
    %45 = arith.divf %43, %44 : vector<4x1xf32>
    %46 = vector.broadcast %38 : vector<4x1xf32> to vector<4x32xf32>
    %47 = arith.subf %34, %46 : vector<4x32xf32>
    %cst_25 = arith.constant 9.99999974E-6 : f32
    %48 = vector.broadcast %cst_25 : f32 to vector<4x1xf32>
    %49 = arith.addf %45, %48 : vector<4x1xf32>
    %50 = math.rsqrt %49 : vector<4x1xf32>
    %51 = vector.broadcast %50 : vector<4x1xf32> to vector<4x32xf32>
    %52 = arith.mulf %47, %51 : vector<4x32xf32>
    %c0_26 = arith.constant 0 : index
    %c0_27 = arith.constant 0 : index
    %53 = vector.load %arg5[%c0_26, %c0_27] : memref<1x32xf32, #tpu.memory_space<vmem>>, vector<1x32xf32>
    %54 = vector.broadcast %53 : vector<1x32xf32> to vector<4x32xf32>
    %55 = arith.mulf %52, %54 : vector<4x32xf32>
    %c0_28 = arith.constant 0 : index
    %c0_29 = arith.constant 0 : index
    %56 = vector.load %arg6[%c0_28, %c0_29] : memref<1x32xf32, #tpu.memory_space<vmem>>, vector<1x32xf32>
    %57 = vector.broadcast %56 : vector<1x32xf32> to vector<4x32xf32>
    %58 = arith.addf %55, %57 : vector<4x32xf32>
    %c0_30 = arith.constant 0 : index
    %c1_31 = arith.constant 1 : index
    %c0_32 = arith.constant 0 : index
    %59 = vector.load %arg7[%c0_30, %c1_31, %c0_32] : memref<1x5x32xf32, #tpu.memory_space<vmem>>, vector<1x4x32xf32>
    %60 = vector.shape_cast %59 : vector<1x4x32xf32> to vector<4x32xf32>
    %61 = vector.shape_cast %58 : vector<4x32xf32> to vector<1x4x32xf32>
    tpu.vector_store %arg7[%c0_30, %c1_31, %c0_32], %61 {strides = array<i32>} : memref<1x5x32xf32, #tpu.memory_space<vmem>>, vector<1x4x32xf32>,
    return
  }
  func.func @transform_0(%arg0: i32) -> (i32, i32, i32) {
    %c0_i32 = arith.constant 0 : i32
    %c0_i32_0 = arith.constant 0 : i32
    %c0_i32_1 = arith.constant 0 : i32
    return %arg0, %c0_i32, %c0_i32_0 : i32, i32, i32
  }
  func.func @transform_1(%arg0: i32) -> (i32, i32) {
    %c0_i32 = arith.constant 0 : i32
    %c0_i32_0 = arith.constant 0 : i32
    %c0_i32_1 = arith.constant 0 : i32
    return %c0_i32, %c0_i32_0 : i32, i32
  }
  func.func @transform_2(%arg0: i32) -> (i32, i32) {
    %c0_i32 = arith.constant 0 : i32
    %c0_i32_0 = arith.constant 0 : i32
    %c0_i32_1 = arith.constant 0 : i32
    return %c0_i32, %c0_i32_0 : i32, i32
  }
  func.func @transform_3(%arg0: i32) -> (i32, i32) {
    %c0_i32 = arith.constant 0 : i32
    %c0_i32_0 = arith.constant 0 : i32
    %c0_i32_1 = arith.constant 0 : i32
    return %c0_i32, %c0_i32_0 : i32, i32
  }
  func.func @transform_4(%arg0: i32) -> (i32, i32) {
    %c0_i32 = arith.constant 0 : i32
    %c0_i32_0 = arith.constant 0 : i32
    %c0_i32_1 = arith.constant 0 : i32
    return %c0_i32, %c0_i32_0 : i32, i32
  }
  func.func @transform_5(%arg0: i32) -> (i32, i32) {
    %c0_i32 = arith.constant 0 : i32
    %c0_i32_0 = arith.constant 0 : i32
    %c0_i32_1 = arith.constant 0 : i32
    return %c0_i32, %c0_i32_0 : i32, i32
  }
  func.func @transform_6(%arg0: i32) -> (i32, i32, i32) {
    %c0_i32 = arith.constant 0 : i32
    %c0_i32_0 = arith.constant 0 : i32
    %c0_i32_1 = arith.constant 0 : i32
    return %arg0, %c0_i32, %c0_i32_0 : i32, i32, i32
  }
}

module attributes {stable_mosaic.version = 11 : i64} {
  func.func @_encoder_layer_kernel(%arg0: i32, %arg1: memref<2xi32, #tpu.memory_space<smem>>, %arg2: memref<1x8x32xf32, #tpu.memory_space<vmem>>, %arg3: memref<1x32xf32, #tpu.memory_space<vmem>>, %arg4: memref<1x32xf32, #tpu.memory_space<vmem>>, %arg5: memref<32x32xbf16, #tpu.memory_space<vmem>>, %arg6: memref<1x32xf32, #tpu.memory_space<vmem>>, %arg7: memref<32x32xbf16, #tpu.memory_space<vmem>>, %arg8: memref<1x32xf32, #tpu.memory_space<vmem>>, %arg9: memref<32x32xbf16, #tpu.memory_space<vmem>>, %arg10: memref<1x32xf32, #tpu.memory_space<vmem>>, %arg11: memref<32x32xbf16, #tpu.memory_space<vmem>>, %arg12: memref<1x32xf32, #tpu.memory_space<vmem>>, %arg13: memref<1x32xf32, #tpu.memory_space<vmem>>, %arg14: memref<1x32xf32, #tpu.memory_space<vmem>>, %arg15: memref<32x64xbf16, #tpu.memory_space<vmem>>, %arg16: memref<1x64xf32, #tpu.memory_space<vmem>>, %arg17: memref<64x32xbf16, #tpu.memory_space<vmem>>, %arg18: memref<1x32xf32, #tpu.memory_space<vmem>>, %arg19: memref<1x8x32xf32, #tpu.memory_space<vmem>>) attributes {dimension_semantics = [#tpu.dimension_semantics<parallel>], iteration_bounds = array<i64: 2>, scalar_prefetch = 1 : i64, scratch_operands = 0 : i64, tpu.core_type = #tpu.core_type<tc>, window_params = [{transform_indices = @transform_0, window_bounds = array<i64: 1, 8, 32>}, {pipeline_mode = #tpu.pipeline_mode<synchronous>, transform_indices = @transform_1, window_bounds = array<i64: 1, 32>}, {pipeline_mode = #tpu.pipeline_mode<synchronous>, transform_indices = @transform_2, window_bounds = array<i64: 1, 32>}, {pipeline_mode = #tpu.pipeline_mode<synchronous>, transform_indices = @transform_3, window_bounds = array<i64: 32, 32>}, {pipeline_mode = #tpu.pipeline_mode<synchronous>, transform_indices = @transform_4, window_bounds = array<i64: 1, 32>}, {pipeline_mode = #tpu.pipeline_mode<synchronous>, transform_indices = @transform_5, window_bounds = array<i64: 32, 32>}, {pipeline_mode = #tpu.pipeline_mode<synchronous>, transform_indices = @transform_6, window_bounds = array<i64: 1, 32>}, {pipeline_mode = #tpu.pipeline_mode<synchronous>, transform_indices = @transform_7, window_bounds = array<i64: 32, 32>}, {pipeline_mode = #tpu.pipeline_mode<synchronous>, transform_indices = @transform_8, window_bounds = array<i64: 1, 32>}, {pipeline_mode = #tpu.pipeline_mode<synchronous>, transform_indices = @transform_9, window_bounds = array<i64: 32, 32>}, {pipeline_mode = #tpu.pipeline_mode<synchronous>, transform_indices = @transform_10, window_bounds = array<i64: 1, 32>}, {pipeline_mode = #tpu.pipeline_mode<synchronous>, transform_indices = @transform_11, window_bounds = array<i64: 1, 32>}, {pipeline_mode = #tpu.pipeline_mode<synchronous>, transform_indices = @transform_12, window_bounds = array<i64: 1, 32>}, {pipeline_mode = #tpu.pipeline_mode<synchronous>, transform_indices = @transform_13, window_bounds = array<i64: 32, 64>}, {pipeline_mode = #tpu.pipeline_mode<synchronous>, transform_indices = @transform_14, window_bounds = array<i64: 1, 64>}, {pipeline_mode = #tpu.pipeline_mode<synchronous>, transform_indices = @transform_15, window_bounds = array<i64: 64, 32>}, {pipeline_mode = #tpu.pipeline_mode<synchronous>, transform_indices = @transform_16, window_bounds = array<i64: 1, 32>}, {transform_indices = @transform_17, window_bounds = array<i64: 1, 8, 32>}]} {
    %c0 = arith.constant 0 : index
    %c0_0 = arith.constant 0 : index
    %c0_1 = arith.constant 0 : index
    %0 = vector.load %arg2[%c0, %c0_0, %c0_1] : memref<1x8x32xf32, #tpu.memory_space<vmem>>, vector<1x8x32xf32>
    %1 = vector.shape_cast %0 : vector<1x8x32xf32> to vector<8x32xf32>
    %cst = arith.constant dense<0.000000e+00> : vector<8xf32>
    %2 = vector.multi_reduction <add>, %1, %cst [1] : vector<8x32xf32> to vector<8xf32>
    %3 = vector.shape_cast %2 : vector<8xf32> to vector<8x1xf32>
    %cst_2 = arith.constant 3.200000e+01 : f32
    %4 = vector.broadcast %cst_2 : f32 to vector<8x1xf32>
    %5 = arith.divf %3, %4 : vector<8x1xf32>
    %6 = vector.broadcast %5 : vector<8x1xf32> to vector<8x32xf32>
    %7 = arith.subf %1, %6 : vector<8x32xf32>
    %8 = arith.mulf %7, %7 : vector<8x32xf32>
    %cst_3 = arith.constant dense<0.000000e+00> : vector<8xf32>
    %9 = vector.multi_reduction <add>, %8, %cst_3 [1] : vector<8x32xf32> to vector<8xf32>
    %10 = vector.shape_cast %9 : vector<8xf32> to vector<8x1xf32>
    %cst_4 = arith.constant 3.200000e+01 : f32
    %11 = vector.broadcast %cst_4 : f32 to vector<8x1xf32>
    %12 = arith.divf %10, %11 : vector<8x1xf32>
    %13 = vector.broadcast %5 : vector<8x1xf32> to vector<8x32xf32>
    %14 = arith.subf %1, %13 : vector<8x32xf32>
    %cst_5 = arith.constant 9.99999974E-6 : f32
    %15 = vector.broadcast %cst_5 : f32 to vector<8x1xf32>
    %16 = arith.addf %12, %15 : vector<8x1xf32>
    %17 = math.rsqrt %16 : vector<8x1xf32>
    %18 = vector.broadcast %17 : vector<8x1xf32> to vector<8x32xf32>
    %19 = arith.mulf %14, %18 : vector<8x32xf32>
    %c0_6 = arith.constant 0 : index
    %c0_7 = arith.constant 0 : index
    %20 = vector.load %arg3[%c0_6, %c0_7] : memref<1x32xf32, #tpu.memory_space<vmem>>, vector<1x32xf32>
    %21 = vector.broadcast %20 : vector<1x32xf32> to vector<8x32xf32>
    %22 = arith.mulf %19, %21 : vector<8x32xf32>
    %c0_8 = arith.constant 0 : index
    %c0_9 = arith.constant 0 : index
    %23 = vector.load %arg4[%c0_8, %c0_9] : memref<1x32xf32, #tpu.memory_space<vmem>>, vector<1x32xf32>
    %24 = vector.broadcast %23 : vector<1x32xf32> to vector<8x32xf32>
    %25 = arith.addf %22, %24 : vector<8x32xf32>
    %26 = arith.truncf %25 : vector<8x32xf32> to vector<8x32xbf16>
    %c0_10 = arith.constant 0 : index
    %c0_11 = arith.constant 0 : index
    %27 = vector.load %arg5[%c0_10, %c0_11] : memref<32x32xbf16, #tpu.memory_space<vmem>>, vector<32x32xbf16>
    %cst_12 = arith.constant dense<0.000000e+00> : vector<8x32xf32>
    %28 = tpu.matmul %26, %27, %cst_12 {dimension_numbers = #tpu.dot_dimension_numbers<[1], [0], [0], [1], [0, 0, 1, 1], [], []>} : vector<8x32xbf16>, vector<32x32xbf16>, vector<8x32xf32> -> vector<8x32xf32>
    %c0_13 = arith.constant 0 : index
    %c0_14 = arith.constant 0 : index
    %29 = vector.load %arg6[%c0_13, %c0_14] : memref<1x32xf32, #tpu.memory_space<vmem>>, vector<1x32xf32>
    %30 = vector.broadcast %29 : vector<1x32xf32> to vector<8x32xf32>
    %31 = arith.addf %28, %30 : vector<8x32xf32>
    %c0_15 = arith.constant 0 : index
    %c0_16 = arith.constant 0 : index
    %32 = vector.load %arg7[%c0_15, %c0_16] : memref<32x32xbf16, #tpu.memory_space<vmem>>, vector<32x32xbf16>
    %cst_17 = arith.constant dense<0.000000e+00> : vector<8x32xf32>
    %33 = tpu.matmul %26, %32, %cst_17 {dimension_numbers = #tpu.dot_dimension_numbers<[1], [0], [0], [1], [0, 0, 1, 1], [], []>} : vector<8x32xbf16>, vector<32x32xbf16>, vector<8x32xf32> -> vector<8x32xf32>
    %c0_18 = arith.constant 0 : index
    %c0_19 = arith.constant 0 : index
    %34 = vector.load %arg8[%c0_18, %c0_19] : memref<1x32xf32, #tpu.memory_space<vmem>>, vector<1x32xf32>
    %35 = vector.broadcast %34 : vector<1x32xf32> to vector<8x32xf32>
    %36 = arith.addf %33, %35 : vector<8x32xf32>
    %c0_20 = arith.constant 0 : index
    %c0_21 = arith.constant 0 : index
    %37 = vector.load %arg9[%c0_20, %c0_21] : memref<32x32xbf16, #tpu.memory_space<vmem>>, vector<32x32xbf16>
    %cst_22 = arith.constant dense<0.000000e+00> : vector<8x32xf32>
    %38 = tpu.matmul %26, %37, %cst_22 {dimension_numbers = #tpu.dot_dimension_numbers<[1], [0], [0], [1], [0, 0, 1, 1], [], []>} : vector<8x32xbf16>, vector<32x32xbf16>, vector<8x32xf32> -> vector<8x32xf32>
    %c0_23 = arith.constant 0 : index
    %c0_24 = arith.constant 0 : index
    %39 = vector.load %arg10[%c0_23, %c0_24] : memref<1x32xf32, #tpu.memory_space<vmem>>, vector<1x32xf32>
    %40 = vector.broadcast %39 : vector<1x32xf32> to vector<8x32xf32>
    %41 = arith.addf %38, %40 : vector<8x32xf32>
    %cst_25 = arith.constant 0.353553385 : f32
    %42 = vector.broadcast %cst_25 : f32 to vector<8x32xf32>
    %43 = arith.mulf %31, %42 : vector<8x32xf32>
    %44 = arith.truncf %43 : vector<8x32xf32> to vector<8x32xbf16>
    %45 = arith.truncf %36 : vector<8x32xf32> to vector<8x32xbf16>
    %46 = arith.truncf %41 : vector<8x32xf32> to vector<8x32xbf16>
    %47 = arith.index_cast %arg0 : i32 to index
    %48 = memref.load %arg1[%47] : memref<2xi32, #tpu.memory_space<smem>>
    %49 = tpu.iota {dimensions = array<i32: 0>} : vector<8x8xi32>
    %50 = tpu.iota {dimensions = array<i32: 1>} : vector<8x8xi32>
    %51 = arith.cmpi sle, %50, %49 : vector<8x8xi32>
    %52 = vector.broadcast %48 : i32 to vector<8x8xi32>
    %53 = arith.cmpi slt, %50, %52 : vector<8x8xi32>
    %54 = arith.andi %51, %53 : vector<8x8xi1>
    %cst_26 = arith.constant 0.000000e+00 : f32
    %cst_27 = arith.constant -1.000000e+09 : f32
    %55 = vector.broadcast %cst_26 : f32 to vector<8x8xf32>
    %56 = vector.broadcast %cst_27 : f32 to vector<8x8xf32>
    %57 = arith.select %54, %55, %56 : vector<8x8xi1>, vector<8x8xf32>
    %c0_28 = arith.constant 0 : index
    %c0_29 = arith.constant 0 : index
    %58 = vector.load %arg11[%c0_28, %c0_29] : memref<32x32xbf16, #tpu.memory_space<vmem>>, vector<32x32xbf16>
    %cst_30 = arith.constant 0.000000e+00 : f32
    %59 = vector.broadcast %cst_30 : f32 to vector<8x32xf32>
    %60 = vector.extract_strided_slice %44 {offsets = [0, 0], sizes = [8, 8], strides = [1, 1]} : vector<8x32xbf16> to vector<8x8xbf16>
    %61 = vector.extract_strided_slice %45 {offsets = [0, 0], sizes = [8, 8], strides = [1, 1]} : vector<8x32xbf16> to vector<8x8xbf16>
    %cst_31 = arith.constant dense<0.000000e+00> : vector<8x8xf32>
    %62 = tpu.matmul %60, %61, %cst_31 {dimension_numbers = #tpu.dot_dimension_numbers<[1], [1], [0], [0], [0, 0, 1, 0], [], []>} : vector<8x8xbf16>, vector<8x8xbf16>, vector<8x8xf32> -> vector<8x8xf32>
    %63 = arith.addf %62, %57 : vector<8x8xf32>
    %cst_32 = arith.constant dense<0xFF800000> : vector<8xf32>
    %64 = vector.multi_reduction <maximumf>, %63, %cst_32 [1] : vector<8x8xf32> to vector<8xf32>
    %65 = vector.shape_cast %64 : vector<8xf32> to vector<8x1xf32>
    %66 = vector.broadcast %65 : vector<8x1xf32> to vector<8x8xf32>
    %67 = arith.subf %63, %66 : vector<8x8xf32>
    %68 = math.exp %67 : vector<8x8xf32>
    %cst_33 = arith.constant dense<0.000000e+00> : vector<8xf32>
    %69 = vector.multi_reduction <add>, %68, %cst_33 [1] : vector<8x8xf32> to vector<8xf32>
    %70 = vector.shape_cast %69 : vector<8xf32> to vector<8x1xf32>
    %71 = tpu.reciprocal %70 {approx = true} : vector<8x1xf32> -> vector<8x1xf32>
    %72 = vector.broadcast %71 : vector<8x1xf32> to vector<8x8xf32>
    %73 = arith.mulf %68, %72 : vector<8x8xf32>
    %74 = arith.truncf %73 : vector<8x8xf32> to vector<8x8xbf16>
    %75 = vector.extract_strided_slice %46 {offsets = [0, 0], sizes = [8, 8], strides = [1, 1]} : vector<8x32xbf16> to vector<8x8xbf16>
    %cst_34 = arith.constant dense<0.000000e+00> : vector<8x8xf32>
    %76 = tpu.matmul %74, %75, %cst_34 {dimension_numbers = #tpu.dot_dimension_numbers<[1], [0], [0], [1], [0, 0, 1, 1], [], []>} : vector<8x8xbf16>, vector<8x8xbf16>, vector<8x8xf32> -> vector<8x8xf32>
    %77 = arith.truncf %76 : vector<8x8xf32> to vector<8x8xbf16>
    %78 = vector.extract_strided_slice %58 {offsets = [0, 0], sizes = [8, 32], strides = [1, 1]} : vector<32x32xbf16> to vector<8x32xbf16>
    %cst_35 = arith.constant dense<0.000000e+00> : vector<8x32xf32>
    %79 = tpu.matmul %77, %78, %cst_35 {dimension_numbers = #tpu.dot_dimension_numbers<[1], [0], [0], [1], [0, 0, 1, 1], [], []>} : vector<8x8xbf16>, vector<8x32xbf16>, vector<8x32xf32> -> vector<8x32xf32>
    %80 = arith.addf %59, %79 : vector<8x32xf32>
    %81 = vector.extract_strided_slice %44 {offsets = [0, 8], sizes = [8, 8], strides = [1, 1]} : vector<8x32xbf16> to vector<8x8xbf16>
    %82 = vector.extract_strided_slice %45 {offsets = [0, 8], sizes = [8, 8], strides = [1, 1]} : vector<8x32xbf16> to vector<8x8xbf16>
    %cst_36 = arith.constant dense<0.000000e+00> : vector<8x8xf32>
    %83 = tpu.matmul %81, %82, %cst_36 {dimension_numbers = #tpu.dot_dimension_numbers<[1], [1], [0], [0], [0, 0, 1, 0], [], []>} : vector<8x8xbf16>, vector<8x8xbf16>, vector<8x8xf32> -> vector<8x8xf32>
    %84 = arith.addf %83, %57 : vector<8x8xf32>
    %cst_37 = arith.constant dense<0xFF800000> : vector<8xf32>
    %85 = vector.multi_reduction <maximumf>, %84, %cst_37 [1] : vector<8x8xf32> to vector<8xf32>
    %86 = vector.shape_cast %85 : vector<8xf32> to vector<8x1xf32>
    %87 = vector.broadcast %86 : vector<8x1xf32> to vector<8x8xf32>
    %88 = arith.subf %84, %87 : vector<8x8xf32>
    %89 = math.exp %88 : vector<8x8xf32>
    %cst_38 = arith.constant dense<0.000000e+00> : vector<8xf32>
    %90 = vector.multi_reduction <add>, %89, %cst_38 [1] : vector<8x8xf32> to vector<8xf32>
    %91 = vector.shape_cast %90 : vector<8xf32> to vector<8x1xf32>
    %92 = tpu.reciprocal %91 {approx = true} : vector<8x1xf32> -> vector<8x1xf32>
    %93 = vector.broadcast %92 : vector<8x1xf32> to vector<8x8xf32>
    %94 = arith.mulf %89, %93 : vector<8x8xf32>
    %95 = arith.truncf %94 : vector<8x8xf32> to vector<8x8xbf16>
    %96 = vector.extract_strided_slice %46 {offsets = [0, 8], sizes = [8, 8], strides = [1, 1]} : vector<8x32xbf16> to vector<8x8xbf16>
    %cst_39 = arith.constant dense<0.000000e+00> : vector<8x8xf32>
    %97 = tpu.matmul %95, %96, %cst_39 {dimension_numbers = #tpu.dot_dimension_numbers<[1], [0], [0], [1], [0, 0, 1, 1], [], []>} : vector<8x8xbf16>, vector<8x8xbf16>, vector<8x8xf32> -> vector<8x8xf32>
    %98 = arith.truncf %97 : vector<8x8xf32> to vector<8x8xbf16>
    %99 = vector.extract_strided_slice %58 {offsets = [8, 0], sizes = [8, 32], strides = [1, 1]} : vector<32x32xbf16> to vector<8x32xbf16>
    %cst_40 = arith.constant dense<0.000000e+00> : vector<8x32xf32>
    %100 = tpu.matmul %98, %99, %cst_40 {dimension_numbers = #tpu.dot_dimension_numbers<[1], [0], [0], [1], [0, 0, 1, 1], [], []>} : vector<8x8xbf16>, vector<8x32xbf16>, vector<8x32xf32> -> vector<8x32xf32>
    %101 = arith.addf %80, %100 : vector<8x32xf32>
    %102 = vector.extract_strided_slice %44 {offsets = [0, 16], sizes = [8, 8], strides = [1, 1]} : vector<8x32xbf16> to vector<8x8xbf16>
    %103 = vector.extract_strided_slice %45 {offsets = [0, 16], sizes = [8, 8], strides = [1, 1]} : vector<8x32xbf16> to vector<8x8xbf16>
    %cst_41 = arith.constant dense<0.000000e+00> : vector<8x8xf32>
    %104 = tpu.matmul %102, %103, %cst_41 {dimension_numbers = #tpu.dot_dimension_numbers<[1], [1], [0], [0], [0, 0, 1, 0], [], []>} : vector<8x8xbf16>, vector<8x8xbf16>, vector<8x8xf32> -> vector<8x8xf32>
    %105 = arith.addf %104, %57 : vector<8x8xf32>
    %cst_42 = arith.constant dense<0xFF800000> : vector<8xf32>
    %106 = vector.multi_reduction <maximumf>, %105, %cst_42 [1] : vector<8x8xf32> to vector<8xf32>
    %107 = vector.shape_cast %106 : vector<8xf32> to vector<8x1xf32>
    %108 = vector.broadcast %107 : vector<8x1xf32> to vector<8x8xf32>
    %109 = arith.subf %105, %108 : vector<8x8xf32>
    %110 = math.exp %109 : vector<8x8xf32>
    %cst_43 = arith.constant dense<0.000000e+00> : vector<8xf32>
    %111 = vector.multi_reduction <add>, %110, %cst_43 [1] : vector<8x8xf32> to vector<8xf32>
    %112 = vector.shape_cast %111 : vector<8xf32> to vector<8x1xf32>
    %113 = tpu.reciprocal %112 {approx = true} : vector<8x1xf32> -> vector<8x1xf32>
    %114 = vector.broadcast %113 : vector<8x1xf32> to vector<8x8xf32>
    %115 = arith.mulf %110, %114 : vector<8x8xf32>
    %116 = arith.truncf %115 : vector<8x8xf32> to vector<8x8xbf16>
    %117 = vector.extract_strided_slice %46 {offsets = [0, 16], sizes = [8, 8], strides = [1, 1]} : vector<8x32xbf16> to vector<8x8xbf16>
    %cst_44 = arith.constant dense<0.000000e+00> : vector<8x8xf32>
    %118 = tpu.matmul %116, %117, %cst_44 {dimension_numbers = #tpu.dot_dimension_numbers<[1], [0], [0], [1], [0, 0, 1, 1], [], []>} : vector<8x8xbf16>, vector<8x8xbf16>, vector<8x8xf32> -> vector<8x8xf32>
    %119 = arith.truncf %118 : vector<8x8xf32> to vector<8x8xbf16>
    %120 = vector.extract_strided_slice %58 {offsets = [16, 0], sizes = [8, 32], strides = [1, 1]} : vector<32x32xbf16> to vector<8x32xbf16>
    %cst_45 = arith.constant dense<0.000000e+00> : vector<8x32xf32>
    %121 = tpu.matmul %119, %120, %cst_45 {dimension_numbers = #tpu.dot_dimension_numbers<[1], [0], [0], [1], [0, 0, 1, 1], [], []>} : vector<8x8xbf16>, vector<8x32xbf16>, vector<8x32xf32> -> vector<8x32xf32>
    %122 = arith.addf %101, %121 : vector<8x32xf32>
    %123 = vector.extract_strided_slice %44 {offsets = [0, 24], sizes = [8, 8], strides = [1, 1]} : vector<8x32xbf16> to vector<8x8xbf16>
    %124 = vector.extract_strided_slice %45 {offsets = [0, 24], sizes = [8, 8], strides = [1, 1]} : vector<8x32xbf16> to vector<8x8xbf16>
    %cst_46 = arith.constant dense<0.000000e+00> : vector<8x8xf32>
    %125 = tpu.matmul %123, %124, %cst_46 {dimension_numbers = #tpu.dot_dimension_numbers<[1], [1], [0], [0], [0, 0, 1, 0], [], []>} : vector<8x8xbf16>, vector<8x8xbf16>, vector<8x8xf32> -> vector<8x8xf32>
    %126 = arith.addf %125, %57 : vector<8x8xf32>
    %cst_47 = arith.constant dense<0xFF800000> : vector<8xf32>
    %127 = vector.multi_reduction <maximumf>, %126, %cst_47 [1] : vector<8x8xf32> to vector<8xf32>
    %128 = vector.shape_cast %127 : vector<8xf32> to vector<8x1xf32>
    %129 = vector.broadcast %128 : vector<8x1xf32> to vector<8x8xf32>
    %130 = arith.subf %126, %129 : vector<8x8xf32>
    %131 = math.exp %130 : vector<8x8xf32>
    %cst_48 = arith.constant dense<0.000000e+00> : vector<8xf32>
    %132 = vector.multi_reduction <add>, %131, %cst_48 [1] : vector<8x8xf32> to vector<8xf32>
    %133 = vector.shape_cast %132 : vector<8xf32> to vector<8x1xf32>
    %134 = tpu.reciprocal %133 {approx = true} : vector<8x1xf32> -> vector<8x1xf32>
    %135 = vector.broadcast %134 : vector<8x1xf32> to vector<8x8xf32>
    %136 = arith.mulf %131, %135 : vector<8x8xf32>
    %137 = arith.truncf %136 : vector<8x8xf32> to vector<8x8xbf16>
    %138 = vector.extract_strided_slice %46 {offsets = [0, 24], sizes = [8, 8], strides = [1, 1]} : vector<8x32xbf16> to vector<8x8xbf16>
    %cst_49 = arith.constant dense<0.000000e+00> : vector<8x8xf32>
    %139 = tpu.matmul %137, %138, %cst_49 {dimension_numbers = #tpu.dot_dimension_numbers<[1], [0], [0], [1], [0, 0, 1, 1], [], []>} : vector<8x8xbf16>, vector<8x8xbf16>, vector<8x8xf32> -> vector<8x8xf32>
    %140 = arith.truncf %139 : vector<8x8xf32> to vector<8x8xbf16>
    %141 = vector.extract_strided_slice %58 {offsets = [24, 0], sizes = [8, 32], strides = [1, 1]} : vector<32x32xbf16> to vector<8x32xbf16>
    %cst_50 = arith.constant dense<0.000000e+00> : vector<8x32xf32>
    %142 = tpu.matmul %140, %141, %cst_50 {dimension_numbers = #tpu.dot_dimension_numbers<[1], [0], [0], [1], [0, 0, 1, 1], [], []>} : vector<8x8xbf16>, vector<8x32xbf16>, vector<8x32xf32> -> vector<8x32xf32>
    %143 = arith.addf %122, %142 : vector<8x32xf32>
    %144 = arith.addf %1, %143 : vector<8x32xf32>
    %c0_51 = arith.constant 0 : index
    %c0_52 = arith.constant 0 : index
    %145 = vector.load %arg12[%c0_51, %c0_52] : memref<1x32xf32, #tpu.memory_space<vmem>>, vector<1x32xf32>
    %146 = vector.broadcast %145 : vector<1x32xf32> to vector<8x32xf32>
    %147 = arith.addf %144, %146 : vector<8x32xf32>
    %cst_53 = arith.constant dense<0.000000e+00> : vector<8xf32>
    %148 = vector.multi_reduction <add>, %147, %cst_53 [1] : vector<8x32xf32> to vector<8xf32>
    %149 = vector.shape_cast %148 : vector<8xf32> to vector<8x1xf32>
    %cst_54 = arith.constant 3.200000e+01 : f32
    %150 = vector.broadcast %cst_54 : f32 to vector<8x1xf32>
    %151 = arith.divf %149, %150 : vector<8x1xf32>
    %152 = vector.broadcast %151 : vector<8x1xf32> to vector<8x32xf32>
    %153 = arith.subf %147, %152 : vector<8x32xf32>
    %154 = arith.mulf %153, %153 : vector<8x32xf32>
    %cst_55 = arith.constant dense<0.000000e+00> : vector<8xf32>
    %155 = vector.multi_reduction <add>, %154, %cst_55 [1] : vector<8x32xf32> to vector<8xf32>
    %156 = vector.shape_cast %155 : vector<8xf32> to vector<8x1xf32>
    %cst_56 = arith.constant 3.200000e+01 : f32
    %157 = vector.broadcast %cst_56 : f32 to vector<8x1xf32>
    %158 = arith.divf %156, %157 : vector<8x1xf32>
    %159 = vector.broadcast %151 : vector<8x1xf32> to vector<8x32xf32>
    %160 = arith.subf %147, %159 : vector<8x32xf32>
    %cst_57 = arith.constant 9.99999974E-6 : f32
    %161 = vector.broadcast %cst_57 : f32 to vector<8x1xf32>
    %162 = arith.addf %158, %161 : vector<8x1xf32>
    %163 = math.rsqrt %162 : vector<8x1xf32>
    %164 = vector.broadcast %163 : vector<8x1xf32> to vector<8x32xf32>
    %165 = arith.mulf %160, %164 : vector<8x32xf32>
    %c0_58 = arith.constant 0 : index
    %c0_59 = arith.constant 0 : index
    %166 = vector.load %arg13[%c0_58, %c0_59] : memref<1x32xf32, #tpu.memory_space<vmem>>, vector<1x32xf32>
    %167 = vector.broadcast %166 : vector<1x32xf32> to vector<8x32xf32>
    %168 = arith.mulf %165, %167 : vector<8x32xf32>
    %c0_60 = arith.constant 0 : index
    %c0_61 = arith.constant 0 : index
    %169 = vector.load %arg14[%c0_60, %c0_61] : memref<1x32xf32, #tpu.memory_space<vmem>>, vector<1x32xf32>
    %170 = vector.broadcast %169 : vector<1x32xf32> to vector<8x32xf32>
    %171 = arith.addf %168, %170 : vector<8x32xf32>
    %172 = arith.truncf %171 : vector<8x32xf32> to vector<8x32xbf16>
    %c0_62 = arith.constant 0 : index
    %c0_63 = arith.constant 0 : index
    %173 = vector.load %arg15[%c0_62, %c0_63] : memref<32x64xbf16, #tpu.memory_space<vmem>>, vector<32x64xbf16>
    %cst_64 = arith.constant dense<0.000000e+00> : vector<8x64xf32>
    %174 = tpu.matmul %172, %173, %cst_64 {dimension_numbers = #tpu.dot_dimension_numbers<[1], [0], [0], [1], [0, 0, 1, 1], [], []>} : vector<8x32xbf16>, vector<32x64xbf16>, vector<8x64xf32> -> vector<8x64xf32>
    %c0_65 = arith.constant 0 : index
    %c0_66 = arith.constant 0 : index
    %175 = vector.load %arg16[%c0_65, %c0_66] : memref<1x64xf32, #tpu.memory_space<vmem>>, vector<1x64xf32>
    %176 = vector.broadcast %175 : vector<1x64xf32> to vector<8x64xf32>
    %177 = arith.addf %174, %176 : vector<8x64xf32>
    %cst_67 = arith.constant -1.702000e+00 : f32
    %178 = vector.broadcast %cst_67 : f32 to vector<8x64xf32>
    %179 = arith.mulf %178, %177 : vector<8x64xf32>
    %180 = math.exp %179 : vector<8x64xf32>
    %cst_68 = arith.constant 1.000000e+00 : f32
    %181 = vector.broadcast %cst_68 : f32 to vector<8x64xf32>
    %182 = arith.addf %181, %180 : vector<8x64xf32>
    %183 = tpu.reciprocal %182 {approx = true} : vector<8x64xf32> -> vector<8x64xf32>
    %184 = arith.mulf %177, %183 : vector<8x64xf32>
    %185 = arith.truncf %184 : vector<8x64xf32> to vector<8x64xbf16>
    %c0_69 = arith.constant 0 : index
    %c0_70 = arith.constant 0 : index
    %186 = vector.load %arg17[%c0_69, %c0_70] : memref<64x32xbf16, #tpu.memory_space<vmem>>, vector<64x32xbf16>
    %cst_71 = arith.constant dense<0.000000e+00> : vector<8x32xf32>
    %187 = tpu.matmul %185, %186, %cst_71 {dimension_numbers = #tpu.dot_dimension_numbers<[1], [0], [0], [1], [0, 0, 1, 1], [], []>} : vector<8x64xbf16>, vector<64x32xbf16>, vector<8x32xf32> -> vector<8x32xf32>
    %c0_72 = arith.constant 0 : index
    %c0_73 = arith.constant 0 : index
    %188 = vector.load %arg18[%c0_72, %c0_73] : memref<1x32xf32, #tpu.memory_space<vmem>>, vector<1x32xf32>
    %189 = vector.broadcast %188 : vector<1x32xf32> to vector<8x32xf32>
    %190 = arith.addf %187, %189 : vector<8x32xf32>
    %191 = arith.addf %147, %190 : vector<8x32xf32>
    %c0_74 = arith.constant 0 : index
    %c0_75 = arith.constant 0 : index
    %c0_76 = arith.constant 0 : index
    %192 = vector.load %arg19[%c0_74, %c0_75, %c0_76] : memref<1x8x32xf32, #tpu.memory_space<vmem>>, vector<1x8x32xf32>
    %193 = vector.shape_cast %192 : vector<1x8x32xf32> to vector<8x32xf32>
    %194 = vector.shape_cast %191 : vector<8x32xf32> to vector<1x8x32xf32>
    tpu.vector_store %arg19[%c0_74, %c0_75, %c0_76], %194 {strides = array<i32>} : memref<1x8x32xf32, #tpu.memory_space<vmem>>, vector<1x8x32xf32>,
    return
  }
  func.func @transform_0(%arg0: i32, %arg1: memref<2xi32, #tpu.memory_space<smem>>) -> (i32, i32, i32) {
    %c0_i32 = arith.constant 0 : i32
    %c0_i32_0 = arith.constant 0 : i32
    %c0_i32_1 = arith.constant 0 : i32
    return %arg0, %c0_i32, %c0_i32_0 : i32, i32, i32
  }
  func.func @transform_1(%arg0: i32, %arg1: memref<2xi32, #tpu.memory_space<smem>>) -> (i32, i32) {
    %c0_i32 = arith.constant 0 : i32
    %c0_i32_0 = arith.constant 0 : i32
    %c0_i32_1 = arith.constant 0 : i32
    return %c0_i32, %c0_i32_0 : i32, i32
  }
  func.func @transform_2(%arg0: i32, %arg1: memref<2xi32, #tpu.memory_space<smem>>) -> (i32, i32) {
    %c0_i32 = arith.constant 0 : i32
    %c0_i32_0 = arith.constant 0 : i32
    %c0_i32_1 = arith.constant 0 : i32
    return %c0_i32, %c0_i32_0 : i32, i32
  }
  func.func @transform_3(%arg0: i32, %arg1: memref<2xi32, #tpu.memory_space<smem>>) -> (i32, i32) {
    %c0_i32 = arith.constant 0 : i32
    %c0_i32_0 = arith.constant 0 : i32
    %c0_i32_1 = arith.constant 0 : i32
    return %c0_i32, %c0_i32_0 : i32, i32
  }
  func.func @transform_4(%arg0: i32, %arg1: memref<2xi32, #tpu.memory_space<smem>>) -> (i32, i32) {
    %c0_i32 = arith.constant 0 : i32
    %c0_i32_0 = arith.constant 0 : i32
    %c0_i32_1 = arith.constant 0 : i32
    return %c0_i32, %c0_i32_0 : i32, i32
  }
  func.func @transform_5(%arg0: i32, %arg1: memref<2xi32, #tpu.memory_space<smem>>) -> (i32, i32) {
    %c0_i32 = arith.constant 0 : i32
    %c0_i32_0 = arith.constant 0 : i32
    %c0_i32_1 = arith.constant 0 : i32
    return %c0_i32, %c0_i32_0 : i32, i32
  }
  func.func @transform_6(%arg0: i32, %arg1: memref<2xi32, #tpu.memory_space<smem>>) -> (i32, i32) {
    %c0_i32 = arith.constant 0 : i32
    %c0_i32_0 = arith.constant 0 : i32
    %c0_i32_1 = arith.constant 0 : i32
    return %c0_i32, %c0_i32_0 : i32, i32
  }
  func.func @transform_7(%arg0: i32, %arg1: memref<2xi32, #tpu.memory_space<smem>>) -> (i32, i32) {
    %c0_i32 = arith.constant 0 : i32
    %c0_i32_0 = arith.constant 0 : i32
    %c0_i32_1 = arith.constant 0 : i32
    return %c0_i32, %c0_i32_0 : i32, i32
  }
  func.func @transform_8(%arg0: i32, %arg1: memref<2xi32, #tpu.memory_space<smem>>) -> (i32, i32) {
    %c0_i32 = arith.constant 0 : i32
    %c0_i32_0 = arith.constant 0 : i32
    %c0_i32_1 = arith.constant 0 : i32
    return %c0_i32, %c0_i32_0 : i32, i32
  }
  func.func @transform_9(%arg0: i32, %arg1: memref<2xi32, #tpu.memory_space<smem>>) -> (i32, i32) {
    %c0_i32 = arith.constant 0 : i32
    %c0_i32_0 = arith.constant 0 : i32
    %c0_i32_1 = arith.constant 0 : i32
    return %c0_i32, %c0_i32_0 : i32, i32
  }
  func.func @transform_10(%arg0: i32, %arg1: memref<2xi32, #tpu.memory_space<smem>>) -> (i32, i32) {
    %c0_i32 = arith.constant 0 : i32
    %c0_i32_0 = arith.constant 0 : i32
    %c0_i32_1 = arith.constant 0 : i32
    return %c0_i32, %c0_i32_0 : i32, i32
  }
  func.func @transform_11(%arg0: i32, %arg1: memref<2xi32, #tpu.memory_space<smem>>) -> (i32, i32) {
    %c0_i32 = arith.constant 0 : i32
    %c0_i32_0 = arith.constant 0 : i32
    %c0_i32_1 = arith.constant 0 : i32
    return %c0_i32, %c0_i32_0 : i32, i32
  }
  func.func @transform_12(%arg0: i32, %arg1: memref<2xi32, #tpu.memory_space<smem>>) -> (i32, i32) {
    %c0_i32 = arith.constant 0 : i32
    %c0_i32_0 = arith.constant 0 : i32
    %c0_i32_1 = arith.constant 0 : i32
    return %c0_i32, %c0_i32_0 : i32, i32
  }
  func.func @transform_13(%arg0: i32, %arg1: memref<2xi32, #tpu.memory_space<smem>>) -> (i32, i32) {
    %c0_i32 = arith.constant 0 : i32
    %c0_i32_0 = arith.constant 0 : i32
    %c0_i32_1 = arith.constant 0 : i32
    return %c0_i32, %c0_i32_0 : i32, i32
  }
  func.func @transform_14(%arg0: i32, %arg1: memref<2xi32, #tpu.memory_space<smem>>) -> (i32, i32) {
    %c0_i32 = arith.constant 0 : i32
    %c0_i32_0 = arith.constant 0 : i32
    %c0_i32_1 = arith.constant 0 : i32
    return %c0_i32, %c0_i32_0 : i32, i32
  }
  func.func @transform_15(%arg0: i32, %arg1: memref<2xi32, #tpu.memory_space<smem>>) -> (i32, i32) {
    %c0_i32 = arith.constant 0 : i32
    %c0_i32_0 = arith.constant 0 : i32
    %c0_i32_1 = arith.constant 0 : i32
    return %c0_i32, %c0_i32_0 : i32, i32
  }
  func.func @transform_16(%arg0: i32, %arg1: memref<2xi32, #tpu.memory_space<smem>>) -> (i32, i32) {
    %c0_i32 = arith.constant 0 : i32
    %c0_i32_0 = arith.constant 0 : i32
    %c0_i32_1 = arith.constant 0 : i32
    return %c0_i32, %c0_i32_0 : i32, i32
  }
  func.func @transform_17(%arg0: i32, %arg1: memref<2xi32, #tpu.memory_space<smem>>) -> (i32, i32, i32) {
    %c0_i32 = arith.constant 0 : i32
    %c0_i32_0 = arith.constant 0 : i32
    %c0_i32_1 = arith.constant 0 : i32
    return %arg0, %c0_i32, %c0_i32_0 : i32, i32, i32
  }
}

module attributes {stable_mosaic.version = 11 : i64} {
  func.func @_tail_kernel(%arg0: i32, %arg1: memref<2x32xf32, #tpu.memory_space<vmem>>, %arg2: memref<2x32xf32, #tpu.memory_space<vmem>>, %arg3: memref<1x32xf32, #tpu.memory_space<vmem>>, %arg4: memref<1x32xf32, #tpu.memory_space<vmem>>, %arg5: memref<1x32xf32, #tpu.memory_space<vmem>>, %arg6: memref<1x32xf32, #tpu.memory_space<vmem>>, %arg7: memref<32x16xbf16, #tpu.memory_space<vmem>>, %arg8: memref<32x16xbf16, #tpu.memory_space<vmem>>, %arg9: memref<16x64xbf16, #tpu.memory_space<vmem>>, %arg10: memref<1x64xf32, #tpu.memory_space<vmem>>, %arg11: memref<64x5xbf16, #tpu.memory_space<vmem>>, %arg12: memref<1x5xf32, #tpu.memory_space<vmem>>, %arg13: memref<2x5xf32, #tpu.memory_space<vmem>>) attributes {dimension_semantics = [#tpu.dimension_semantics<arbitrary>], iteration_bounds = array<i64: 1>, scalar_prefetch = 0 : i64, scratch_operands = 0 : i64, tpu.core_type = #tpu.core_type<tc>, window_params = [{pipeline_mode = #tpu.pipeline_mode<synchronous>, transform_indices = @transform_0, window_bounds = array<i64: 2, 32>}, {pipeline_mode = #tpu.pipeline_mode<synchronous>, transform_indices = @transform_1, window_bounds = array<i64: 2, 32>}, {pipeline_mode = #tpu.pipeline_mode<synchronous>, transform_indices = @transform_2, window_bounds = array<i64: 1, 32>}, {pipeline_mode = #tpu.pipeline_mode<synchronous>, transform_indices = @transform_3, window_bounds = array<i64: 1, 32>}, {pipeline_mode = #tpu.pipeline_mode<synchronous>, transform_indices = @transform_4, window_bounds = array<i64: 1, 32>}, {pipeline_mode = #tpu.pipeline_mode<synchronous>, transform_indices = @transform_5, window_bounds = array<i64: 1, 32>}, {pipeline_mode = #tpu.pipeline_mode<synchronous>, transform_indices = @transform_6, window_bounds = array<i64: 32, 16>}, {pipeline_mode = #tpu.pipeline_mode<synchronous>, transform_indices = @transform_7, window_bounds = array<i64: 32, 16>}, {pipeline_mode = #tpu.pipeline_mode<synchronous>, transform_indices = @transform_8, window_bounds = array<i64: 16, 64>}, {pipeline_mode = #tpu.pipeline_mode<synchronous>, transform_indices = @transform_9, window_bounds = array<i64: 1, 64>}, {pipeline_mode = #tpu.pipeline_mode<synchronous>, transform_indices = @transform_10, window_bounds = array<i64: 64, 5>}, {pipeline_mode = #tpu.pipeline_mode<synchronous>, transform_indices = @transform_11, window_bounds = array<i64: 1, 5>}, {pipeline_mode = #tpu.pipeline_mode<synchronous>, transform_indices = @transform_12, window_bounds = array<i64: 2, 5>}]} {
    %c0 = arith.constant 0 : index
    %c0_0 = arith.constant 0 : index
    %0 = vector.load %arg1[%c0, %c0_0] : memref<2x32xf32, #tpu.memory_space<vmem>>, vector<2x32xf32>
    %cst = arith.constant dense<0.000000e+00> : vector<2xf32>
    %1 = vector.multi_reduction <add>, %0, %cst [1] : vector<2x32xf32> to vector<2xf32>
    %2 = vector.shape_cast %1 : vector<2xf32> to vector<2x1xf32>
    %cst_1 = arith.constant 3.200000e+01 : f32
    %3 = vector.broadcast %cst_1 : f32 to vector<2x1xf32>
    %4 = arith.divf %2, %3 : vector<2x1xf32>
    %5 = vector.broadcast %4 : vector<2x1xf32> to vector<2x32xf32>
    %6 = arith.subf %0, %5 : vector<2x32xf32>
    %7 = arith.mulf %6, %6 : vector<2x32xf32>
    %cst_2 = arith.constant dense<0.000000e+00> : vector<2xf32>
    %8 = vector.multi_reduction <add>, %7, %cst_2 [1] : vector<2x32xf32> to vector<2xf32>
    %9 = vector.shape_cast %8 : vector<2xf32> to vector<2x1xf32>
    %cst_3 = arith.constant 3.200000e+01 : f32
    %10 = vector.broadcast %cst_3 : f32 to vector<2x1xf32>
    %11 = arith.divf %9, %10 : vector<2x1xf32>
    %12 = vector.broadcast %4 : vector<2x1xf32> to vector<2x32xf32>
    %13 = arith.subf %0, %12 : vector<2x32xf32>
    %cst_4 = arith.constant 9.99999974E-6 : f32
    %14 = vector.broadcast %cst_4 : f32 to vector<2x1xf32>
    %15 = arith.addf %11, %14 : vector<2x1xf32>
    %16 = math.rsqrt %15 : vector<2x1xf32>
    %17 = vector.broadcast %16 : vector<2x1xf32> to vector<2x32xf32>
    %18 = arith.mulf %13, %17 : vector<2x32xf32>
    %c0_5 = arith.constant 0 : index
    %c0_6 = arith.constant 0 : index
    %19 = vector.load %arg3[%c0_5, %c0_6] : memref<1x32xf32, #tpu.memory_space<vmem>>, vector<1x32xf32>
    %20 = vector.broadcast %19 : vector<1x32xf32> to vector<2x32xf32>
    %21 = arith.mulf %18, %20 : vector<2x32xf32>
    %c0_7 = arith.constant 0 : index
    %c0_8 = arith.constant 0 : index
    %22 = vector.load %arg4[%c0_7, %c0_8] : memref<1x32xf32, #tpu.memory_space<vmem>>, vector<1x32xf32>
    %23 = vector.broadcast %22 : vector<1x32xf32> to vector<2x32xf32>
    %24 = arith.addf %21, %23 : vector<2x32xf32>
    %25 = arith.truncf %24 : vector<2x32xf32> to vector<2x32xbf16>
    %c0_9 = arith.constant 0 : index
    %c0_10 = arith.constant 0 : index
    %26 = vector.load %arg7[%c0_9, %c0_10] : memref<32x16xbf16, #tpu.memory_space<vmem>>, vector<32x16xbf16>
    %cst_11 = arith.constant dense<0.000000e+00> : vector<2x16xf32>
    %27 = tpu.matmul %25, %26, %cst_11 {dimension_numbers = #tpu.dot_dimension_numbers<[1], [0], [0], [1], [0, 0, 1, 1], [], []>} : vector<2x32xbf16>, vector<32x16xbf16>, vector<2x16xf32> -> vector<2x16xf32>
    %c0_12 = arith.constant 0 : index
    %c0_13 = arith.constant 0 : index
    %28 = vector.load %arg2[%c0_12, %c0_13] : memref<2x32xf32, #tpu.memory_space<vmem>>, vector<2x32xf32>
    %cst_14 = arith.constant dense<0.000000e+00> : vector<2xf32>
    %29 = vector.multi_reduction <add>, %28, %cst_14 [1] : vector<2x32xf32> to vector<2xf32>
    %30 = vector.shape_cast %29 : vector<2xf32> to vector<2x1xf32>
    %cst_15 = arith.constant 3.200000e+01 : f32
    %31 = vector.broadcast %cst_15 : f32 to vector<2x1xf32>
    %32 = arith.divf %30, %31 : vector<2x1xf32>
    %33 = vector.broadcast %32 : vector<2x1xf32> to vector<2x32xf32>
    %34 = arith.subf %28, %33 : vector<2x32xf32>
    %35 = arith.mulf %34, %34 : vector<2x32xf32>
    %cst_16 = arith.constant dense<0.000000e+00> : vector<2xf32>
    %36 = vector.multi_reduction <add>, %35, %cst_16 [1] : vector<2x32xf32> to vector<2xf32>
    %37 = vector.shape_cast %36 : vector<2xf32> to vector<2x1xf32>
    %cst_17 = arith.constant 3.200000e+01 : f32
    %38 = vector.broadcast %cst_17 : f32 to vector<2x1xf32>
    %39 = arith.divf %37, %38 : vector<2x1xf32>
    %40 = vector.broadcast %32 : vector<2x1xf32> to vector<2x32xf32>
    %41 = arith.subf %28, %40 : vector<2x32xf32>
    %cst_18 = arith.constant 9.99999974E-6 : f32
    %42 = vector.broadcast %cst_18 : f32 to vector<2x1xf32>
    %43 = arith.addf %39, %42 : vector<2x1xf32>
    %44 = math.rsqrt %43 : vector<2x1xf32>
    %45 = vector.broadcast %44 : vector<2x1xf32> to vector<2x32xf32>
    %46 = arith.mulf %41, %45 : vector<2x32xf32>
    %c0_19 = arith.constant 0 : index
    %c0_20 = arith.constant 0 : index
    %47 = vector.load %arg5[%c0_19, %c0_20] : memref<1x32xf32, #tpu.memory_space<vmem>>, vector<1x32xf32>
    %48 = vector.broadcast %47 : vector<1x32xf32> to vector<2x32xf32>
    %49 = arith.mulf %46, %48 : vector<2x32xf32>
    %c0_21 = arith.constant 0 : index
    %c0_22 = arith.constant 0 : index
    %50 = vector.load %arg6[%c0_21, %c0_22] : memref<1x32xf32, #tpu.memory_space<vmem>>, vector<1x32xf32>
    %51 = vector.broadcast %50 : vector<1x32xf32> to vector<2x32xf32>
    %52 = arith.addf %49, %51 : vector<2x32xf32>
    %53 = arith.truncf %52 : vector<2x32xf32> to vector<2x32xbf16>
    %c0_23 = arith.constant 0 : index
    %c0_24 = arith.constant 0 : index
    %54 = vector.load %arg8[%c0_23, %c0_24] : memref<32x16xbf16, #tpu.memory_space<vmem>>, vector<32x16xbf16>
    %cst_25 = arith.constant dense<0.000000e+00> : vector<2x16xf32>
    %55 = tpu.matmul %53, %54, %cst_25 {dimension_numbers = #tpu.dot_dimension_numbers<[1], [0], [0], [1], [0, 0, 1, 1], [], []>} : vector<2x32xbf16>, vector<32x16xbf16>, vector<2x16xf32> -> vector<2x16xf32>
    %56 = arith.mulf %27, %27 : vector<2x16xf32>
    %cst_26 = arith.constant dense<0.000000e+00> : vector<2xf32>
    %57 = vector.multi_reduction <add>, %56, %cst_26 [1] : vector<2x16xf32> to vector<2xf32>
    %58 = vector.shape_cast %57 : vector<2xf32> to vector<2x1xf32>
    %cst_27 = arith.constant 9.99999996E-13 : f32
    %59 = vector.broadcast %cst_27 : f32 to vector<2x1xf32>
    %60 = arith.addf %58, %59 : vector<2x1xf32>
    %61 = math.rsqrt %60 : vector<2x1xf32>
    %62 = vector.broadcast %61 : vector<2x1xf32> to vector<2x16xf32>
    %63 = arith.mulf %27, %62 : vector<2x16xf32>
    %64 = arith.mulf %55, %55 : vector<2x16xf32>
    %cst_28 = arith.constant dense<0.000000e+00> : vector<2xf32>
    %65 = vector.multi_reduction <add>, %64, %cst_28 [1] : vector<2x16xf32> to vector<2xf32>
    %66 = vector.shape_cast %65 : vector<2xf32> to vector<2x1xf32>
    %cst_29 = arith.constant 9.99999996E-13 : f32
    %67 = vector.broadcast %cst_29 : f32 to vector<2x1xf32>
    %68 = arith.addf %66, %67 : vector<2x1xf32>
    %69 = math.rsqrt %68 : vector<2x1xf32>
    %70 = vector.broadcast %69 : vector<2x1xf32> to vector<2x16xf32>
    %71 = arith.mulf %55, %70 : vector<2x16xf32>
    %cst_30 = arith.constant 0.699999988 : f32
    %72 = vector.broadcast %cst_30 : f32 to vector<2x16xf32>
    %73 = arith.mulf %63, %72 : vector<2x16xf32>
    %cst_31 = arith.constant 3.000000e-01 : f32
    %74 = vector.broadcast %cst_31 : f32 to vector<2x16xf32>
    %75 = arith.mulf %71, %74 : vector<2x16xf32>
    %76 = arith.addf %73, %75 : vector<2x16xf32>
    %77 = arith.truncf %76 : vector<2x16xf32> to vector<2x16xbf16>
    %c0_32 = arith.constant 0 : index
    %c0_33 = arith.constant 0 : index
    %78 = vector.load %arg9[%c0_32, %c0_33] : memref<16x64xbf16, #tpu.memory_space<vmem>>, vector<16x64xbf16>
    %cst_34 = arith.constant dense<0.000000e+00> : vector<2x64xf32>
    %79 = tpu.matmul %77, %78, %cst_34 {dimension_numbers = #tpu.dot_dimension_numbers<[1], [0], [0], [1], [0, 0, 1, 1], [], []>} : vector<2x16xbf16>, vector<16x64xbf16>, vector<2x64xf32> -> vector<2x64xf32>
    %c0_35 = arith.constant 0 : index
    %c0_36 = arith.constant 0 : index
    %80 = vector.load %arg10[%c0_35, %c0_36] : memref<1x64xf32, #tpu.memory_space<vmem>>, vector<1x64xf32>
    %81 = vector.broadcast %80 : vector<1x64xf32> to vector<2x64xf32>
    %82 = arith.addf %79, %81 : vector<2x64xf32>
    %cst_37 = arith.constant 0.000000e+00 : f32
    %83 = vector.broadcast %cst_37 : f32 to vector<2x64xf32>
    %84 = arith.maximumf %82, %83 : vector<2x64xf32>
    %85 = arith.truncf %84 : vector<2x64xf32> to vector<2x64xbf16>
    %c0_38 = arith.constant 0 : index
    %c0_39 = arith.constant 0 : index
    %86 = vector.load %arg11[%c0_38, %c0_39] : memref<64x5xbf16, #tpu.memory_space<vmem>>, vector<64x5xbf16>
    %cst_40 = arith.constant dense<0.000000e+00> : vector<2x5xf32>
    %87 = tpu.matmul %85, %86, %cst_40 {dimension_numbers = #tpu.dot_dimension_numbers<[1], [0], [0], [1], [0, 0, 1, 1], [], []>} : vector<2x64xbf16>, vector<64x5xbf16>, vector<2x5xf32> -> vector<2x5xf32>
    %c0_41 = arith.constant 0 : index
    %c0_42 = arith.constant 0 : index
    %88 = vector.load %arg12[%c0_41, %c0_42] : memref<1x5xf32, #tpu.memory_space<vmem>>, vector<1x5xf32>
    %89 = vector.broadcast %88 : vector<1x5xf32> to vector<2x5xf32>
    %90 = arith.addf %87, %89 : vector<2x5xf32>
    %c0_43 = arith.constant 0 : index
    %c0_44 = arith.constant 0 : index
    %91 = vector.load %arg13[%c0_43, %c0_44] : memref<2x5xf32, #tpu.memory_space<vmem>>, vector<2x5xf32>
    tpu.vector_store %arg13[%c0_43, %c0_44], %90 {strides = array<i32>} : memref<2x5xf32, #tpu.memory_space<vmem>>, vector<2x5xf32>,
    return
  }
  func.func @transform_0(%arg0: i32) -> (i32, i32) {
    %c0_i32 = arith.constant 0 : i32
    %c0_i32_0 = arith.constant 0 : i32
    %c0_i32_1 = arith.constant 0 : i32
    return %c0_i32, %c0_i32_0 : i32, i32
  }
  func.func @transform_1(%arg0: i32) -> (i32, i32) {
    %c0_i32 = arith.constant 0 : i32
    %c0_i32_0 = arith.constant 0 : i32
    %c0_i32_1 = arith.constant 0 : i32
    return %c0_i32, %c0_i32_0 : i32, i32
  }
  func.func @transform_2(%arg0: i32) -> (i32, i32) {
    %c0_i32 = arith.constant 0 : i32
    %c0_i32_0 = arith.constant 0 : i32
    %c0_i32_1 = arith.constant 0 : i32
    return %c0_i32, %c0_i32_0 : i32, i32
  }
  func.func @transform_3(%arg0: i32) -> (i32, i32) {
    %c0_i32 = arith.constant 0 : i32
    %c0_i32_0 = arith.constant 0 : i32
    %c0_i32_1 = arith.constant 0 : i32
    return %c0_i32, %c0_i32_0 : i32, i32
  }
  func.func @transform_4(%arg0: i32) -> (i32, i32) {
    %c0_i32 = arith.constant 0 : i32
    %c0_i32_0 = arith.constant 0 : i32
    %c0_i32_1 = arith.constant 0 : i32
    return %c0_i32, %c0_i32_0 : i32, i32
  }
  func.func @transform_5(%arg0: i32) -> (i32, i32) {
    %c0_i32 = arith.constant 0 : i32
    %c0_i32_0 = arith.constant 0 : i32
    %c0_i32_1 = arith.constant 0 : i32
    return %c0_i32, %c0_i32_0 : i32, i32
  }
  func.func @transform_6(%arg0: i32) -> (i32, i32) {
    %c0_i32 = arith.constant 0 : i32
    %c0_i32_0 = arith.constant 0 : i32
    %c0_i32_1 = arith.constant 0 : i32
    return %c0_i32, %c0_i32_0 : i32, i32
  }
  func.func @transform_7(%arg0: i32) -> (i32, i32) {
    %c0_i32 = arith.constant 0 : i32
    %c0_i32_0 = arith.constant 0 : i32
    %c0_i32_1 = arith.constant 0 : i32
    return %c0_i32, %c0_i32_0 : i32, i32
  }
  func.func @transform_8(%arg0: i32) -> (i32, i32) {
    %c0_i32 = arith.constant 0 : i32
    %c0_i32_0 = arith.constant 0 : i32
    %c0_i32_1 = arith.constant 0 : i32
    return %c0_i32, %c0_i32_0 : i32, i32
  }
  func.func @transform_9(%arg0: i32) -> (i32, i32) {
    %c0_i32 = arith.constant 0 : i32
    %c0_i32_0 = arith.constant 0 : i32
    %c0_i32_1 = arith.constant 0 : i32
    return %c0_i32, %c0_i32_0 : i32, i32
  }
  func.func @transform_10(%arg0: i32) -> (i32, i32) {
    %c0_i32 = arith.constant 0 : i32
    %c0_i32_0 = arith.constant 0 : i32
    %c0_i32_1 = arith.constant 0 : i32
    return %c0_i32, %c0_i32_0 : i32, i32
  }
  func.func @transform_11(%arg0: i32) -> (i32, i32) {
    %c0_i32 = arith.constant 0 : i32
    %c0_i32_0 = arith.constant 0 : i32
    %c0_i32_1 = arith.constant 0 : i32
    return %c0_i32, %c0_i32_0 : i32, i32
  }
  func.func @transform_12(%arg0: i32) -> (i32, i32) {
    %c0_i32 = arith.constant 0 : i32
    %c0_i32_0 = arith.constant 0 : i32
    %c0_i32_1 = arith.constant 0 : i32
    return %c0_i32, %c0_i32_0 : i32, i32
  }
}

</mosaic_0001>

<bundles_post_ra>
// kernel: _lambda_.6
= control target key start
LH: loop header
LB: loop body
LE: loop exit
PB: predicated region body
PF: predicated region fallthrough
CT: control target
= control target key end

     0   :  { %s601_s21 = smov 0   ;;  %s688_s0 = inlined_call_operand.vmem [shape: f32[2,4,192], index: 0, kind: input, shape index: {}]   ;;  %s689_s1 = inlined_call_operand.vmem [shape: bf16[192,32], index: 1, kind: input, shape index: {}]   ;;  %s690_s2 = inlined_call_operand.vmem [shape: f32[1,32], index: 2, kind: input, shape index: {}]   ;;  %s691_s3 = inlined_call_operand.vmem [shape: f32[5,32], index: 3, kind: input, shape index: {}]   ;;  %s692_s4 = inlined_call_operand.vmem [shape: f32[1,32], index: 4, kind: input, shape index: {}]   ;;  %s693_s5 = inlined_call_operand.vmem [shape: f32[1,32], index: 5, kind: input, shape index: {}]   ;;  %s694_s6 = inlined_call_operand.vmem [shape: f32[2,5,32], index: 6, kind: output, shape index: {}]  }
   0x1 LB: > { %s505_s22 = sadd.s32 4294967295, %s563_s21   ;;  %p509_p0 = scmp.ge.s32.totalorder %s563_s21, 1  ;;  %s563_s21 = sphi %s601_s21, %s16_s21  }
   0x2   : > { %p212_p1 = scmp.lt.s32.totalorder %s563_s21, 3 }
   0x4   : > { %p213_p2 = pnand %p509_p0, %p212_p1 }
   0x5   : > { %v540_v0 = vld [vmem:[%s689_s1] sm:$0xff] (!%p213_p2)   ;;  %v565_v1 = vmov (!%p213_p2), 0   ;;  %p241_p3 = scmp.lt.s32.totalorder (!%p213_p2), %s505_s22, 1  ;;  %v541_v2 = vld [vmem:[%s689_s1 + $0x8] sm:$0xff] (!%p213_p2)   ;;  %v542_v3 = vld [vmem:[%s689_s1 + $0x10] sm:$0xff] (!%p213_p2)   ;;  %vm284_vm0 = vcmask (!%p213_p2), 253952  }
   0x6   : > { %216 = sbr.rel (%p213_p2) target bundleno = 582 (0x246), region = 44  ;;  %381 = vmatprep.subr.bf16.mxu0 (!%p213_p2), %v565_v1  ;;  %v543_v4 = vld [vmem:[%s689_s1 + $0x18] sm:$0xff] (!%p213_p2)   ;;  %v281_v6 = vld [vmem:[%s690_s2] sm:$0x1] (!%p213_p2)  ;;  %vm377_vm1 = vcmask (!%p213_p2), 523264   ;;  %v545_v13 = vld [vmem:[%s689_s1 + $0x28] sm:$0xff] (!%p213_p2)  }
   0x7   : > { %382 = vmatpush1.bf16.msra.mxu0 (!%p213_p2), %v540_v0  ;;  %v282_v7 = vld [vmem:[%s691_s3] sm:$0x1] (!%p213_p2)  ;;  %v546_v14 = vld [vmem:[%s689_s1 + $0x30] sm:$0xff] (!%p213_p2)   ;;  %v547_v15 = vld [vmem:[%s689_s1 + $0x38] sm:$0xff] (!%p213_p2)   ;;  %vm421_vm2 = vcmask (!%p213_p2), 257024  }
   0x8   : > { %383 = vmatprep.subr.bf16.mxu0 (!%p213_p2), %v565_v1  ;;  %v283_v9 = vadd.f32 (!%p213_p2), %v282_v7, %v281_v6  ;;  %v544_v10 = vld [vmem:[%s689_s1 + $0x20] sm:$0xff] (!%p213_p2)   ;;  %v549_v17 = vld [vmem:[%s689_s1 + $0x48] sm:$0xff] (!%p213_p2)   ;;  %v550_v18 = vld [vmem:[%s689_s1 + $0x50] sm:$0xff] (!%p213_p2)  }
   0x9   : > { %v548_v16 = vld [vmem:[%s689_s1 + $0x40] sm:$0xff] (!%p213_p2)   ;;  %v551_v19 = vld [vmem:[%s689_s1 + $0x58] sm:$0xff] (!%p213_p2)  }
   0xa   : > { %v285_v12 = vsel (!%p213_p2), %vm284_vm0, %v283_v9, 0.0  ;;  %v304_v26 = vld [vmem:[%s691_s3 + $0x1] sm:$0xf] (!%p213_p2)  ;;  %v299_v37 = vld [vmem:[%s692_s4] sm:$0x1] (!%p213_p2) }
   0xb   : > { %384 = vmatpush1.bf16.msra.mxu0 (!%p213_p2), %v541_v2  ;;  %286 = vadd.xlane.f32.xlu0 (!%p213_p2), %v285_v12  ;;  %v301_v39 = vld [vmem:[%s693_s5] sm:$0x1] (!%p213_p2) }
   0xc   : > { %385 = vmatprep.subr.bf16.mxu0 (!%p213_p2), %v565_v1  ;;  %v526_v51 = vld [vmem:[%s692_s4] ss:$0 sm:$0xff] (!%p213_p2) }
   0xd   : > { %s696_s22 = smov (!%p241_p3, %s505_s22), 1  ;;  %v527_v53 = vld [vmem:[%s693_s5] ss:$0 sm:$0xff] }
   0xe   : > { %s530_s29 = sshll.u32 %s696_s22, 3 }
   0xf   : > { %s245_s8 = scalar_lea.vmem %s688_s0, %s530_s29  ;;  %386 = vmatpush1.bf16.msra.mxu0 %v542_v3  ;;  %s249_s18 = scalar_lea.vmem %s694_s6, %s530_s29 }
  0x10   : > { %387 = vmatprep.subr.bf16.mxu0 %v565_v1  ;;  %v251_v5 = vld [vmem:[%s245_s8] sm:$0xff] }
  0x11   : > { %v253_v8 = vcombine.high %v251_v5, %v251_v5  ;;  %v255_v20 = vpack.c.bf16 %v251_v5, %v251_v5 }
  0x13   : > { %388 = vmatpush1.bf16.msra.mxu0 %v543_v4  ;;  %v256_v11 = vpack.c.bf16 %v253_v8, %v253_v8 }
  0x14   : > { %389 = vmatprep.subr.bf16.mxu0 %v565_v1 }
  0x15   : > { %525 = vmatprep.mubr.msk.bf16.mxu0 %vm377_vm1, %v256_v11 }
  0x17   : > { %390 = vmatpush1.bf16.msra.mxu0 %v544_v10 }
  0x18   : > { %391 = vmatprep.subr.bf16.mxu0 %v565_v1 }
  0x1b   : > { %392 = vmatpush1.bf16.msra.mxu0 %v545_v13 }
  0x1c   : > { %393 = vmatprep.subr.bf16.mxu0 %v565_v1 }
  0x1f   : > { %394 = vmatpush1.bf16.msra.mxu0 %v546_v14 }
  0x20   : > { %395 = vmatprep.subr.bf16.mxu0 %v565_v1 }
  0x23   : > { %396 = vmatpush1.bf16.msra.mxu0 %v547_v15 }
  0x24   : > { %397 = vmatprep.subr.bf16.mxu0 %v565_v1 }
  0x27   : > { %398 = vmatpush1.bf16.msra.mxu0 %v548_v16 }
  0x28   : > { %399 = vmatprep.subr.bf16.mxu0 %v565_v1 }
  0x2b   : > { %400 = vmatpush1.bf16.msra.mxu0 %v549_v17 }
  0x2c   : > { %401 = vmatprep.subr.bf16.mxu0 %v565_v1 }
  0x2f   : > { %402 = vmatpush1.bf16.msra.mxu0 %v550_v18 }
  0x30   : > { %403 = vmatprep.subr.bf16.mxu0 %v565_v1 }
  0x33   : > { %404 = vmatpush1.bf16.msra.mxu0 %v551_v19 }
  0x36   : > { %414 = vmatmul.mubr.bf16.vlgmr.msra.gmra.mrb[0].mxu0 %v255_v20 }
  0x98   : > { %v287_v21 = vpop.xlane.xlu0 %286 }
  0x99   : > { %v289_v22 = vmul.f32 0.03125, %v287_v21 }
  0x9b   : > { %v290_v23 = vsub.f32 %v283_v9, %v289_v22 }
  0x9d   : > { %v291_v24 = vmul.f32 %v290_v23, %v290_v23 }
  0x9f   : > { %v292_v25 = vsel %vm284_vm0, %v291_v24, 0.0 }
  0xa0   : > { %293 = vadd.xlane.f32.xlu1 %v292_v25 }
 0x109   : > { %v415_v27 = vpop.f32.mrb[0].mxu0 }
 0x10a   : > { %v416_v28 = vadd.f32 %v415_v27, %v304_v26  ;;  %v417_v29 = vpop.f32.mrb[1].mxu0 }
 0x10b   : > { %v418_v30 = vpop.f32.mrb[2].mxu0 }
 0x10c   : > { %v419_v31 = vpop.f32.mrb[3].mxu0  ;;  %v422_v32 = vsel %vm421_vm2, %v416_v28, 0.0 }
 0x10d   : > { %423 = vadd.xlane.f32.xlu0 %v422_v32 }
 0x12d   : > { %v294_v33 = vpop.xlane.xlu1 %293 }
 0x12e   : > { %v295_v34 = vmul.f32 0.03125, %v294_v33 }
 0x130   : > { %v296_v35 = vadd.f32 1e-05, %v295_v34 }
 0x132   : > { %553 = vrsqrt.f32 %v296_v35 }
 0x13c   : > { %v554_v36 = vpop.eup %553 }
 0x13d   : > { %v298_v38 = vmul.f32 %v554_v36, %v290_v23 }
 0x13f   : > { %v300_v40 = vmul.f32 %v299_v37, %v298_v38 }
 0x141   : > { %v302_v41 = vadd.f32 %v301_v39, %v300_v40 }
 0x143   : > { %303 = vst.msk [vmem:[%s249_s18] sm:$0x1] %vm284_vm0, %v302_v41 }
 0x19a   : > { %v424_v42 = vpop.xlane.xlu0 %423 }
 0x19b   : > { %v425_v43 = vmul.f32 0.03125, %v424_v42 }
 0x19d   : > { %v426_v44 = vsub.f32 %v416_v28, %v425_v43 }
 0x19f   : > { %v427_v45 = vmul.f32 %v426_v44, %v426_v44 }
 0x1a1   : > { %v428_v46 = vsel %vm421_vm2, %v427_v45, 0.0 }
 0x1a2   : > { %429 = vadd.xlane.f32.xlu1 %v428_v46 }
 0x22f   : > { %v430_v47 = vpop.xlane.xlu1 %429 }
 0x230   : > { %v431_v48 = vmul.f32 0.03125, %v430_v47 }
 0x232   : > { %v432_v49 = vadd.f32 1e-05, %v431_v48 }
 0x234   : > { %555 = vrsqrt.f32 %v432_v49 }
 0x23e   : > { %v556_v50 = vpop.eup %555 }
 0x23f   : > { %v434_v52 = vmul.f32 %v556_v50, %v426_v44 }
 0x241   : > { %v442_v54 = vmul.f32 %v526_v51, %v434_v52 }
 0x243   : > { %v450_v55 = vadd.f32 %v527_v53, %v442_v54 }
 0x245   : > { %451 = vst.msk [vmem:[%s249_s18 + $0x1] sm:$0xf] %vm421_vm2, %v450_v55 }
 0x246 PF: > { %s16_s21 = sadd.s32 1, %s563_s21  }
 0x247   : > { %p13_p4 = scmp.ge.s32.totalorder %s16_s21, 4  }
 0x249   :  { %15 = sbr.rel (!%p13_p4) target bundleno = 1 (0x1), region = 74 }

// kernel: _lambda_.7
= control target key start
LH: loop header
LB: loop body
LE: loop exit
PB: predicated region body
PF: predicated region fallthrough
CT: control target
= control target key end

     0   :  { %s2023_s24 = smov 0   ;;  %s2261_s0 = inlined_call_operand.vmem [shape: f32[2,5,32], index: 0, kind: input, shape index: {}]   ;;  %s2262_s1 = inlined_call_operand.vmem [shape: f32[1,32], index: 1, kind: input, shape index: {}]   ;;  %s2263_s2 = inlined_call_operand.vmem [shape: f32[1,32], index: 2, kind: input, shape index: {}]   ;;  %s2264_s3 = inlined_call_operand.vmem [shape: bf16[32,32], index: 3, kind: input, shape index: {}]   ;;  %s2265_s4 = inlined_call_operand.vmem [shape: f32[1,32], index: 4, kind: input, shape index: {}]   ;;  %s2266_s5 = inlined_call_operand.vmem [shape: bf16[32,32], index: 5, kind: input, shape index: {}]   ;;  %s2267_s6 = inlined_call_operand.vmem [shape: f32[1,32], index: 6, kind: input, shape index: {}]   ;;  %s2268_s7 = inlined_call_operand.vmem [shape: bf16[32,32], index: 7, kind: input, shape index: {}]   ;;  %s2269_s8 = inlined_call_operand.vmem [shape: f32[1,32], index: 8, kind: input, shape index: {}]   ;;  %s2270_s9 = inlined_call_operand.vmem [shape: bf16[32,32], index: 9, kind: input, shape index: {}]   ;;  %s2271_s10 = inlined_call_operand.vmem [shape: f32[1,32], index: 10, kind: input, shape index: {}]   ;;  %s2272_s11 = inlined_call_operand.vmem [shape: f32[1,32], index: 11, kind: input, shape index: {}]   ;;  %s2273_s12 = inlined_call_operand.vmem [shape: f32[1,32], index: 12, kind: input, shape index: {}]   ;;  %s2274_s13 = inlined_call_operand.vmem [shape: bf16[32,64], index: 13, kind: input, shape index: {}]   ;;  %s2275_s14 = inlined_call_operand.vmem [shape: f32[1,64], index: 14, kind: input, shape index: {}]   ;;  %s2276_s15 = inlined_call_operand.vmem [shape: bf16[64,32], index: 15, kind: input, shape index: {}]   ;;  %s2277_s16 = inlined_call_operand.vmem [shape: f32[1,32], index: 16, kind: input, shape index: {}]   ;;  %s2278_s17 = inlined_call_operand.vmem [shape: f32[2,5,32], index: 17, kind: output, shape index: {}]  }
   0x1   :  { %2279 = sst [smem:[#allocation2_spill]] %s2261_s0 }
   0x2   :  { %2280 = sst [smem:[#allocation3_spill]] %s2262_s1 }
   0x3 LB: > { %s1664_s25 = sadd.s32 4294967295, %s1925_s24   ;;  %p1668_p0 = scmp.ge.s32.totalorder %s1925_s24, 1  ;;  %s1925_s24 = sphi %s2023_s24, %s27_s24  }
   0x4   : > { %p486_p1 = scmp.lt.s32.totalorder %s1925_s24, 3 }
   0x6   : > { %p487_p2 = pnand %p1668_p0, %p486_p1 }
   0x7   : > { %p536_p3 = scmp.lt.s32.totalorder (!%p487_p2), %s1664_s25, 1  ;;  %vm546_vm0 = vcmask (!%p487_p2), 258048   ;;  %s2281_s29 = sld [smem:[#allocation2_spill]] (!%p487_p2)  ;;  %v1883_v7 = vld [vmem:[%s2264_s3] sm:$0xff] (!%p487_p2)   ;;  %v1927_v9 = vmov (!%p487_p2), 0.0   ;;  %v1885_v10 = vld [vmem:[%s2264_s3 + $0x8] sm:$0xff] (!%p487_p2)  }
   0x8   : > { %490 = sbr.rel (%p487_p2) target bundleno = 3705 (0xe79), region = 88  ;;  %v1884_v8 = vld [vmem:[%s2268_s7] sm:$0xff] (!%p487_p2)   ;;  %1753 = vmatprep.subr.bf16.mxu1 (!%p487_p2), %v1927_v9  ;;  %1769 = vmatprep.subr.bf16.mxu0 (!%p487_p2), %v1927_v9  ;;  %v1886_v11 = vld [vmem:[%s2268_s7 + $0x8] sm:$0xff] (!%p487_p2)   ;;  %vm1928_vm1 = vmmov (!%p487_p2), 0   ;;  %vm601_vm2 = vcmask (!%p487_p2), 261120   ;;  %vm843_vm3 = vcmask (!%p487_p2), 1041408  }
   0x9   : > { %1754 = vmatpush3.bf16.msra.mxu1 (!%p487_p2), %v1883_v7  ;;  %1770 = vmatpush3.bf16.msra.mxu0 (!%p487_p2), %v1884_v8  ;;  %v1672_v18 = vld [vmem:[%s2263_s2] ss:$0 sm:$0xff] (!%p487_p2)  ;;  %v1888_v23 = vld [vmem:[%s2266_s5 + $0x8] sm:$0xff] (!%p487_p2)   ;;  %vm844_vm4 = vcmask (!%p487_p2), 1042432   ;;  %v1929_v25 = vmov (!%p487_p2), 65535   ;;  %vm779_vm5 = vcmask (!%p487_p2), 64512  }
   0xa   : > { %1755 = vmatprep.subr.bf16.mxu1 (!%p487_p2), %v1927_v9  ;;  %1771 = vmatprep.subr.bf16.mxu0 (!%p487_p2), %v1927_v9  ;;  %v1887_v21 = vld [vmem:[%s2266_s5] sm:$0xff] (!%p487_p2)   ;;  %v845_v26 = vsel (!%p487_p2), %vm843_vm3, 4294967295, %v1929_v25  ;;  %vm826_vm6 = vcmask (!%p487_p2), 36864   ;;  %s1931_s30 = smov (!%p487_p2), 112   ;;  %vm839_vm7 = vcmask (!%p487_p2), 39936   ;;  %vm1008_vm8 = vcmask (!%p487_p2), 1043456  }
   0xb   : > { %1757 = vmatprep.mubr.msk.bf16.mxu1 (!%p487_p2), %vm1928_vm1, %v1927_v9  ;;  %1773 = vmatprep.mubr.msk.bf16.mxu0 (!%p487_p2), %vm1928_vm1, %v1927_v9  ;;  %v1681_v24 = vld [vmem:[%s2269_s8] ss:$0 sm:$0xff] (!%p487_p2)  ;;  %v2093_v34 = vsel (!%p487_p2), %vm844_vm4, %v845_v26, 0  ;;  %s1932_s21 = smov (!%p487_p2), 104   ;;  %vm1565_vm9 = vcmask (!%p487_p2), 523264  }
   0xc   : > { %v1673_v38 = vld [vmem:[%s2265_s4] ss:$0 sm:$0xff] (!%p487_p2) }
   0xd   : > { %1756 = vmatpush3.bf16.msra.mxu1 (!%p487_p2), %v1885_v10  ;;  %1772 = vmatpush3.bf16.msra.mxu0 (!%p487_p2), %v1886_v11  ;;  %v1677_v40 = vld [vmem:[%s2267_s6] ss:$0 sm:$0xff] (!%p487_p2) }
   0xe   : > { %1761 = vmatprep.subr.bf16.mxu1 (!%p487_p2), %v1927_v9  ;;  %1783 = vmatprep.subr.bf16.mxu0 (!%p487_p2), %v1927_v9 }
   0xf   : > { %s2284_s25 = smov (!%p536_p3, %s1664_s25), 1 }
  0x10   : > { %s1669_s26 = sshll.u32 %s2284_s25, 3 }
  0x11   : > { %s539_s0 = scalar_lea.vmem %s2281_s29, %s1669_s26  ;;  %s2282_s29 = sld [smem:[#allocation3_spill]] }
  0x12   : > { %v2039_v0 = vld [vmem:[%s539_s0] sm:$0x1f]  ;;  %s1930_s0 = smov 120  }
  0x13   : > { %v547_v1 = vsel %vm546_vm0, %v2039_v0, 0.0 }
  0x14   : > { %548 = vadd.xlane.f32.xlu0 %v547_v1 }
  0x17   : > { %v1671_v16 = vld [vmem:[%s2282_s29] ss:$0 sm:$0xff]  ;;  %s543_s29 = scalar_lea.vmem %s2278_s17, %s1669_s26 }
  0xa1   : > { %v549_v2 = vpop.xlane.xlu0 %548 }
  0xa2   : > { %v551_v3 = vmul.f32 0.03125, %v549_v2 }
  0xa4   : > { %v552_v4 = vsub.f32 %v2039_v0, %v551_v3 }
  0xa6   : > { %v553_v5 = vmul.f32 %v552_v4, %v552_v4 }
  0xa8   : > { %v554_v6 = vsel %vm546_vm0, %v553_v5, 0.0 }
  0xa9   : > { %555 = vadd.xlane.f32.xlu0 %v554_v6 }
 0x136   : > { %v556_v12 = vpop.xlane.xlu0 %555 }
 0x137   : > { %v557_v13 = vmul.f32 0.03125, %v556_v12 }
 0x139   : > { %v558_v14 = vadd.f32 1e-05, %v557_v13 }
 0x13b   : > { %1895 = vrsqrt.f32 %v558_v14 }
 0x145   : > { %v1896_v15 = vpop.eup %1895 }
 0x146   : > { %v560_v17 = vmul.f32 %v1896_v15, %v552_v4 }
 0x148   : > { %v568_v19 = vmul.f32 %v1671_v16, %v560_v17  ;;  %v776_v16 = vld [vmem:[%s2270_s9 + $0x4] sm:$0xf] }
 0x149   : > { %v1010_v17 = vsel %vm1008_vm8, %v776_v16, 0 }
 0x14a   : > { %v576_v20 = vadd.f32 %v1672_v18, %v568_v19 }
 0x14c   : > { %v577_v22 = vpack.c.bf16 %v576_v20, %v576_v20 }
 0x14e   : > { %1758 = vmatmul.mubr.msk.bf16.vlgmr.msra.gmra.mrb[0].mxu1 %vm601_vm2, %v577_v22  ;;  %1774 = vmatmul.mubr.msk.bf16.vlgmr.msra.gmra.mrb[0].mxu0 %vm601_vm2, %v577_v22 }
 0x14f   : > { %1762 = vmatpush3.bf16.msra.mxu1 %v1887_v21  ;;  %1765 = vmatprep.mubr.msk.bf16.mxu1 %vm1928_vm1, %v1927_v9 }
 0x150   : > { %1763 = vmatprep.subr.bf16.mxu1 %v1927_v9  ;;  %1785 = vmatprep.mubr.msk.bf16.mxu0 %vm1928_vm1, %v1927_v9 }
 0x153   : > { %1764 = vmatpush3.bf16.msra.mxu1 %v1888_v23 }
 0x154   : > { %1777 = vmatprep.subr.bf16.mxu1 %v1927_v9 }
 0x156   : > { %1766 = vmatmul.mubr.msk.bf16.vlgmr.msra.gmra.mrb[4].mxu1 %vm601_vm2, %v577_v22  ;;  %v775_v22 = vld [vmem:[%s2270_s9] sm:$0xf] }
 0x157   : > { %1779 = vmatprep.mubr.msk.bf16.mxu1 %vm1928_vm1, %v1927_v9  ;;  %v1056_v25 = vsel %vm1008_vm8, %v775_v22, 0 }
 0x221   : > { %v639_v27 = vpop.f32.mrb[0].mxu1  ;;  %v765_v28 = vpop.f32.mrb[0].mxu0 }
 0x222   : > { %v766_v29 = vadd.f32 %v1681_v24, %v765_v28  ;;  %v1759_v30 = vpop.f32.mrb[1].mxu1  ;;  %v1775_v31 = vpop.f32.mrb[1].mxu0  ;;  %v640_v41 = vadd.f32 %v1673_v38, %v639_v27 }
 0x223   : > { %v642_v32 = vpop.f32.mrb[2].mxu1  ;;  %v768_v33 = vpop.f32.mrb[2].mxu0 }
 0x224   : > { %v2095_v35 = vpack.c.bf16 %v766_v29, %v766_v29  ;;  %v1760_v36 = vpop.f32.mrb[3].mxu1  ;;  %v1776_v37 = vpop.f32.mrb[3].mxu0  ;;  %v771_v46 = vmul.f32 0.35355338, %v640_v41 }
 0x226   : > { %v848_v39 = vand.u32 %v2093_v34, %v2095_v35  ;;  %v2112_v50 = vpack.c.bf16 %v771_v46, %v771_v46 }
 0x228   : > { %1784 = vmatpush3.bf16.msra.mxu0 %v848_v39 }
 0x229   : > { %v702_v42 = vpop.f32.mrb[4].mxu1  ;;  %1795 = vmatprep.subr.bf16.mxu0 %v1927_v9 }
 0x22a   : > { %v703_v43 = vadd.f32 %v1677_v40, %v702_v42  ;;  %v1767_v44 = vpop.f32.mrb[5].mxu1 }
 0x22b   : > { %v705_v45 = vpop.f32.mrb[6].mxu1 }
 0x22c   : > { %v2106_v47 = vpack.c.bf16 %v703_v43, %v703_v43  ;;  %v1768_v48 = vpop.f32.mrb[7].mxu1 }
 0x22e   : > { %895 = vrot.lane.b32.xlu1 %v2106_v47, %s1930_s0  ;;  %v784_v49 = vsel %vm779_vm5, %v2106_v47, 0 }
 0x22f   : > { %1778 = vmatpush3.bf16.xpose.msra.mxu1 %v784_v49 }
 0x230   : > { %1789 = vmatprep.subr.bf16.mxu1 %v1927_v9 }
 0x232   : > { %892 = vrot.lane.b32.xlu1 %v2112_v50, %s1930_s0 }
 0x236   : > { %1780 = vmatmul.mubr.msk.bf16.vlgmr.msra.gmra.mrb[8].mxu1 %vm779_vm5, %v2112_v50 }
 0x237   : > { %1791 = vmatprep.mubr.msk.bf16.mxu1 %vm1928_vm1, %v1927_v9 }
 0x2a0   : > { %v896_v51 = vpop.permute.xlu1 %895 }
 0x2a1   : > { %v901_v52 = vsel %vm779_vm5, %v896_v51, 0 }
 0x2a2   : > { %1790 = vmatpush3.bf16.xpose.msra.mxu1 %v901_v52 }
 0x2a3   : > { %1801 = vmatprep.subr.bf16.mxu1 %v1927_v9 }
 0x2a4   : > { %v893_v53 = vpop.permute.xlu1 %892 }
 0x2a9   : > { %1792 = vmatmul.mubr.msk.bf16.vlgmr.msra.gmra.mrb[12].mxu1 %vm779_vm5, %v893_v53 }
 0x2aa   : > { %1803 = vmatprep.mubr.msk.bf16.mxu1 %vm1928_vm1, %v1927_v9  ;;  %1802 = vmatpush3.bf16.msra.mxu1 %v1010_v17 }
 0x2ab   : > { %1813 = vmatprep.subr.bf16.mxu1 %v1927_v9 }
 0x309   : > { %v820_v54 = vpop.f32.mrb[8].mxu1 }
 0x30a   : > { %v1781_v55 = vpop.f32.mrb[9].mxu1  ;;  %v827_v56 = vsel %vm826_vm6, %v820_v54, -inf }
 0x30b   : > { %828 = vmax.xlane.f32.xlu0 %v827_v56  ;;  %v823_v57 = vpop.f32.mrb[10].mxu1 }
 0x30c   : > { %v1782_v58 = vpop.f32.mrb[11].mxu1 }
 0x37c   : > { %v937_v59 = vpop.f32.mrb[12].mxu1 }
 0x37d   : > { %v1793_v60 = vpop.f32.mrb[13].mxu1  ;;  %v943_v61 = vsel %vm826_vm6, %v937_v59, -inf }
 0x37e   : > { %944 = vmax.xlane.f32.xlu1 %v943_v61  ;;  %v940_v62 = vpop.f32.mrb[14].mxu1 }
 0x37f   : > { %v1794_v63 = vpop.f32.mrb[15].mxu1 }
 0x38f   : > { %1098 = vrot.lane.b32.xlu1 %v2112_v50, %s1931_s30 }
 0x398   : > { %v829_v1 = vpop.xlane.xlu0 %828 }
 0x399   : > { %v830_v2 = vsub.f32 %v820_v54, %v829_v1 }
 0x39b   : > { %v831_v3 = vmul.f32 1.442695, %v830_v2 }
 0x39d   : > { %1897 = vpow2.f32 %v831_v3 }
 0x3a7   : > { %v1898_v4 = vpop.eup %1897 }
 0x3a8   : > { %v833_v5 = vsel %vm826_vm6, %v1898_v4, 0.0 }
 0x3a9   : > { %834 = vadd.xlane.f32.xlu0 %v833_v5 }
 0x40b   : > { %v945_v6 = vpop.xlane.xlu1 %944 }
 0x40c   : > { %v946_v7 = vsub.f32 %v937_v59, %v945_v6 }
 0x40e   : > { %v947_v8 = vmul.f32 1.442695, %v946_v7 }
 0x40f   : > { %v1099_v40 = vpop.permute.xlu1 %1098 }
 0x410   : > { %1899 = vpow2.f32 %v947_v8 }
 0x41a   : > { %v1900_v10 = vpop.eup %1899 }
 0x41b   : > { %v949_v11 = vsel %vm826_vm6, %v1900_v10, 0.0 }
 0x41c   : > { %950 = vadd.xlane.f32.xlu0 %v949_v11 }
 0x432   : > { %956 = vrot.lane.b32.xlu0 %v2095_v35, %s1930_s0 }
 0x436   : > { %v835_v12 = vpop.xlane.xlu0 %834  ;;  %1100 = vrot.lane.b32.xlu0 %v2106_v47, %s1931_s30 }
 0x437   : > { %1901 = vrcp.f32 %v835_v12 }
 0x441   : > { %v1902_v13 = vpop.eup %1901 }
 0x442   : > { %v837_v14 = vmul.f32 %v1902_v13, %v1898_v4 }
 0x444   : > { %v838_v15 = vpack.c.bf16 %v837_v14, %v837_v14 }
 0x446   : > { %1786 = vmatmul.mubr.msk.bf16.vlgmr.msra.gmra.mrb[4].mxu0 %vm839_vm7, %v838_v15 }
 0x447   : > { %1797 = vmatprep.mubr.msk.bf16.mxu0 %vm1928_vm1, %v1927_v9 }
 0x4a9   : > { %v951_v18 = vpop.xlane.xlu0 %950 }
 0x4aa   : > { %1903 = vrcp.f32 %v951_v18 }
 0x4ad   : > { %v957_v19 = vpop.permute.xlu0 %956 }
 0x4ae   : > { %v962_v20 = vand.u32 %v957_v19, %v2093_v34 }
 0x4b0   : > { %1796 = vmatpush3.bf16.msra.mxu0 %v962_v20 }
 0x4b1   : > { %1807 = vmatprep.subr.bf16.mxu0 %v1927_v9  ;;  %v1101_v31 = vpop.permute.xlu0 %1100 }
 0x4b2   : > { %v1106_v38 = vsel %vm779_vm5, %v1101_v31, 0 }
 0x4b4   : > { %v1904_v21 = vpop.eup %1903 }
 0x4b5   : > { %v953_v23 = vmul.f32 %v1904_v21, %v1900_v10 }
 0x4b7   : > { %v954_v24 = vpack.c.bf16 %v953_v23, %v953_v23 }
 0x4b9   : > { %1798 = vmatmul.mubr.msk.bf16.vlgmr.msra.gmra.mrb[8].mxu0 %vm839_vm7, %v954_v24 }
 0x4ba   : > { %1808 = vmatpush3.bf16.msra.mxu0 %v1056_v25  ;;  %1809 = vmatprep.mubr.msk.bf16.mxu0 %vm1928_vm1, %v1927_v9 }
 0x4bb   : > { %1819 = vmatprep.subr.bf16.mxu0 %v1927_v9 }
 0x519   : > { %v884_v26 = vpop.f32.mrb[4].mxu0 }
 0x51a   : > { %v890_v27 = vpack.c.bf16 %v884_v26, %v884_v26  ;;  %v1787_v28 = vpop.f32.mrb[5].mxu0  ;;  %v778_v26 = vld [vmem:[%s2270_s9 + $0xc] sm:$0xf] }
 0x51b   : > { %v887_v29 = vpop.f32.mrb[6].mxu0 }
 0x51c   : > { %v1788_v30 = vpop.f32.mrb[7].mxu0  ;;  %1810 = vmatmul.mubr.msk.bf16.vlgmr.msra.gmra.mrb[12].mxu0 %vm779_vm5, %v890_v27 }
 0x51d   : > { %1821 = vmatprep.mubr.msk.bf16.mxu0 %vm1928_vm1, %v1927_v9 }
 0x58c   : > { %v998_v32 = vpop.f32.mrb[8].mxu0 }
 0x58d   : > { %v1004_v33 = vpack.c.bf16 %v998_v32, %v998_v32  ;;  %v1799_v36 = vpop.f32.mrb[9].mxu0 }
 0x58e   : > { %v1001_v37 = vpop.f32.mrb[10].mxu0 }
 0x58f   : > { %v1800_v39 = vpop.f32.mrb[11].mxu0  ;;  %1804 = vmatmul.mubr.msk.bf16.vlgmr.msra.gmra.mrb[16].mxu1 %vm779_vm5, %v1004_v33 }
 0x590   : > { %1814 = vmatpush3.bf16.xpose.msra.mxu1 %v1106_v38  ;;  %1815 = vmatprep.mubr.msk.bf16.mxu1 %vm1928_vm1, %v1927_v9 }
 0x591   : > { %1825 = vmatprep.subr.bf16.mxu1 %v1927_v9 }
 0x597   : > { %1816 = vmatmul.mubr.msk.bf16.vlgmr.msra.gmra.mrb[20].mxu1 %vm779_vm5, %v1099_v40 }
 0x598   : > { %1827 = vmatprep.mubr.msk.bf16.mxu1 %vm1928_vm1, %v1927_v9 }
 0x5ef   : > { %v1092_v41 = vpop.f32.mrb[12].mxu0 }
 0x5f0   : > { %v1811_v42 = vpop.f32.mrb[13].mxu0 }
 0x5f1   : > { %v1095_v43 = vpop.f32.mrb[14].mxu0 }
 0x5f2   : > { %v1812_v44 = vpop.f32.mrb[15].mxu0 }
 0x662   : > { %v1046_v45 = vpop.f32.mrb[16].mxu1 }
 0x663   : > { %v2165_v46 = vadd.f32 %v1092_v41, %v1046_v45  ;;  %v1805_v48 = vpop.f32.mrb[17].mxu1  ;;  %v1697_v45 = vld [vmem:[%s2271_s10] ss:$0 sm:$0xff] }
 0x664   : > { %v1049_v49 = vpop.f32.mrb[18].mxu1 }
 0x665   : > { %v1806_v51 = vpop.f32.mrb[19].mxu1 }
 0x66a   : > { %v1142_v52 = vpop.f32.mrb[20].mxu1 }
 0x66b   : > { %v1817_v53 = vpop.f32.mrb[21].mxu1  ;;  %v1148_v54 = vsel %vm826_vm6, %v1142_v52, -inf }
 0x66c   : > { %1149 = vmax.xlane.f32.xlu0 %v1148_v54  ;;  %v1145_v55 = vpop.f32.mrb[22].mxu1 }
 0x66d   : > { %v1818_v56 = vpop.f32.mrb[23].mxu1 }
 0x682   : > { %1160 = vrot.lane.b32.xlu0 %v2095_v35, %s1931_s30 }
 0x686   : > { %1256 = vrot.lane.b32.xlu0 %v2112_v50, %s1932_s21 }
 0x6f9   : > { %v1150_v57 = vpop.xlane.xlu0 %1149 }
 0x6fa   : > { %v1151_v58 = vsub.f32 %v1142_v52, %v1150_v57 }
 0x6fc   : > { %v1152_v59 = vmul.f32 1.442695, %v1151_v58  ;;  %v1889_v58 = vld [vmem:[%s2274_s13] sm:$0xff]  }
 0x6fd   : > { %v1161_v60 = vpop.permute.xlu0 %1160 }
 0x6fe   : > { %1905 = vpow2.f32 %v1152_v59  ;;  %v1166_v61 = vand.u32 %v1161_v60, %v2093_v34 }
 0x700   : > { %1820 = vmatpush3.bf16.msra.mxu0 %v1166_v61 }
 0x701   : > { %1831 = vmatprep.subr.bf16.mxu0 %v1927_v9  ;;  %v1257_v6 = vpop.permute.xlu0 %1256 }
 0x708   : > { %v1906_v62 = vpop.eup %1905 }
 0x709   : > { %v1154_v63 = vsel %vm826_vm6, %v1906_v62, 0.0 }
 0x70a   : > { %1155 = vadd.xlane.f32.xlu1 %v1154_v63  ;;  %v1698_v63 = vld [vmem:[%s2272_s11] ss:$0 sm:$0xff] }
 0x71b   : > { %1258 = vrot.lane.b32.xlu1 %v2106_v47, %s1932_s21  ;;  %v777_v47 = vld [vmem:[%s2270_s9 + $0x8] sm:$0xf] }
 0x71c   : > { %v1213_v7 = vsel %vm1008_vm8, %v777_v47, 0  ;;  %v1893_v47 = vld [vmem:[%s2276_s15 + $0x10] sm:$0xff]  }
 0x71d   : > { %1826 = vmatpush3.bf16.msra.mxu1 %v1213_v7  ;;  %v1894_v7 = vld [vmem:[%s2276_s15 + $0x18] sm:$0xff]  }
 0x71e   : > { %1837 = vmatprep.subr.bf16.mxu1 %v1927_v9 }
 0x797   : > { %v1156_v1 = vpop.xlane.xlu1 %1155 }
 0x798   : > { %1907 = vrcp.f32 %v1156_v1 }
 0x79b   : > { %v1259_v3 = vpop.permute.xlu1 %1258 }
 0x79c   : > { %v1264_v5 = vsel %vm779_vm5, %v1259_v3, 0 }
 0x7a2   : > { %v1908_v50 = vpop.eup %1907 }
 0x7a3   : > { %v1158_v2 = vmul.f32 %v1908_v50, %v1906_v62  ;;  %v1699_v50 = vld [vmem:[%s2273_s12] ss:$0 sm:$0xff] }
 0x7a5   : > { %v1159_v4 = vpack.c.bf16 %v1158_v2, %v1158_v2 }
 0x7a7   : > { %1822 = vmatmul.mubr.msk.bf16.vlgmr.msra.gmra.mrb[16].mxu0 %vm839_vm7, %v1159_v4 }
 0x7a8   : > { %1832 = vmatpush3.bf16.xpose.msra.mxu0 %v1264_v5  ;;  %1833 = vmatprep.mubr.msk.bf16.mxu0 %vm1928_vm1, %v1927_v9  ;;  %v1891_v5 = vld [vmem:[%s2276_s15] sm:$0xff]  }
 0x7a9   : > { %1843 = vmatprep.subr.bf16.mxu0 %v1927_v9 }
 0x7af   : > { %1834 = vmatmul.mubr.msk.bf16.vlgmr.msra.gmra.mrb[20].mxu0 %vm779_vm5, %v1257_v6  ;;  %v1892_v6 = vld [vmem:[%s2276_s15 + $0x8] sm:$0xff]  }
 0x7b0   : > { %1845 = vmatprep.mubr.msk.bf16.mxu0 %vm1928_vm1, %v1927_v9 }
 0x87a   : > { %v1202_v8 = vpop.f32.mrb[16].mxu0 }
 0x87b   : > { %v1208_v10 = vpack.c.bf16 %v1202_v8, %v1202_v8  ;;  %v1823_v11 = vpop.f32.mrb[17].mxu0  ;;  %v1700_v8 = vld [vmem:[%s2275_s14] ss:$0 sm:$0xff] }
 0x87c   : > { %v1205_v12 = vpop.f32.mrb[18].mxu0 }
 0x87d   : > { %v1824_v13 = vpop.f32.mrb[19].mxu0  ;;  %1828 = vmatmul.mubr.msk.bf16.vlgmr.msra.gmra.mrb[24].mxu1 %vm779_vm5, %v1208_v10 }
 0x87e   : > { %1839 = vmatprep.mubr.msk.bf16.mxu1 %vm1928_vm1, %v1927_v9 }
 0x882   : > { %v1300_v14 = vpop.f32.mrb[20].mxu0 }
 0x883   : > { %v1835_v15 = vpop.f32.mrb[21].mxu0  ;;  %v1306_v16 = vsel %vm826_vm6, %v1300_v14, -inf }
 0x884   : > { %1307 = vmax.xlane.f32.xlu0 %v1306_v16  ;;  %v1303_v17 = vpop.f32.mrb[22].mxu0 }
 0x885   : > { %v1836_v18 = vpop.f32.mrb[23].mxu0 }
 0x89a   : > { %1318 = vrot.lane.b32.xlu0 %v2095_v35, %s1932_s21  ;;  %v1371_v35 = vsel %vm1008_vm8, %v778_v26, 0 }
 0x89b   : > { %1844 = vmatpush3.bf16.msra.mxu0 %v1371_v35 }
 0x89c   : > { %1857 = vmatprep.subr.bf16.mxu0 %v1927_v9 }
 0x911   : > { %v1308_v19 = vpop.xlane.xlu0 %1307 }
 0x912   : > { %v1309_v20 = vsub.f32 %v1300_v14, %v1308_v19 }
 0x914   : > { %v1310_v21 = vmul.f32 1.442695, %v1309_v20 }
 0x915   : > { %v1319_v22 = vpop.permute.xlu0 %1318 }
 0x916   : > { %1909 = vpow2.f32 %v1310_v21  ;;  %v1324_v23 = vand.u32 %v1319_v22, %v2093_v34  ;;  %v1704_v21 = vld [vmem:[%s2277_s16] ss:$0 sm:$0xff] }
 0x918   : > { %1838 = vmatpush3.bf16.msra.mxu1 %v1324_v23 }
 0x919   : > { %1849 = vmatprep.subr.bf16.mxu1 %v1927_v9 }
 0x920   : > { %v1910_v24 = vpop.eup %1909 }
 0x921   : > { %v1312_v25 = vsel %vm826_vm6, %v1910_v24, 0.0 }
 0x922   : > { %1313 = vadd.xlane.f32.xlu1 %v1312_v25 }
 0x950   : > { %v1249_v27 = vpop.f32.mrb[24].mxu1 }
 0x951   : > { %v1255_v28 = vadd.f32 %v1249_v27, %v2165_v46  ;;  %v1829_v34 = vpop.f32.mrb[25].mxu1 }
 0x952   : > { %v1252_v29 = vpop.f32.mrb[26].mxu1 }
 0x953   : > { %v1830_v30 = vpop.f32.mrb[27].mxu1 }
 0x9af   : > { %v1314_v31 = vpop.xlane.xlu1 %1313 }
 0x9b0   : > { %1911 = vrcp.f32 %v1314_v31 }
 0x9ba   : > { %v1912_v32 = vpop.eup %1911 }
 0x9bb   : > { %v1316_v33 = vmul.f32 %v1912_v32, %v1910_v24 }
 0x9bd   : > { %v1317_v36 = vpack.c.bf16 %v1316_v33, %v1316_v33 }
 0x9bf   : > { %1840 = vmatmul.mubr.msk.bf16.vlgmr.msra.gmra.mrb[28].mxu1 %vm839_vm7, %v1317_v36 }
 0x9c0   : > { %1853 = vmatprep.mubr.msk.bf16.mxu1 %vm1928_vm1, %v1927_v9  ;;  %1850 = vmatpush3.bf16.msra.mxu1 %v1889_v58 }
 0x9c1   : > { %1851 = vmatprep.subr.bf16.mxu1 %v1927_v9 }
 0xa92   : > { %v1360_v37 = vpop.f32.mrb[28].mxu1 }
 0xa93   : > { %v1366_v38 = vpack.c.bf16 %v1360_v37, %v1360_v37  ;;  %v1841_v39 = vpop.f32.mrb[29].mxu1 }
 0xa94   : > { %v1363_v40 = vpop.f32.mrb[30].mxu1 }
 0xa95   : > { %v1842_v41 = vpop.f32.mrb[31].mxu1  ;;  %1846 = vmatmul.mubr.msk.bf16.vlgmr.msra.gmra.mrb[24].mxu0 %vm779_vm5, %v1366_v38 }
 0xa96   : > { %1865 = vmatprep.mubr.msk.bf16.mxu0 %vm1928_vm1, %v1927_v9  ;;  %1858 = vmatpush3.bf16.msra.mxu0 %v1891_v5 }
 0xa97   : > { %1859 = vmatprep.subr.bf16.mxu0 %v1927_v9 }
 0xa9a   : > { %1860 = vmatpush3.bf16.msra.mxu0 %v1892_v6 }
 0xa9b   : > { %1861 = vmatprep.subr.bf16.mxu0 %v1927_v9 }
 0xa9e   : > { %1862 = vmatpush3.bf16.msra.mxu0 %v1893_v47 }
 0xa9f   : > { %1863 = vmatprep.subr.bf16.mxu0 %v1927_v9 }
 0xaa2   : > { %1864 = vmatpush3.bf16.msra.mxu0 %v1894_v7 }
 0xb68   : > { %v1407_v42 = vpop.f32.mrb[24].mxu0 }
 0xb69   : > { %v1413_v43 = vadd.f32 %v1407_v42, %v1255_v28  ;;  %v1847_v44 = vpop.f32.mrb[25].mxu0 }
 0xb6a   : > { %v1410_v46 = vpop.f32.mrb[26].mxu0 }
 0xb6b   : > { %v1414_v48 = vadd.f32 %v1413_v43, %v2039_v0  ;;  %v1848_v49 = vpop.f32.mrb[27].mxu0  ;;  %v1890_v0 = vld [vmem:[%s2274_s13 + $0x8] sm:$0xff]  }
 0xb6c   : > { %1852 = vmatpush3.bf16.msra.mxu1 %v1890_v0 }
 0xb6d   : > { %v1422_v51 = vadd.f32 %v1697_v45, %v1414_v48 }
 0xb6f   : > { %v1423_v52 = vsel %vm546_vm0, %v1422_v51, 0.0 }
 0xb70   : > { %1424 = vadd.xlane.f32.xlu1 %v1423_v52 }
 0xbfd   : > { %v1425_v53 = vpop.xlane.xlu1 %1424 }
 0xbfe   : > { %v1426_v54 = vmul.f32 0.03125, %v1425_v53 }
 0xc00   : > { %v1427_v55 = vsub.f32 %v1422_v51, %v1426_v54 }
 0xc02   : > { %v1428_v56 = vmul.f32 %v1427_v55, %v1427_v55 }
 0xc04   : > { %v1429_v57 = vsel %vm546_vm0, %v1428_v56, 0.0 }
 0xc05   : > { %1430 = vadd.xlane.f32.xlu1 %v1429_v57 }
 0xc92   : > { %v1431_v59 = vpop.xlane.xlu1 %1430 }
 0xc93   : > { %v1432_v60 = vmul.f32 0.03125, %v1431_v59 }
 0xc95   : > { %v1433_v61 = vadd.f32 1e-05, %v1432_v60 }
 0xc97   : > { %1913 = vrsqrt.f32 %v1433_v61 }
 0xca1   : > { %v1914_v62 = vpop.eup %1913 }
 0xca2   : > { %v1435_v1 = vmul.f32 %v1914_v62, %v1427_v55 }
 0xca4   : > { %v1443_v2 = vmul.f32 %v1698_v63, %v1435_v1 }
 0xca6   : > { %v1451_v3 = vadd.f32 %v1699_v50, %v1443_v2 }
 0xca8   : > { %v1452_v4 = vpack.c.bf16 %v1451_v3, %v1451_v3 }
 0xcaa   : > { %1854 = vmatmul.mubr.msk.bf16.vlgmr.msra.gmra.mrb[32].mxu1 %vm601_vm2, %v1452_v4 }
 0xd7d   : > { %v1513_v10 = vpop.f32.mrb[32].mxu1 }
 0xd7e   : > { %v1514_v11 = vadd.f32 %v1700_v8, %v1513_v10  ;;  %v1855_v12 = vpop.f32.mrb[33].mxu1 }
 0xd7f   : > { %v1516_v13 = vpop.f32.mrb[34].mxu1 }
 0xd80   : > { %v1519_v14 = vmul.f32 -1.702, %v1514_v11  ;;  %v1856_v15 = vpop.f32.mrb[35].mxu1 }
 0xd82   : > { %v1520_v16 = vmul.f32 1.442695, %v1519_v14 }
 0xd84   : > { %1915 = vpow2.f32 %v1520_v16 }
 0xd8e   : > { %v1916_v17 = vpop.eup %1915 }
 0xd8f   : > { %v1522_v9 = vadd.f32 1.0, %v1916_v17 }
 0xd91   : > { %1917 = vrcp.f32 %v1522_v9 }
 0xd9b   : > { %v1918_v18 = vpop.eup %1917 }
 0xd9c   : > { %v1524_v19 = vmul.f32 %v1918_v18, %v1514_v11 }
 0xd9e   : > { %v1525_v20 = vpack.c.bf16 %v1524_v19, %v1524_v19 }
 0xda0   : > { %1866 = vmatmul.mubr.msk.bf16.vlgmr.msra.gmra.mrb[28].mxu0 %vm1565_vm9, %v1525_v20 }
 0xe73   : > { %v1603_v22 = vpop.f32.mrb[28].mxu0 }
 0xe74   : > { %v1604_v23 = vadd.f32 %v1704_v21, %v1603_v22  ;;  %v1867_v24 = vpop.f32.mrb[29].mxu0 }
 0xe75   : > { %v1606_v25 = vpop.f32.mrb[30].mxu0 }
 0xe76   : > { %v1609_v26 = vadd.f32 %v1604_v23, %v1422_v51  ;;  %v1868_v35 = vpop.f32.mrb[31].mxu0 }
 0xe78   : > { %1610 = vst.msk [vmem:[%s543_s29] sm:$0x1f] %vm546_vm0, %v1609_v26 }
 0xe79 PF: > { %s27_s24 = sadd.s32 1, %s1925_s24  }
 0xe7a   : > { %p24_p4 = scmp.ge.s32.totalorder %s27_s24, 4  }
 0xe7c   :  { %26 = sbr.rel (!%p24_p4) target bundleno = 3 (0x3), region = 118 }

// kernel: _lambda_.11
= control target key start
LH: loop header
LB: loop body
LE: loop exit
PB: predicated region body
PF: predicated region fallthrough
CT: control target
= control target key end

     0   :  { %vm44_vm0 = vcmask 254976   ;;  %s667_s0 = inlined_call_operand.vmem [shape: f32[2,32], index: 0, kind: input, shape index: {}]   ;;  %s668_s1 = inlined_call_operand.vmem [shape: f32[2,32], index: 1, kind: input, shape index: {}]   ;;  %s669_s2 = inlined_call_operand.vmem [shape: f32[1,32], index: 2, kind: input, shape index: {}]   ;;  %s670_s3 = inlined_call_operand.vmem [shape: f32[1,32], index: 3, kind: input, shape index: {}]   ;;  %s671_s4 = inlined_call_operand.vmem [shape: f32[1,32], index: 4, kind: input, shape index: {}]   ;;  %s672_s5 = inlined_call_operand.vmem [shape: f32[1,32], index: 5, kind: input, shape index: {}]   ;;  %s673_s6 = inlined_call_operand.vmem [shape: bf16[32,16], index: 6, kind: input, shape index: {}]   ;;  %s674_s7 = inlined_call_operand.vmem [shape: bf16[32,16], index: 7, kind: input, shape index: {}]   ;;  %s675_s8 = inlined_call_operand.vmem [shape: bf16[16,64], index: 8, kind: input, shape index: {}]   ;;  %s676_s9 = inlined_call_operand.vmem [shape: f32[1,64], index: 9, kind: input, shape index: {}]   ;;  %s677_s10 = inlined_call_operand.vmem [shape: bf16[64,5], index: 10, kind: input, shape index: {}]   ;;  %s678_s11 = inlined_call_operand.vmem [shape: f32[1,5], index: 11, kind: input, shape index: {}]   ;;  %s679_s12 = inlined_call_operand.hbm [shape: f32[2,5], index: 12, kind: output, shape index: {}]  }
   0x1   :  { %v43_v0 = vld [vmem:[%s667_s0] sm:$0x3] }
   0x2   :  { %v136_v1 = vld [vmem:[%s668_s1] sm:$0x3]  ;;  %v45_v2 = vsel %vm44_vm0, %v43_v0, 0.0 }
   0x3   :  { %v137_v3 = vsel %vm44_vm0, %v136_v1, 0.0  ;;  %46 = vadd.xlane.f32.xlu0 %v45_v2 }
   0x7   :  { %138 = vadd.xlane.f32.xlu0 %v137_v3 }
   0x8   :  { %17 = vsyncpa [#allocation3], 0  ;;  %v474_v14 = vld [vmem:[%s673_s6] sm:$0xff]   ;;  %v515_v16 = vmov 0.0   ;;  %v475_v17 = vld [vmem:[%s673_s6 + $0x8] sm:$0xff]   ;;  %vm516_vm1 = vmmov 0  }
   0x9   :  { %v476_v15 = vld [vmem:[%s674_s7] sm:$0xff]   ;;  %437 = vmatprep.subr.bf16.mxu0 %v515_v16  ;;  %445 = vmatprep.subr.bf16.mxu1 %v515_v16  ;;  %v477_v18 = vld [vmem:[%s674_s7 + $0x8] sm:$0xff]   ;;  %vm92_vm2 = vcmask 261120   ;;  %vm227_vm3 = vcmask 123904   ;;  %vm260_vm4 = vcmask 130048   ;;  %v481_v2 = vld [vmem:[%s677_s10 + $0x10] sm:$0xff]  }
   0xa   :  { %438 = vmatpush3.bf16.msra.mxu0 %v474_v14  ;;  %446 = vmatpush3.bf16.msra.mxu1 %v476_v15  ;;  %v405_v26 = vld [vmem:[%s669_s2] ss:$0 sm:$0xff]  ;;  %v480_v53 = vld [vmem:[%s677_s10 + $0x8] sm:$0xff]   ;;  %v482_v3 = vld [vmem:[%s677_s10 + $0x18] sm:$0xff]   ;;  %vm345_vm5 = vcmask 523264   ;;  %s517_s26 = smov [#allocation2]  }
   0xb   :  { %439 = vmatprep.subr.bf16.mxu0 %v515_v16  ;;  %441 = vmatprep.mubr.msk.bf16.mxu0 %vm516_vm1, %v515_v16  ;;  %v406_v28 = vld [vmem:[%s670_s3] ss:$0 sm:$0xff]  ;;  %vm389_vm6 = vcmask 33792  }
   0xc   :  { %447 = vmatprep.subr.bf16.mxu1 %v515_v16  ;;  %449 = vmatprep.mubr.msk.bf16.mxu1 %vm516_vm1, %v515_v16  ;;  %v410_v31 = vld [vmem:[%s671_s4] ss:$0 sm:$0xff] }
   0xd   :  { %v411_v34 = vld [vmem:[%s672_s5] ss:$0 sm:$0xff] }
   0xe   :  { %440 = vmatpush3.bf16.msra.mxu0 %v475_v17  ;;  %448 = vmatpush3.bf16.msra.mxu1 %v477_v18  ;;  %v478_v51 = vld [vmem:[%s675_s8] sm:$0xff]  }
   0xf   :  { %453 = vmatprep.subr.bf16.mxu0 %v515_v16  ;;  %459 = vmatprep.subr.bf16.mxu1 %v515_v16  ;;  %v479_v52 = vld [vmem:[%s677_s10] sm:$0xff]   ;;  %s397_s10 = sshll.u32 %s517_s26, 4  ;;  %s398_s10 = int_to_ptr.vmem [resolvable:$true] %s397_s10 }
  0x10   :  { %p496_p1 = scmp.lt.s32.totalorder %s398_s10, %s398_s10 }
  0x90   :  { %v47_v4 = vpop.xlane.xlu0 %46 }
  0x91   :  { %v49_v5 = vmul.f32 0.03125, %v47_v4  ;;  %v415_v4 = vld [vmem:[%s676_s9] ss:$0 sm:$0xff]  ;;  %s491_s9 = scalar_lea.vmem %s398_s10, 32 }
  0x92   :  { %p492_p0 = scmp.ne.s32.totalorder %s398_s10, %s491_s9  ;;  %p497_p2 = scmp.lt.s32.totalorder %s491_s9, %s491_s9 }
  0x93   :  { %v50_v6 = vsub.f32 %v43_v0, %v49_v5 }
  0x94   :  { %v139_v7 = vpop.xlane.xlu0 %138  ;;  %p498_p3 = por %p497_p2, %p496_p1 }
  0x95   :  { %v140_v8 = vmul.f32 0.03125, %v139_v7  ;;  %v51_v9 = vmul.f32 %v50_v6, %v50_v6 }
  0x96   :  { %p499_p4 = pnand %p498_p3, %p492_p0 }
  0x97   :  { %v141_v10 = vsub.f32 %v136_v1, %v140_v8  ;;  %v52_v11 = vsel %vm44_vm0, %v51_v9, 0.0 }
  0x98   :  { %53 = vadd.xlane.f32.xlu1 %v52_v11 }
  0x99   :  { %v142_v12 = vmul.f32 %v141_v10, %v141_v10 }
  0x9b   :  { %v143_v13 = vsel %vm44_vm0, %v142_v12, 0.0  ;;  %v418_v12 = vld [vmem:[%s678_s11] ss:$0 sm:$0xff] }
  0x9c   :  { %144 = vadd.xlane.f32.xlu1 %v143_v13 }
 0x125   :  { %v54_v19 = vpop.xlane.xlu1 %53 }
 0x126   :  { %v55_v20 = vmul.f32 0.03125, %v54_v19 }
 0x128   :  { %v56_v21 = vadd.f32 1e-05, %v55_v20 }
 0x129   :  { %v145_v22 = vpop.xlane.xlu1 %144 }
 0x12a   :  { %483 = vrsqrt.f32 %v56_v21  ;;  %v146_v23 = vmul.f32 0.03125, %v145_v22 }
 0x12c   :  { %v147_v24 = vadd.f32 1e-05, %v146_v23 }
 0x12e   :  { %485 = vrsqrt.f32 %v147_v24 }
 0x134   :  { %v484_v25 = vpop.eup %483 }
 0x135   :  { %v58_v27 = vmul.f32 %v484_v25, %v50_v6 }
 0x137   :  { %v66_v29 = vmul.f32 %v405_v26, %v58_v27 }
 0x138   :  { %v486_v30 = vpop.eup %485 }
 0x139   :  { %v74_v32 = vadd.f32 %v406_v28, %v66_v29  ;;  %v149_v33 = vmul.f32 %v486_v30, %v141_v10 }
 0x13b   :  { %v75_v35 = vpack.c.bf16 %v74_v32, %v74_v32  ;;  %v157_v36 = vmul.f32 %v410_v31, %v149_v33 }
 0x13d   :  { %442 = vmatmul.mubr.msk.bf16.vlgmr.msra.gmra.mrb[0].mxu0 %vm92_vm2, %v75_v35  ;;  %v165_v37 = vadd.f32 %v411_v34, %v157_v36 }
 0x13e   :  { %455 = vmatprep.mubr.msk.bf16.mxu0 %vm516_vm1, %v515_v16  ;;  %454 = vmatpush3.bf16.msra.mxu0 %v478_v51 }
 0x13f   :  { %v166_v38 = vpack.c.bf16 %v165_v37, %v165_v37 }
 0x141   :  { %450 = vmatmul.mubr.msk.bf16.vlgmr.msra.gmra.mrb[0].mxu1 %vm92_vm2, %v166_v38 }
 0x142   :  { %467 = vmatprep.mubr.msk.bf16.mxu1 %vm516_vm1, %v515_v16  ;;  %460 = vmatpush3.bf16.msra.mxu1 %v479_v52 }
 0x143   :  { %461 = vmatprep.subr.bf16.mxu1 %v515_v16 }
 0x146   :  { %462 = vmatpush3.bf16.msra.mxu1 %v480_v53 }
 0x147   :  { %463 = vmatprep.subr.bf16.mxu1 %v515_v16 }
 0x14a   :  { %464 = vmatpush3.bf16.msra.mxu1 %v481_v2 }
 0x14b   :  { %465 = vmatprep.subr.bf16.mxu1 %v515_v16 }
 0x14e   :  { %466 = vmatpush3.bf16.msra.mxu1 %v482_v3 }
 0x210   :  { %v130_v39 = vpop.f32.mrb[0].mxu0 }
 0x211   :  { %v226_v40 = vmul.f32 %v130_v39, %v130_v39  ;;  %v443_v41 = vpop.f32.mrb[1].mxu0 }
 0x212   :  { %v133_v42 = vpop.f32.mrb[2].mxu0 }
 0x213   :  { %v444_v43 = vpop.f32.mrb[3].mxu0  ;;  %v228_v44 = vsel %vm227_vm3, %v226_v40, 0.0 }
 0x214   :  { %229 = vadd.xlane.f32.xlu0 %v228_v44  ;;  %v220_v45 = vpop.f32.mrb[0].mxu1 }
 0x215   :  { %v234_v46 = vmul.f32 %v220_v45, %v220_v45  ;;  %v451_v47 = vpop.f32.mrb[1].mxu1 }
 0x216   :  { %v223_v48 = vpop.f32.mrb[2].mxu1 }
 0x217   :  { %v452_v49 = vpop.f32.mrb[3].mxu1  ;;  %v235_v50 = vsel %vm227_vm3, %v234_v46, 0.0 }
 0x218   :  { %236 = vadd.xlane.f32.xlu1 %v235_v50 }
 0x2a1   :  { %v230_v54 = vpop.xlane.xlu0 %229 }
 0x2a2   :  { %v231_v55 = vadd.f32 1e-12, %v230_v54 }
 0x2a4   :  { %487 = vrsqrt.f32 %v231_v55 }
 0x2a5   :  { %v237_v56 = vpop.xlane.xlu1 %236 }
 0x2a6   :  { %v238_v57 = vadd.f32 1e-12, %v237_v56 }
 0x2a8   :  { %489 = vrsqrt.f32 %v238_v57 }
 0x2ae   :  { %v488_v58 = vpop.eup %487 }
 0x2af   :  { %v233_v59 = vmul.f32 %v488_v58, %v130_v39 }
 0x2b1   :  { %v241_v62 = vmul.f32 0.7, %v233_v59 }
 0x2b2   :  { %v490_v60 = vpop.eup %489 }
 0x2b3   :  { %v240_v61 = vmul.f32 %v490_v60, %v220_v45 }
 0x2b5   :  { %v242_v63 = vmul.f32 0.3, %v240_v61 }
 0x2b7   :  { %v243_v0 = vadd.f32 %v242_v63, %v241_v62 }
 0x2b9   :  { %v244_v1 = vpack.c.bf16 %v243_v0, %v243_v0 }
 0x2bb   :  { %456 = vmatmul.mubr.msk.bf16.vlgmr.msra.gmra.mrb[4].mxu0 %vm260_vm4, %v244_v1 }
 0x38e   :  { %v298_v5 = vpop.f32.mrb[4].mxu0 }
 0x38f   :  { %v299_v6 = vadd.f32 %v415_v4, %v298_v5  ;;  %v457_v7 = vpop.f32.mrb[5].mxu0 }
 0x390   :  { %v301_v8 = vpop.f32.mrb[6].mxu0 }
 0x391   :  { %v304_v9 = vmax.f32 %v299_v6, 0.0  ;;  %v458_v10 = vpop.f32.mrb[7].mxu0 }
 0x393   :  { %v305_v11 = vpack.c.bf16 %v304_v9, %v304_v9 }
 0x395   :  { %468 = vmatmul.mubr.msk.bf16.vlgmr.msra.gmra.mrb[4].mxu1 %vm345_vm5, %v305_v11 }
 0x468   :  { %v383_v13 = vpop.f32.mrb[4].mxu1 }
 0x469   :  { %v384_v14 = vadd.f32 %v418_v12, %v383_v13  ;;  %v469_v15 = vpop.f32.mrb[5].mxu1 }
 0x46a   :  { %v386_v16 = vpop.f32.mrb[6].mxu1 }
 0x46b   :  { %v470_v17 = vpop.f32.mrb[7].mxu1  ;;  %390 = vst.msk [vmem:[#allocation2] sm:$0x3] %vm389_vm6, %v384_v14 }
 0x46c   :  { %502 = shalt.err (!%p499_p4)
}
 0x46d   :  { %s503_s11 = scalar_lea.hbm %s679_s12, 32 }
 0x46e   :  { %p504_p5 = scmp.ne.s32.totalorder %s679_s12, %s503_s11  ;;  %p507_p6 = scmp.lt.u32.totalorder %s503_s11, %s679_s12 }
 0x470   :  { %p509_p7 = pnand %p507_p6, %p504_p5 }
 0x472   :  { %512 = shalt.err (!%p509_p7)
}
 0x473   :  { %400 = dma.vmem_to_hbm [thread:$0]  %s398_s10, 32, %s679_s12, [#allocation3]  }
 0x474   :  { %513 = dma.done.wait [#allocation3], 32  }
 0x475   :  { %514 = vsyncadd [#allocation3], 4294967264 }
 0x476   :  { %404 = vsyncpa [#allocation3], 1 }

// kernel: _lambda_.9
= control target key start
LH: loop header
LB: loop body
LE: loop exit
PB: predicated region body
PF: predicated region fallthrough
CT: control target
= control target key end

     0   :  { %s2304_s0 = inlined_call_operand.vmem [shape: s32[2], index: 0, kind: input, shape index: {}]   ;;  %s2305_s1 = inlined_call_operand.vmem [shape: f32[2,8,32], index: 1, kind: input, shape index: {}]   ;;  %s2306_s2 = inlined_call_operand.vmem [shape: f32[1,32], index: 2, kind: input, shape index: {}]   ;;  %s2307_s3 = inlined_call_operand.vmem [shape: f32[1,32], index: 3, kind: input, shape index: {}]   ;;  %s2308_s4 = inlined_call_operand.vmem [shape: bf16[32,32], index: 4, kind: input, shape index: {}]   ;;  %s2309_s5 = inlined_call_operand.vmem [shape: f32[1,32], index: 5, kind: input, shape index: {}]   ;;  %s2310_s6 = inlined_call_operand.vmem [shape: bf16[32,32], index: 6, kind: input, shape index: {}]   ;;  %s2311_s7 = inlined_call_operand.vmem [shape: f32[1,32], index: 7, kind: input, shape index: {}]   ;;  %s2312_s8 = inlined_call_operand.vmem [shape: bf16[32,32], index: 8, kind: input, shape index: {}]   ;;  %s2313_s9 = inlined_call_operand.vmem [shape: f32[1,32], index: 9, kind: input, shape index: {}]   ;;  %s2314_s10 = inlined_call_operand.vmem [shape: bf16[32,32], index: 10, kind: input, shape index: {}]   ;;  %s2315_s11 = inlined_call_operand.vmem [shape: f32[1,32], index: 11, kind: input, shape index: {}]   ;;  %s2316_s12 = inlined_call_operand.vmem [shape: f32[1,32], index: 12, kind: input, shape index: {}]   ;;  %s2317_s13 = inlined_call_operand.vmem [shape: f32[1,32], index: 13, kind: input, shape index: {}]   ;;  %s2318_s14 = inlined_call_operand.vmem [shape: bf16[32,64], index: 14, kind: input, shape index: {}]   ;;  %s2319_s15 = inlined_call_operand.vmem [shape: f32[1,64], index: 15, kind: input, shape index: {}]   ;;  %s2320_s16 = inlined_call_operand.vmem [shape: bf16[64,32], index: 16, kind: input, shape index: {}]   ;;  %s2321_s17 = inlined_call_operand.vmem [shape: f32[1,32], index: 17, kind: input, shape index: {}]   ;;  %s2322_s18 = inlined_call_operand.vmem [shape: f32[2,8,32], index: 18, kind: output, shape index: {}]  }
   0x1   :  { %2323 = sst [smem:[#allocation5_spill]] %s2304_s0 }
   0x2   :  { %2324 = sst [smem:[#allocation6_spill]] %s2305_s1  ;;  %s2327_s29 = sld [smem:[#allocation5_spill]] }
   0x3   :  { %2325 = sst [smem:[#allocation7_spill]] %s2306_s2 }
   0x4   :  { %2326 = sst [smem:[#allocation8_spill]] %s2316_s12 }
   0x8   :  { %s23_s12 = sshll.u32 %s2327_s29, 4  ;;  %s24_s12 = int_to_ptr.vmem [resolvable:$true] %s23_s12 }
   0x9   :  { %s1930_s30 = scalar_lea.vmem %s24_s12, 16  ;;  %p1935_p1 = scmp.lt.s32.totalorder %s24_s12, %s24_s12 }
   0xa   :  { %p1931_p0 = scmp.ne.s32.totalorder %s24_s12, %s1930_s30  ;;  %p1936_p2 = scmp.lt.s32.totalorder %s1930_s30, %s1930_s30 }
   0xc   :  { %p1937_p3 = por %p1936_p2, %p1935_p1 }
   0xe   :  { %p1938_p4 = pnand %p1937_p3, %p1931_p0 }
  0x10   :  { %1941 = shalt.err (!%p1938_p4)  }
  0x11   :  { %s1952_s0 = smov [#allocation3]  }
  0x12   :  { %26 = dma.vmem_to_smem %s24_s12, 16, %s1952_s0, [#allocation2] }
  0x13   :  { %1946 = dma.done.wait [#allocation2], 16 }
  0x14   :  { %1947 = vsyncadd [#allocation2], 4294967280 }
  0x15   :  { %28 = sfence }
  0x16   :  { %s2057_s19 = smov 0  }
  0x17 LB: > { %s2063_s1 = sadd.s32 4294967295, %s1950_s19   ;;  %p1678_p5 = scmp.ge.s32.totalorder %s1950_s19, 1  ;;  %s1950_s19 = sphi %s2057_s19, %s34_s19  }
  0x18   : > { %p493_p6 = scmp.lt.s32.totalorder %s1950_s19, 3 }
  0x1a   : > { %p494_p7 = pnand %p1678_p5, %p493_p6 }
  0x1b   : > { %p543_p8 = scmp.lt.s32.totalorder (!%p494_p7), %s2063_s1, 1  ;;  %vm553_vm0 = vcmask (!%p494_p7), 261120   ;;  %s2328_s2 = sld [smem:[#allocation6_spill]] (!%p494_p7)  ;;  %v1894_v7 = vld [vmem:[%s2308_s4] sm:$0xff] (!%p494_p7)   ;;  %v1953_v9 = vmov (!%p494_p7), 0.0   ;;  %v1896_v10 = vld [vmem:[%s2308_s4 + $0x8] sm:$0xff] (!%p494_p7)   ;;  %v782_v51 = vlaneseq (!%p494_p7) }
  0x1c   : > { %497 = sbr.rel (%p494_p7) target bundleno = 3732 (0xe94), region = 88  ;;  %v1895_v8 = vld [vmem:[%s2312_s8] sm:$0xff] (!%p494_p7)   ;;  %1763 = vmatprep.subr.bf16.mxu1 (!%p494_p7), %v1953_v9  ;;  %1779 = vmatprep.subr.bf16.mxu0 (!%p494_p7), %v1953_v9  ;;  %v1897_v11 = vld [vmem:[%s2312_s8 + $0x8] sm:$0xff] (!%p494_p7)   ;;  %vm1954_vm1 = vmmov (!%p494_p7), 0   ;;  %vm857_vm2 = vcmask (!%p494_p7), 1043456   ;;  %vm795_vm3 = vcmask (!%p494_p7), 64512  }
  0x1d   : > { %1764 = vmatpush3.bf16.msra.mxu1 (!%p494_p7), %v1894_v7  ;;  %1780 = vmatpush3.bf16.msra.mxu0 (!%p494_p7), %v1895_v8  ;;  %v1682_v18 = vld [vmem:[%s2307_s3] ss:$0 sm:$0xff] (!%p494_p7)  ;;  %v1899_v23 = vld [vmem:[%s2310_s6 + $0x8] sm:$0xff] (!%p494_p7)   ;;  %s781_s24 = sld [smem:[#allocation3 + %s2063_s1]] (!%p494_p7)  ;;  %v783_v52 = vshrl.u32 (!%p494_p7), %v782_v51, 7  ;;  %v785_v53 = vand.u32 (!%p494_p7), 127, %v782_v51 }
  0x1e   : > { %1765 = vmatprep.subr.bf16.mxu1 (!%p494_p7), %v1953_v9  ;;  %1781 = vmatprep.subr.bf16.mxu0 (!%p494_p7), %v1953_v9  ;;  %v1898_v21 = vld [vmem:[%s2310_s6] sm:$0xff] (!%p494_p7)   ;;  %v1956_v55 = vmov (!%p494_p7), -1e+09   ;;  %s1958_s29 = smov (!%p494_p7), 104   ;;  %vm1575_vm7 = vcmask (!%p494_p7), 523264  }
  0x1f   : > { %1767 = vmatprep.mubr.msk.bf16.mxu1 (!%p494_p7), %vm1954_vm1, %v1953_v9  ;;  %1783 = vmatprep.mubr.msk.bf16.mxu0 (!%p494_p7), %vm1954_vm1, %v1953_v9  ;;  %v1691_v24 = vld [vmem:[%s2313_s9] ss:$0 sm:$0xff] (!%p494_p7)  ;;  %vm786_vm4 = vcmp.le.s32.totalorder (!%p494_p7), %v785_v53, %v783_v52 }
  0x20   : > { %v1683_v35 = vld [vmem:[%s2309_s5] ss:$0 sm:$0xff] (!%p494_p7) }
  0x21   : > { %1766 = vmatpush3.bf16.msra.mxu1 (!%p494_p7), %v1896_v10  ;;  %1782 = vmatpush3.bf16.msra.mxu0 (!%p494_p7), %v1897_v11  ;;  %v1687_v37 = vld [vmem:[%s2311_s7] ss:$0 sm:$0xff] (!%p494_p7) }
  0x22   : > { %1771 = vmatprep.subr.bf16.mxu1 (!%p494_p7), %v1953_v9  ;;  %1793 = vmatprep.subr.bf16.mxu0 (!%p494_p7), %v1953_v9 }
  0x23   : > { %s2069_s12 = scalar_select %p543_p8, %s2063_s1, 1  ;;  %v787_v54 = vstv %s781_s24 }
  0x24   : > { %vm788_vm5 = vcmp.lt.s32.totalorder %v785_v53, %v787_v54  ;;  %s1957_s1 = smov 112  }
  0x25   : > { %s1679_s20 = sshll.u32 %s2069_s12, 3  ;;  %vm789_vm6 = vmand %vm786_vm4, %vm788_vm5 }
  0x26   : > { %s546_s23 = scalar_lea.vmem %s2328_s2, %s1679_s20  ;;  %s2329_s2 = sld [smem:[#allocation7_spill]]  ;;  %v2163_v56 = vsel %vm789_vm6, 0.0, %v1956_v55 }
  0x27   : > { %v2077_v0 = vld [vmem:[%s546_s23] sm:$0xff]  ;;  %s1955_s23 = smov 120   ;;  %s550_s22 = scalar_lea.vmem %s2322_s18, %s1679_s20 }
  0x28   : > { %v554_v1 = vsel %vm553_vm0, %v2077_v0, 0.0 }
  0x29   : > { %555 = vadd.xlane.f32.xlu0 %v554_v1 }
  0x2c   : > { %v1681_v16 = vld [vmem:[%s2329_s2] ss:$0 sm:$0xff] }
  0xb6   : > { %v556_v2 = vpop.xlane.xlu0 %555 }
  0xb7   : > { %v558_v3 = vmul.f32 0.03125, %v556_v2 }
  0xb9   : > { %v559_v4 = vsub.f32 %v2077_v0, %v558_v3 }
  0xbb   : > { %v560_v5 = vmul.f32 %v559_v4, %v559_v4 }
  0xbd   : > { %v561_v6 = vsel %vm553_vm0, %v560_v5, 0.0 }
  0xbe   : > { %562 = vadd.xlane.f32.xlu0 %v561_v6 }
 0x14b   : > { %v563_v12 = vpop.xlane.xlu0 %562 }
 0x14c   : > { %v564_v13 = vmul.f32 0.03125, %v563_v12 }
 0x14e   : > { %v565_v14 = vadd.f32 1e-05, %v564_v13 }
 0x150   : > { %1906 = vrsqrt.f32 %v565_v14 }
 0x15a   : > { %v1907_v15 = vpop.eup %1906 }
 0x15b   : > { %v567_v17 = vmul.f32 %v1907_v15, %v559_v4 }
 0x15d   : > { %v575_v19 = vmul.f32 %v1681_v16, %v567_v17 }
 0x15f   : > { %v583_v20 = vadd.f32 %v1682_v18, %v575_v19 }
 0x161   : > { %v584_v22 = vpack.c.bf16 %v583_v20, %v583_v20 }
 0x163   : > { %1768 = vmatmul.mubr.msk.bf16.vlgmr.msra.gmra.mrb[0].mxu1 %vm553_vm0, %v584_v22  ;;  %1784 = vmatmul.mubr.msk.bf16.vlgmr.msra.gmra.mrb[0].mxu0 %vm553_vm0, %v584_v22 }
 0x164   : > { %1772 = vmatpush3.bf16.msra.mxu1 %v1898_v21  ;;  %1775 = vmatprep.mubr.msk.bf16.mxu1 %vm1954_vm1, %v1953_v9  ;;  %v792_v21 = vld [vmem:[%s2314_s10 + $0x4] sm:$0xf] }
 0x165   : > { %1773 = vmatprep.subr.bf16.mxu1 %v1953_v9  ;;  %1795 = vmatprep.mubr.msk.bf16.mxu0 %vm1954_vm1, %v1953_v9 }
 0x168   : > { %1774 = vmatpush3.bf16.msra.mxu1 %v1899_v23 }
 0x169   : > { %1787 = vmatprep.subr.bf16.mxu1 %v1953_v9 }
 0x16b   : > { %1776 = vmatmul.mubr.msk.bf16.vlgmr.msra.gmra.mrb[4].mxu1 %vm553_vm0, %v584_v22  ;;  %v1020_v22 = vsel %vm857_vm2, %v792_v21, 0 }
 0x16c   : > { %1789 = vmatprep.mubr.msk.bf16.mxu1 %vm1954_vm1, %v1953_v9 }
 0x236   : > { %v645_v25 = vpop.f32.mrb[0].mxu1  ;;  %v771_v26 = vpop.f32.mrb[0].mxu0 }
 0x237   : > { %v772_v27 = vadd.f32 %v1691_v24, %v771_v26  ;;  %v1769_v28 = vpop.f32.mrb[1].mxu1  ;;  %v1785_v29 = vpop.f32.mrb[1].mxu0  ;;  %v646_v38 = vadd.f32 %v1683_v35, %v645_v25 }
 0x238   : > { %v648_v30 = vpop.f32.mrb[2].mxu1  ;;  %v774_v31 = vpop.f32.mrb[2].mxu0 }
 0x239   : > { %v2131_v32 = vpack.c.bf16 %v772_v27, %v772_v27  ;;  %v1770_v33 = vpop.f32.mrb[3].mxu1  ;;  %v1786_v34 = vpop.f32.mrb[3].mxu0  ;;  %v777_v43 = vmul.f32 0.35355338, %v646_v38  ;;  %v791_v27 = vld [vmem:[%s2314_s10] sm:$0xf] }
 0x23a   : > { %v1066_v30 = vsel %vm857_vm2, %v791_v27, 0 }
 0x23b   : > { %v859_v36 = vsel %vm857_vm2, %v2131_v32, 0  ;;  %v2148_v47 = vpack.c.bf16 %v777_v43, %v777_v43 }
 0x23c   : > { %1794 = vmatpush3.bf16.msra.mxu0 %v859_v36 }
 0x23d   : > { %1805 = vmatprep.subr.bf16.mxu0 %v1953_v9 }
 0x23e   : > { %v708_v39 = vpop.f32.mrb[4].mxu1 }
 0x23f   : > { %v709_v40 = vadd.f32 %v1687_v37, %v708_v39  ;;  %v1777_v41 = vpop.f32.mrb[5].mxu1 }
 0x240   : > { %v711_v42 = vpop.f32.mrb[6].mxu1 }
 0x241   : > { %v2142_v44 = vpack.c.bf16 %v709_v40, %v709_v40  ;;  %v1778_v45 = vpop.f32.mrb[7].mxu1 }
 0x243   : > { %906 = vrot.lane.b32.xlu1 %v2142_v44, %s1955_s23  ;;  %v800_v46 = vsel %vm795_vm3, %v2142_v44, 0 }
 0x244   : > { %1788 = vmatpush3.bf16.xpose.msra.mxu1 %v800_v46 }
 0x245   : > { %1799 = vmatprep.subr.bf16.mxu1 %v1953_v9 }
 0x247   : > { %903 = vrot.lane.b32.xlu1 %v2148_v47, %s1955_s23 }
 0x24b   : > { %1790 = vmatmul.mubr.msk.bf16.vlgmr.msra.gmra.mrb[8].mxu1 %vm795_vm3, %v2148_v47 }
 0x24c   : > { %1801 = vmatprep.mubr.msk.bf16.mxu1 %vm1954_vm1, %v1953_v9 }
 0x2b5   : > { %v907_v48 = vpop.permute.xlu1 %906 }
 0x2b6   : > { %v912_v49 = vsel %vm795_vm3, %v907_v48, 0 }
 0x2b7   : > { %1800 = vmatpush3.bf16.xpose.msra.mxu1 %v912_v49 }
 0x2b8   : > { %1811 = vmatprep.subr.bf16.mxu1 %v1953_v9 }
 0x2b9   : > { %v904_v50 = vpop.permute.xlu1 %903 }
 0x2be   : > { %1802 = vmatmul.mubr.msk.bf16.vlgmr.msra.gmra.mrb[12].mxu1 %vm795_vm3, %v904_v50 }
 0x2bf   : > { %1813 = vmatprep.mubr.msk.bf16.mxu1 %vm1954_vm1, %v1953_v9  ;;  %1812 = vmatpush3.bf16.msra.mxu1 %v1020_v22 }
 0x2c0   : > { %1823 = vmatprep.subr.bf16.mxu1 %v1953_v9 }
 0x31e   : > { %v836_v57 = vpop.f32.mrb[8].mxu1 }
 0x31f   : > { %v837_v58 = vadd.f32 %v836_v57, %v2163_v56  ;;  %v1791_v59 = vpop.f32.mrb[9].mxu1 }
 0x320   : > { %v839_v60 = vpop.f32.mrb[10].mxu1 }
 0x321   : > { %v1792_v61 = vpop.f32.mrb[11].mxu1  ;;  %v842_v62 = vsel %vm795_vm3, %v837_v58, -inf }
 0x322   : > { %843 = vmax.xlane.f32.xlu0 %v842_v62 }
 0x391   : > { %v948_v63 = vpop.f32.mrb[12].mxu1 }
 0x392   : > { %v949_v1 = vadd.f32 %v948_v63, %v2163_v56  ;;  %v1803_v2 = vpop.f32.mrb[13].mxu1 }
 0x393   : > { %v951_v3 = vpop.f32.mrb[14].mxu1 }
 0x394   : > { %v1804_v4 = vpop.f32.mrb[15].mxu1  ;;  %v954_v5 = vsel %vm795_vm3, %v949_v1, -inf }
 0x395   : > { %955 = vmax.xlane.f32.xlu1 %v954_v5 }
 0x3a6   : > { %1108 = vrot.lane.b32.xlu1 %v2148_v47, %s1957_s1 }
 0x3af   : > { %v844_v6 = vpop.xlane.xlu0 %843 }
 0x3b0   : > { %v845_v7 = vsub.f32 %v837_v58, %v844_v6 }
 0x3b2   : > { %v846_v8 = vmul.f32 1.442695, %v845_v7 }
 0x3b4   : > { %1908 = vpow2.f32 %v846_v8 }
 0x3be   : > { %v1909_v10 = vpop.eup %1908 }
 0x3bf   : > { %v848_v11 = vsel %vm795_vm3, %v1909_v10, 0.0 }
 0x3c0   : > { %849 = vadd.xlane.f32.xlu0 %v848_v11 }
 0x422   : > { %v956_v12 = vpop.xlane.xlu1 %955 }
 0x423   : > { %v957_v13 = vsub.f32 %v949_v1, %v956_v12 }
 0x425   : > { %v958_v14 = vmul.f32 1.442695, %v957_v13 }
 0x426   : > { %v1109_v45 = vpop.permute.xlu1 %1108 }
 0x427   : > { %1910 = vpow2.f32 %v958_v14 }
 0x431   : > { %v1911_v15 = vpop.eup %1910 }
 0x432   : > { %v960_v16 = vsel %vm795_vm3, %v1911_v15, 0.0 }
 0x433   : > { %961 = vadd.xlane.f32.xlu0 %v960_v16 }
 0x449   : > { %967 = vrot.lane.b32.xlu0 %v2131_v32, %s1955_s23 }
 0x44d   : > { %v850_v17 = vpop.xlane.xlu0 %849  ;;  %1110 = vrot.lane.b32.xlu0 %v2142_v44, %s1957_s1 }
 0x44e   : > { %1912 = vrcp.f32 %v850_v17 }
 0x458   : > { %v1913_v18 = vpop.eup %1912 }
 0x459   : > { %v852_v19 = vmul.f32 %v1913_v18, %v1909_v10 }
 0x45b   : > { %v853_v20 = vpack.c.bf16 %v852_v19, %v852_v19 }
 0x45d   : > { %1796 = vmatmul.mubr.msk.bf16.vlgmr.msra.gmra.mrb[4].mxu0 %vm795_vm3, %v853_v20 }
 0x45e   : > { %1807 = vmatprep.mubr.msk.bf16.mxu0 %vm1954_vm1, %v1953_v9 }
 0x4c0   : > { %v962_v23 = vpop.xlane.xlu0 %961 }
 0x4c1   : > { %1914 = vrcp.f32 %v962_v23 }
 0x4c4   : > { %v968_v24 = vpop.permute.xlu0 %967 }
 0x4c5   : > { %v973_v25 = vsel %vm857_vm2, %v968_v24, 0 }
 0x4c6   : > { %1806 = vmatpush3.bf16.msra.mxu0 %v973_v25 }
 0x4c7   : > { %1817 = vmatprep.subr.bf16.mxu0 %v1953_v9 }
 0x4c8   : > { %v1111_v37 = vpop.permute.xlu0 %1110 }
 0x4c9   : > { %v1116_v42 = vsel %vm795_vm3, %v1111_v37, 0 }
 0x4cb   : > { %v1915_v26 = vpop.eup %1914 }
 0x4cc   : > { %v964_v28 = vmul.f32 %v1915_v26, %v1911_v15 }
 0x4ce   : > { %v965_v29 = vpack.c.bf16 %v964_v28, %v964_v28 }
 0x4d0   : > { %1808 = vmatmul.mubr.msk.bf16.vlgmr.msra.gmra.mrb[8].mxu0 %vm795_vm3, %v965_v29 }
 0x4d1   : > { %1818 = vmatpush3.bf16.msra.mxu0 %v1066_v30  ;;  %1819 = vmatprep.mubr.msk.bf16.mxu0 %vm1954_vm1, %v1953_v9 }
 0x4d2   : > { %1829 = vmatprep.subr.bf16.mxu0 %v1953_v9 }
 0x530   : > { %v895_v31 = vpop.f32.mrb[4].mxu0 }
 0x531   : > { %v901_v33 = vpack.c.bf16 %v895_v31, %v895_v31  ;;  %v1797_v34 = vpop.f32.mrb[5].mxu0 }
 0x532   : > { %v898_v35 = vpop.f32.mrb[6].mxu0 }
 0x533   : > { %v1798_v36 = vpop.f32.mrb[7].mxu0  ;;  %1820 = vmatmul.mubr.msk.bf16.vlgmr.msra.gmra.mrb[12].mxu0 %vm795_vm3, %v901_v33  ;;  %v794_v33 = vld [vmem:[%s2314_s10 + $0xc] sm:$0xf] }
 0x534   : > { %1831 = vmatprep.mubr.msk.bf16.mxu0 %vm1954_vm1, %v1953_v9 }
 0x5a3   : > { %v1009_v38 = vpop.f32.mrb[8].mxu0 }
 0x5a4   : > { %v1015_v39 = vpack.c.bf16 %v1009_v38, %v1009_v38  ;;  %v1809_v40 = vpop.f32.mrb[9].mxu0 }
 0x5a5   : > { %v1012_v41 = vpop.f32.mrb[10].mxu0 }
 0x5a6   : > { %v1810_v43 = vpop.f32.mrb[11].mxu0  ;;  %1814 = vmatmul.mubr.msk.bf16.vlgmr.msra.gmra.mrb[16].mxu1 %vm795_vm3, %v1015_v39 }
 0x5a7   : > { %1824 = vmatpush3.bf16.xpose.msra.mxu1 %v1116_v42  ;;  %1825 = vmatprep.mubr.msk.bf16.mxu1 %vm1954_vm1, %v1953_v9 }
 0x5a8   : > { %1835 = vmatprep.subr.bf16.mxu1 %v1953_v9 }
 0x5ae   : > { %1826 = vmatmul.mubr.msk.bf16.vlgmr.msra.gmra.mrb[20].mxu1 %vm795_vm3, %v1109_v45 }
 0x5af   : > { %1837 = vmatprep.mubr.msk.bf16.mxu1 %vm1954_vm1, %v1953_v9 }
 0x606   : > { %v1102_v46 = vpop.f32.mrb[12].mxu0 }
 0x607   : > { %v1821_v48 = vpop.f32.mrb[13].mxu0 }
 0x608   : > { %v1105_v49 = vpop.f32.mrb[14].mxu0 }
 0x609   : > { %v1822_v50 = vpop.f32.mrb[15].mxu0 }
 0x679   : > { %v1056_v51 = vpop.f32.mrb[16].mxu1 }
 0x67a   : > { %v2206_v52 = vadd.f32 %v1102_v46, %v1056_v51  ;;  %v1815_v53 = vpop.f32.mrb[17].mxu1 }
 0x67b   : > { %v1059_v54 = vpop.f32.mrb[18].mxu1  ;;  %v1707_v53 = vld [vmem:[%s2315_s11] ss:$0 sm:$0xff] }
 0x67c   : > { %v1816_v55 = vpop.f32.mrb[19].mxu1 }
 0x681   : > { %v1152_v57 = vpop.f32.mrb[20].mxu1 }
 0x682   : > { %v1153_v58 = vadd.f32 %v1152_v57, %v2163_v56  ;;  %v1827_v59 = vpop.f32.mrb[21].mxu1 }
 0x683   : > { %v1155_v60 = vpop.f32.mrb[22].mxu1 }
 0x684   : > { %v1828_v61 = vpop.f32.mrb[23].mxu1  ;;  %v1158_v62 = vsel %vm795_vm3, %v1153_v58, -inf }
 0x685   : > { %1159 = vmax.xlane.f32.xlu0 %v1158_v62 }
 0x69b   : > { %1170 = vrot.lane.b32.xlu0 %v2131_v32, %s1957_s1 }
 0x69f   : > { %1266 = vrot.lane.b32.xlu0 %v2148_v47, %s1958_s29 }
 0x712   : > { %v1160_v63 = vpop.xlane.xlu0 %1159 }
 0x713   : > { %v1161_v1 = vsub.f32 %v1153_v58, %v1160_v63 }
 0x715   : > { %v1162_v2 = vmul.f32 1.442695, %v1161_v1 }
 0x716   : > { %v1171_v3 = vpop.permute.xlu0 %1170 }
 0x717   : > { %1916 = vpow2.f32 %v1162_v2  ;;  %v1176_v4 = vsel %vm857_vm2, %v1171_v3, 0  ;;  %v1900_v2 = vld [vmem:[%s2318_s14] sm:$0xff]  }
 0x718   : > { %1830 = vmatpush3.bf16.msra.mxu0 %v1176_v4 }
 0x719   : > { %1841 = vmatprep.subr.bf16.mxu0 %v1953_v9 }
 0x71a   : > { %v1267_v13 = vpop.permute.xlu0 %1266 }
 0x721   : > { %v1917_v5 = vpop.eup %1916 }
 0x722   : > { %v1164_v6 = vsel %vm795_vm3, %v1917_v5, 0.0 }
 0x723   : > { %1165 = vadd.xlane.f32.xlu1 %v1164_v6 }
 0x734   : > { %1268 = vrot.lane.b32.xlu1 %v2142_v44, %s1958_s29  ;;  %v793_v44 = vld [vmem:[%s2314_s10 + $0x8] sm:$0xf] }
 0x735   : > { %v1223_v14 = vsel %vm857_vm2, %v793_v44, 0  ;;  %v1903_v44 = vld [vmem:[%s2320_s16 + $0x8] sm:$0xff]  }
 0x736   : > { %1836 = vmatpush3.bf16.msra.mxu1 %v1223_v14  ;;  %v1904_v14 = vld [vmem:[%s2320_s16 + $0x10] sm:$0xff]  }
 0x737   : > { %1847 = vmatprep.subr.bf16.mxu1 %v1953_v9 }
 0x7b0   : > { %v1166_v7 = vpop.xlane.xlu1 %1165 }
 0x7b1   : > { %1918 = vrcp.f32 %v1166_v7 }
 0x7b4   : > { %v1269_v10 = vpop.permute.xlu1 %1268 }
 0x7b5   : > { %v1274_v12 = vsel %vm795_vm3, %v1269_v10, 0 }
 0x7bb   : > { %v1919_v47 = vpop.eup %1918 }
 0x7bc   : > { %v1168_v8 = vmul.f32 %v1919_v47, %v1917_v5 }
 0x7be   : > { %v1169_v11 = vpack.c.bf16 %v1168_v8, %v1168_v8  ;;  %v1709_v8 = vld [vmem:[%s2317_s13] ss:$0 sm:$0xff] }
 0x7c0   : > { %1832 = vmatmul.mubr.msk.bf16.vlgmr.msra.gmra.mrb[16].mxu0 %vm795_vm3, %v1169_v11 }
 0x7c1   : > { %1842 = vmatpush3.bf16.xpose.msra.mxu0 %v1274_v12  ;;  %1843 = vmatprep.mubr.msk.bf16.mxu0 %vm1954_vm1, %v1953_v9 }
 0x7c2   : > { %1853 = vmatprep.subr.bf16.mxu0 %v1953_v9 }
 0x7c8   : > { %1844 = vmatmul.mubr.msk.bf16.vlgmr.msra.gmra.mrb[20].mxu0 %vm795_vm3, %v1267_v13  ;;  %v1902_v13 = vld [vmem:[%s2320_s16] sm:$0xff]  }
 0x7c9   : > { %1855 = vmatprep.mubr.msk.bf16.mxu0 %vm1954_vm1, %v1953_v9 }
 0x893   : > { %v1212_v15 = vpop.f32.mrb[16].mxu0 }
 0x894   : > { %v1218_v16 = vpack.c.bf16 %v1212_v15, %v1212_v15  ;;  %v1833_v17 = vpop.f32.mrb[17].mxu0  ;;  %v1905_v15 = vld [vmem:[%s2320_s16 + $0x18] sm:$0xff]  }
 0x895   : > { %v1215_v18 = vpop.f32.mrb[18].mxu0 }
 0x896   : > { %v1834_v19 = vpop.f32.mrb[19].mxu0  ;;  %1838 = vmatmul.mubr.msk.bf16.vlgmr.msra.gmra.mrb[24].mxu1 %vm795_vm3, %v1218_v16  ;;  %v1710_v16 = vld [vmem:[%s2319_s15] ss:$0 sm:$0xff] }
 0x897   : > { %1849 = vmatprep.mubr.msk.bf16.mxu1 %vm1954_vm1, %v1953_v9 }
 0x89b   : > { %v1310_v20 = vpop.f32.mrb[20].mxu0 }
 0x89c   : > { %v1311_v21 = vadd.f32 %v1310_v20, %v2163_v56  ;;  %v1845_v22 = vpop.f32.mrb[21].mxu0 }
 0x89d   : > { %v1313_v23 = vpop.f32.mrb[22].mxu0 }
 0x89e   : > { %v1846_v24 = vpop.f32.mrb[23].mxu0  ;;  %v1316_v25 = vsel %vm795_vm3, %v1311_v21, -inf }
 0x89f   : > { %1317 = vmax.xlane.f32.xlu0 %v1316_v25 }
 0x8b5   : > { %1328 = vrot.lane.b32.xlu0 %v2131_v32, %s1958_s29  ;;  %v1381_v32 = vsel %vm857_vm2, %v794_v33, 0  ;;  %s2330_s29 = sld [smem:[#allocation8_spill]] }
 0x8b6   : > { %1854 = vmatpush3.bf16.msra.mxu0 %v1381_v32 }
 0x8b7   : > { %1867 = vmatprep.subr.bf16.mxu0 %v1953_v9 }
 0x8bb   : > { %v1708_v7 = vld [vmem:[%s2330_s29] ss:$0 sm:$0xff] }
 0x92c   : > { %v1318_v26 = vpop.xlane.xlu0 %1317 }
 0x92d   : > { %v1319_v27 = vsub.f32 %v1311_v21, %v1318_v26 }
 0x92f   : > { %v1320_v28 = vmul.f32 1.442695, %v1319_v27 }
 0x930   : > { %v1329_v29 = vpop.permute.xlu0 %1328 }
 0x931   : > { %1920 = vpow2.f32 %v1320_v28  ;;  %v1334_v30 = vsel %vm857_vm2, %v1329_v29, 0  ;;  %v1714_v28 = vld [vmem:[%s2321_s17] ss:$0 sm:$0xff] }
 0x932   : > { %1848 = vmatpush3.bf16.msra.mxu1 %v1334_v30 }
 0x933   : > { %1859 = vmatprep.subr.bf16.mxu1 %v1953_v9 }
 0x93b   : > { %v1921_v56 = vpop.eup %1920 }
 0x93c   : > { %v1322_v31 = vsel %vm795_vm3, %v1921_v56, 0.0 }
 0x93d   : > { %1323 = vadd.xlane.f32.xlu1 %v1322_v31 }
 0x969   : > { %v1259_v34 = vpop.f32.mrb[24].mxu1 }
 0x96a   : > { %v1265_v35 = vadd.f32 %v1259_v34, %v2206_v52  ;;  %v1839_v36 = vpop.f32.mrb[25].mxu1 }
 0x96b   : > { %v1262_v37 = vpop.f32.mrb[26].mxu1 }
 0x96c   : > { %v1840_v38 = vpop.f32.mrb[27].mxu1 }
 0x9ca   : > { %v1324_v39 = vpop.xlane.xlu1 %1323 }
 0x9cb   : > { %1922 = vrcp.f32 %v1324_v39 }
 0x9d5   : > { %v1923_v40 = vpop.eup %1922 }
 0x9d6   : > { %v1326_v41 = vmul.f32 %v1923_v40, %v1921_v56 }
 0x9d8   : > { %v1327_v42 = vpack.c.bf16 %v1326_v41, %v1326_v41 }
 0x9da   : > { %1850 = vmatmul.mubr.msk.bf16.vlgmr.msra.gmra.mrb[28].mxu1 %vm795_vm3, %v1327_v42 }
 0x9db   : > { %1863 = vmatprep.mubr.msk.bf16.mxu1 %vm1954_vm1, %v1953_v9  ;;  %1860 = vmatpush3.bf16.msra.mxu1 %v1900_v2 }
 0x9dc   : > { %1861 = vmatprep.subr.bf16.mxu1 %v1953_v9 }
 0xaad   : > { %v1370_v43 = vpop.f32.mrb[28].mxu1 }
 0xaae   : > { %v1376_v45 = vpack.c.bf16 %v1370_v43, %v1370_v43  ;;  %v1851_v46 = vpop.f32.mrb[29].mxu1 }
 0xaaf   : > { %v1373_v48 = vpop.f32.mrb[30].mxu1 }
 0xab0   : > { %v1852_v49 = vpop.f32.mrb[31].mxu1  ;;  %1856 = vmatmul.mubr.msk.bf16.vlgmr.msra.gmra.mrb[24].mxu0 %vm795_vm3, %v1376_v45 }
 0xab1   : > { %1875 = vmatprep.mubr.msk.bf16.mxu0 %vm1954_vm1, %v1953_v9  ;;  %1868 = vmatpush3.bf16.msra.mxu0 %v1902_v13 }
 0xab2   : > { %1869 = vmatprep.subr.bf16.mxu0 %v1953_v9 }
 0xab5   : > { %1870 = vmatpush3.bf16.msra.mxu0 %v1903_v44 }
 0xab6   : > { %1871 = vmatprep.subr.bf16.mxu0 %v1953_v9 }
 0xab9   : > { %1872 = vmatpush3.bf16.msra.mxu0 %v1904_v14 }
 0xaba   : > { %1873 = vmatprep.subr.bf16.mxu0 %v1953_v9 }
 0xabd   : > { %1874 = vmatpush3.bf16.msra.mxu0 %v1905_v15 }
 0xb83   : > { %v1417_v50 = vpop.f32.mrb[24].mxu0 }
 0xb84   : > { %v1423_v51 = vadd.f32 %v1417_v50, %v1265_v35  ;;  %v1857_v52 = vpop.f32.mrb[25].mxu0 }
 0xb85   : > { %v1420_v54 = vpop.f32.mrb[26].mxu0 }
 0xb86   : > { %v1424_v55 = vadd.f32 %v1423_v51, %v2077_v0  ;;  %v1858_v57 = vpop.f32.mrb[27].mxu0  ;;  %v1901_v0 = vld [vmem:[%s2318_s14 + $0x8] sm:$0xff]  }
 0xb87   : > { %1862 = vmatpush3.bf16.msra.mxu1 %v1901_v0 }
 0xb88   : > { %v1432_v58 = vadd.f32 %v1707_v53, %v1424_v55 }
 0xb8a   : > { %v1433_v59 = vsel %vm553_vm0, %v1432_v58, 0.0 }
 0xb8b   : > { %1434 = vadd.xlane.f32.xlu1 %v1433_v59 }
 0xc18   : > { %v1435_v60 = vpop.xlane.xlu1 %1434 }
 0xc19   : > { %v1436_v61 = vmul.f32 0.03125, %v1435_v60 }
 0xc1b   : > { %v1437_v62 = vsub.f32 %v1432_v58, %v1436_v61 }
 0xc1d   : > { %v1438_v63 = vmul.f32 %v1437_v62, %v1437_v62 }
 0xc1f   : > { %v1439_v1 = vsel %vm553_vm0, %v1438_v63, 0.0 }
 0xc20   : > { %1440 = vadd.xlane.f32.xlu1 %v1439_v1 }
 0xcad   : > { %v1441_v3 = vpop.xlane.xlu1 %1440 }
 0xcae   : > { %v1442_v4 = vmul.f32 0.03125, %v1441_v3 }
 0xcb0   : > { %v1443_v5 = vadd.f32 1e-05, %v1442_v4 }
 0xcb2   : > { %1924 = vrsqrt.f32 %v1443_v5 }
 0xcbc   : > { %v1925_v6 = vpop.eup %1924 }
 0xcbd   : > { %v1445_v47 = vmul.f32 %v1925_v6, %v1437_v62 }
 0xcbf   : > { %v1453_v10 = vmul.f32 %v1708_v7, %v1445_v47 }
 0xcc1   : > { %v1461_v11 = vadd.f32 %v1709_v8, %v1453_v10 }
 0xcc3   : > { %v1462_v12 = vpack.c.bf16 %v1461_v11, %v1461_v11 }
 0xcc5   : > { %1864 = vmatmul.mubr.msk.bf16.vlgmr.msra.gmra.mrb[32].mxu1 %vm553_vm0, %v1462_v12 }
 0xd98   : > { %v1523_v17 = vpop.f32.mrb[32].mxu1 }
 0xd99   : > { %v1524_v18 = vadd.f32 %v1710_v16, %v1523_v17  ;;  %v1865_v19 = vpop.f32.mrb[33].mxu1 }
 0xd9a   : > { %v1526_v20 = vpop.f32.mrb[34].mxu1 }
 0xd9b   : > { %v1529_v21 = vmul.f32 -1.702, %v1524_v18  ;;  %v1866_v22 = vpop.f32.mrb[35].mxu1 }
 0xd9d   : > { %v1530_v23 = vmul.f32 1.442695, %v1529_v21 }
 0xd9f   : > { %1926 = vpow2.f32 %v1530_v23 }
 0xda9   : > { %v1927_v24 = vpop.eup %1926 }
 0xdaa   : > { %v1532_v9 = vadd.f32 1.0, %v1927_v24 }
 0xdac   : > { %1928 = vrcp.f32 %v1532_v9 }
 0xdb6   : > { %v1929_v25 = vpop.eup %1928 }
 0xdb7   : > { %v1534_v26 = vmul.f32 %v1929_v25, %v1524_v18 }
 0xdb9   : > { %v1535_v27 = vpack.c.bf16 %v1534_v26, %v1534_v26 }
 0xdbb   : > { %1876 = vmatmul.mubr.msk.bf16.vlgmr.msra.gmra.mrb[28].mxu0 %vm1575_vm7, %v1535_v27 }
 0xe8e   : > { %v1613_v29 = vpop.f32.mrb[28].mxu0 }
 0xe8f   : > { %v1614_v30 = vadd.f32 %v1714_v28, %v1613_v29  ;;  %v1877_v56 = vpop.f32.mrb[29].mxu0 }
 0xe90   : > { %v1616_v31 = vpop.f32.mrb[30].mxu0 }
 0xe91   : > { %v1619_v33 = vadd.f32 %v1614_v30, %v1432_v58  ;;  %v1878_v32 = vpop.f32.mrb[31].mxu0 }
 0xe93   : > { %1620 = vst.msk [vmem:[%s550_s22] sm:$0xff] %vm553_vm0, %v1619_v33 }
 0xe94 PF: > { %s34_s19 = sadd.s32 1, %s1950_s19  }
 0xe95   : > { %p31_p9 = scmp.ge.s32.totalorder %s34_s19, 4  }
 0xe97   :  { %33 = sbr.rel (!%p31_p9) target bundleno = 23 (0x17), region = 118 }

</bundles_post_ra>
